<compile_context>
chip_gen: v7x
topology: tpu7x:2x2x1
jax: 0.10.0
libtpu: 0.0.40
codegen_flags: <defaults>
</compile_context>

<pallas_src>
import jax
import jax.numpy as jnp
from jax.experimental import pallas as pl
from jax.experimental.pallas import tpu as pltpu

EPS = 1e-6


def ln_linear_kernel(x_ref, w_ref, b_ref, g_ref, beta_ref, o_ref):
    # x_ref:    (tm, C)  input rows (f32)
    # w_ref:    (F, C)   linear weight in torch layout (out, in)
    # b_ref:    (1, F)   linear bias
    # g_ref:    (1, C)   layernorm gamma
    # beta_ref: (1, C)   layernorm beta
    x = x_ref[...]                                    # (tm, C)
    inv_c = 1.0 / x.shape[-1]

    # Single-traversal LayerNorm statistics (biased variance, like torch).
    s1 = jnp.sum(x, axis=-1, keepdims=True)           # sum(x)
    s2 = jnp.sum(x * x, axis=-1, keepdims=True)       # sum(x^2)
    mean = s1 * inv_c
    var = s2 * inv_c - mean * mean
    xhat = (x - mean) * jax.lax.rsqrt(var + EPS)
    y = xhat * g_ref[...] + beta_ref[...]              # (tm, C)

    # Linear: y @ W^T + b.  Transposed-RHS contraction runs directly on the
    # MXU; no separate weight transpose pass is needed.
    out = jax.lax.dot_general(
        y, w_ref[...],
        dimension_numbers=(((1,), (1,)), ((), ())),
        preferred_element_type=jnp.float32)            # (tm, F)
    o_ref[...] = (out + b_ref[...]).astype(o_ref.dtype)


def layernorm_linear(x_nhwc, gamma, beta, weight, bias, *, tm=392):
    """x_nhwc: (N,H,W,C) f32.  weight: (F,C) torch-style.  bias: (F,)."""
    N, H, W, C = x_nhwc.shape
    F = weight.shape[0]
    rows = N * H * W
    assert rows % tm == 0 and tm % 8 == 0, (rows, tm)

    x2d = x_nhwc.reshape(rows, C)
    b2d = bias.reshape(1, F)
    g2d = gamma.reshape(1, C)
    bt2d = beta.reshape(1, C)

    flops = 2 * rows * C * F
    bytes_accessed = 4 * (rows * C + rows * F + F * C + F + 2 * C)

    out2d = pl.pallas_call(
        ln_linear_kernel,
        out_shape=jax.ShapeDtypeStruct((rows, F), x_nhwc.dtype),
        grid_spec=pltpu.PrefetchScalarGridSpec(
            num_scalar_prefetch=0,
            grid=(rows // tm,),                       # 2 steps at tm=392
            in_specs=[
                pl.BlockSpec((tm, C), lambda i: (i, 0)),   # x rows
                pl.BlockSpec((F, C), lambda i: (0, 0)),    # weight (resident)
                pl.BlockSpec((1, F), lambda i: (0, 0)),    # bias
                pl.BlockSpec((1, C), lambda i: (0, 0)),    # gamma
                pl.BlockSpec((1, C), lambda i: (0, 0)),    # beta
            ],
            out_specs=pl.BlockSpec((tm, F), lambda i: (i, 0)),
        ),
        compiler_params=pltpu.CompilerParams(
            dimension_semantics=("parallel",),
            vmem_limit_bytes=32 << 20),
        cost_estimate=pl.CostEstimate(
            flops=flops, transcendentals=rows, bytes_accessed=bytes_accessed),
    )(x2d, weight, b2d, g2d, bt2d)

    return out2d.reshape(N, H, W, F)


def reference(x_nhwc, gamma, beta, weight, bias):
    mean = jnp.mean(x_nhwc, axis=-1, keepdims=True)
    var = jnp.mean((x_nhwc - mean) ** 2, axis=-1, keepdims=True)
    xhat = (x_nhwc - mean) / jnp.sqrt(var + EPS)
    y = xhat * gamma + beta
    return jnp.einsum("nhwc,fc->nhwf", y, weight) + bias


if __name__ == "__main__":
    key = jax.random.PRNGKey(0)
    k_x, k_g, k_b, k_w, k_bias = jax.random.split(key, 5)

    N, H, W, C, F = 1, 28, 28, 256, 1024

    x = jax.random.normal(k_x, (N, H, W, C), dtype=jnp.float32)
    gamma = 1.0 + 0.01 * jax.random.normal(k_g, (C,), dtype=jnp.float32)
    beta = 0.01 * jax.random.normal(k_b, (C,), dtype=jnp.float32)
    weight = 0.02 * jax.random.normal(k_w, (F, C), dtype=jnp.float32)   # torch Linear: (out, in)
    bias = 0.01 * jax.random.normal(k_bias, (F,), dtype=jnp.float32)

    out = layernorm_linear(x, gamma, beta, weight, bias)
    out = jax.block_until_ready(out)

    ref = reference(x, gamma, beta, weight, bias)
    assert out.shape == (N, H, W, F), out.shape
    assert jnp.allclose(out, ref, atol=1e-4, rtol=1e-4), float(jnp.max(jnp.abs(out - ref)))

    print("KERNEL_OK")
</pallas_src>

<mosaic_0001>
module attributes {stable_mosaic.version = 11 : i64} {
  func.func @ln_linear_kernel(%arg0: i32, %arg1: memref<392x256xf32, #tpu.memory_space<vmem>>, %arg2: memref<1024x256xf32, #tpu.memory_space<vmem>>, %arg3: memref<1x1024xf32, #tpu.memory_space<vmem>>, %arg4: memref<1x256xf32, #tpu.memory_space<vmem>>, %arg5: memref<1x256xf32, #tpu.memory_space<vmem>>, %arg6: memref<392x1024xf32, #tpu.memory_space<vmem>>) attributes {dimension_semantics = [#tpu.dimension_semantics<parallel>], iteration_bounds = array<i64: 2>, scalar_prefetch = 0 : i64, scratch_operands = 0 : i64, tpu.core_type = #tpu.core_type<tc>, window_params = [{transform_indices = @transform_0, window_bounds = array<i64: 392, 256>}, {pipeline_mode = #tpu.pipeline_mode<synchronous>, transform_indices = @transform_1, window_bounds = array<i64: 1024, 256>}, {pipeline_mode = #tpu.pipeline_mode<synchronous>, transform_indices = @transform_2, window_bounds = array<i64: 1, 1024>}, {pipeline_mode = #tpu.pipeline_mode<synchronous>, transform_indices = @transform_3, window_bounds = array<i64: 1, 256>}, {pipeline_mode = #tpu.pipeline_mode<synchronous>, transform_indices = @transform_4, window_bounds = array<i64: 1, 256>}, {transform_indices = @transform_5, window_bounds = array<i64: 392, 1024>}]} {
    %c0 = arith.constant 0 : index
    %c0_0 = arith.constant 0 : index
    %0 = vector.load %arg1[%c0, %c0_0] : memref<392x256xf32, #tpu.memory_space<vmem>>, vector<392x256xf32>
    %cst = arith.constant dense<0.000000e+00> : vector<392xf32>
    %1 = vector.multi_reduction <add>, %0, %cst [1] : vector<392x256xf32> to vector<392xf32>
    %2 = vector.shape_cast %1 : vector<392xf32> to vector<392x1xf32>
    %3 = arith.mulf %0, %0 : vector<392x256xf32>
    %cst_1 = arith.constant dense<0.000000e+00> : vector<392xf32>
    %4 = vector.multi_reduction <add>, %3, %cst_1 [1] : vector<392x256xf32> to vector<392xf32>
    %5 = vector.shape_cast %4 : vector<392xf32> to vector<392x1xf32>
    %cst_2 = arith.constant 3.906250e-03 : f32
    %6 = vector.broadcast %cst_2 : f32 to vector<392x1xf32>
    %7 = arith.mulf %2, %6 : vector<392x1xf32>
    %cst_3 = arith.constant 3.906250e-03 : f32
    %8 = vector.broadcast %cst_3 : f32 to vector<392x1xf32>
    %9 = arith.mulf %5, %8 : vector<392x1xf32>
    %10 = arith.mulf %7, %7 : vector<392x1xf32>
    %11 = arith.subf %9, %10 : vector<392x1xf32>
    %12 = vector.broadcast %7 : vector<392x1xf32> to vector<392x256xf32>
    %13 = arith.subf %0, %12 : vector<392x256xf32>
    %cst_4 = arith.constant 9.99999997E-7 : f32
    %14 = vector.broadcast %cst_4 : f32 to vector<392x1xf32>
    %15 = arith.addf %11, %14 : vector<392x1xf32>
    %16 = math.rsqrt %15 : vector<392x1xf32>
    %17 = vector.broadcast %16 : vector<392x1xf32> to vector<392x256xf32>
    %18 = arith.mulf %13, %17 : vector<392x256xf32>
    %c0_5 = arith.constant 0 : index
    %c0_6 = arith.constant 0 : index
    %19 = vector.load %arg4[%c0_5, %c0_6] : memref<1x256xf32, #tpu.memory_space<vmem>>, vector<1x256xf32>
    %20 = vector.broadcast %19 : vector<1x256xf32> to vector<392x256xf32>
    %21 = arith.mulf %18, %20 : vector<392x256xf32>
    %c0_7 = arith.constant 0 : index
    %c0_8 = arith.constant 0 : index
    %22 = vector.load %arg5[%c0_7, %c0_8] : memref<1x256xf32, #tpu.memory_space<vmem>>, vector<1x256xf32>
    %23 = vector.broadcast %22 : vector<1x256xf32> to vector<392x256xf32>
    %24 = arith.addf %21, %23 : vector<392x256xf32>
    %c0_9 = arith.constant 0 : index
    %c0_10 = arith.constant 0 : index
    %25 = vector.load %arg2[%c0_9, %c0_10] : memref<1024x256xf32, #tpu.memory_space<vmem>>, vector<1024x256xf32>
    %cst_11 = arith.constant dense<0.000000e+00> : vector<392x1024xf32>
    %26 = tpu.matmul %24, %25, %cst_11 {dimension_numbers = #tpu.dot_dimension_numbers<[1], [1], [0], [0], [0, 0, 1, 0], [], []>} : vector<392x256xf32>, vector<1024x256xf32>, vector<392x1024xf32> -> vector<392x1024xf32>
    %c0_12 = arith.constant 0 : index
    %c0_13 = arith.constant 0 : index
    %27 = vector.load %arg3[%c0_12, %c0_13] : memref<1x1024xf32, #tpu.memory_space<vmem>>, vector<1x1024xf32>
    %28 = vector.broadcast %27 : vector<1x1024xf32> to vector<392x1024xf32>
    %29 = arith.addf %26, %28 : vector<392x1024xf32>
    %c0_14 = arith.constant 0 : index
    %c0_15 = arith.constant 0 : index
    %30 = vector.load %arg6[%c0_14, %c0_15] : memref<392x1024xf32, #tpu.memory_space<vmem>>, vector<392x1024xf32>
    tpu.vector_store %arg6[%c0_14, %c0_15], %29 {strides = array<i32>} : memref<392x1024xf32, #tpu.memory_space<vmem>>, vector<392x1024xf32>,
    return
  }
  func.func @transform_0(%arg0: i32) -> (i32, i32) {
    %c0_i32 = arith.constant 0 : i32
    %c0_i32_0 = arith.constant 0 : i32
    return %arg0, %c0_i32 : i32, i32
  }
  func.func @transform_1(%arg0: i32) -> (i32, i32) {
    %c0_i32 = arith.constant 0 : i32
    %c0_i32_0 = arith.constant 0 : i32
    %c0_i32_1 = arith.constant 0 : i32
    return %c0_i32, %c0_i32_0 : i32, i32
  }
  func.func @transform_2(%arg0: i32) -> (i32, i32) {
    %c0_i32 = arith.constant 0 : i32
    %c0_i32_0 = arith.constant 0 : i32
    %c0_i32_1 = arith.constant 0 : i32
    return %c0_i32, %c0_i32_0 : i32, i32
  }
  func.func @transform_3(%arg0: i32) -> (i32, i32) {
    %c0_i32 = arith.constant 0 : i32
    %c0_i32_0 = arith.constant 0 : i32
    %c0_i32_1 = arith.constant 0 : i32
    return %c0_i32, %c0_i32_0 : i32, i32
  }
  func.func @transform_4(%arg0: i32) -> (i32, i32) {
    %c0_i32 = arith.constant 0 : i32
    %c0_i32_0 = arith.constant 0 : i32
    %c0_i32_1 = arith.constant 0 : i32
    return %c0_i32, %c0_i32_0 : i32, i32
  }
  func.func @transform_5(%arg0: i32) -> (i32, i32) {
    %c0_i32 = arith.constant 0 : i32
    %c0_i32_0 = arith.constant 0 : i32
    return %arg0, %c0_i32 : i32, i32
  }
}

</mosaic_0001>

<bundles_post_ra>
// kernel: tpu_custom_call.1
= control target key start
LH: loop header
LB: loop body
LE: loop exit
PB: predicated region body
PF: predicated region fallthrough
CT: control target
= control target key end

     0   :  { %10 = vsyncpa [#allocation3], 0  ;;  %s7585_s0 = inlined_call_operand.hbm [shape: f32[784,256], index: 0, kind: input, shape index: {}]   ;;  %s7586_s1 = inlined_call_operand.hbm [shape: f32[1024,256], index: 1, kind: input, shape index: {}]   ;;  %s7587_s2 = inlined_call_operand.hbm [shape: f32[1,1024], index: 2, kind: input, shape index: {}]   ;;  %s7588_s3 = inlined_call_operand.hbm [shape: f32[1,256], index: 3, kind: input, shape index: {}]   ;;  %s7589_s4 = inlined_call_operand.hbm [shape: f32[1,256], index: 4, kind: input, shape index: {}]   ;;  %s7590_s5 = inlined_call_operand.hbm [shape: f32[784,1024], index: 5, kind: output, shape index: {}]  }
   0x1   :  { %12 = vsyncpa [#allocation3 + $0x1], 0 }
   0x2   :  { %13 = vsyncpa [#allocation6], 0 }
   0x3   :  { %14 = vsyncpa [#allocation9], 0 }
   0x4   :  { %15 = vsyncpa [#allocation4], 0 }
   0x5   :  { %17 = vsyncpa [#allocation4 + $0x1], 0  ;;  %s4579_s18 = smov 0   ;;  %s4581_s19 = smov 0  }
   0x6   :  { %s4583_s20 = smov 0   ;;  %s4585_s21 = smov 0  }
   0x7 LB: > { %s4600_s22 = sadd.s32 4294967295, %s4537_s21   ;;  %s3750_s23 = sadd.s32 4294967294, %s4537_s21   ;;  %s4537_s21 = sphi %s4585_s21, %s8008_s21   ;;  %s4533_s20 = sphi %s4583_s20, %s8007_s20   ;;  %s4529_s19 = sphi %s4581_s19, %s8006_s19   ;;  %s4525_s18 = sphi %s4579_s18, %s8005_s18  }
   0x8   : > { %p43_p0 = scmp.ne.s32.totalorder %s4529_s19, %s4525_s18  ;;  %p7591_p1 = scmp.eq.s32.totalorder %s4600_s22, 0 }
   0x9   : > { %p157_p3 = scmp.eq.s32.totalorder %s3750_s23, 1  ;;  %p3751_p5 = scmp.ge.s32.totalorder %s4537_s21, 1 }
   0xa   : > { %p4609_p4 = por %p7591_p1, %p43_p0  ;;  %p164_p7 = scmp.lt.s32.totalorder %s4537_s21, 3 }
   0xb   : > { %p4614_p6 = por %p157_p3, %p43_p0  ;;  %s4539_s27 = smov [#allocation5]  }
   0xc   : > { %s7734_s24 = scalar_select %p4609_p4, 1, 0 }
   0xd   : > { %s7735_s25 = scalar_select %p4614_p6, 1, 0 }
   0xe   : > { %p4619_p8 = pnand %p3751_p5, %p164_p7  ;;  %s176_s28 = sshll.u32 %s4539_s27, 4  ;;  %s4623_s28 = int_to_ptr.vmem [resolvable:$true] %s176_s28 }
   0xf   : > { %s4540_s30 = smov [#allocation8]   ;;  %s4541_s7 = smov [#allocation7]  }
  0x10   : > { %s7736_s26 = scalar_select %p4619_p8, 1, 0 }
  0x11   : > { %p4053_p9 = pneg %p4619_p8  ;;  %s201_s6 = sshll.u32 %s4540_s30, 4  ;;  %s4634_s6 = int_to_ptr.vmem [resolvable:$true] %s201_s6 }
  0x12   : > { %s4636_s8 = sshll.u32 %s4541_s7, 4  ;;  %s4321_s11 = scalar_lea.hbm %s7586_s1, 32768  ;;  %s191_s8 = int_to_ptr.vmem [resolvable:$true] %s4636_s8 }
  0x13   : > { %p4630_p11 = pnand %p4053_p9, %p7591_p1  ;;  %p4322_p12 = scmp.ne.s32.totalorder %s7586_s1, %s4321_s11 }
  0x14   : > { %p4328_p5 = scmp.lt.u32.totalorder %s4321_s11, %s7586_s1 }
  0x15   : > { %p4646_p13 = pneg %p4630_p11 }
  0x17   : > { %p4324_p0 = pnand %p4646_p13, %p4322_p12 }
  0x19   : > { %p4325_p3 = pneg %p4324_p0 }
  0x1b   : > { %p4330_p7 = pnand %p4328_p5, %p4325_p3 }
  0x1d   : > { %4333 = shalt.err (!%p4330_p7)
}
  0x1e   : > { %s4334_s17 = scalar_lea.vmem %s4623_s28, 32768  ;;  %p4342_p2 = scmp.lt.s32.totalorder %s4623_s28, %s4623_s28 }
  0x1f   : > { %p4335_p9 = scmp.ne.s32.totalorder %s4623_s28, %s4334_s17  ;;  %p4343_p6 = scmp.lt.s32.totalorder %s4334_s17, %s4334_s17 }
  0x21   : > { %p4337_p10 = pnand %p4335_p9, %p4646_p13  ;;  %p4344_p12 = por %p4343_p6, %p4342_p2 }
  0x23   : > { %p4338_p1 = pneg %p4337_p10 }
  0x25   : > { %p4345_p0 = pnand %p4344_p12, %p4338_p1 }
  0x27   : > { %4348 = shalt.err (!%p4345_p0)
}
  0x28   : > { %s7594_s23 = smov 256   ;;  %s4543_s27 = smov 16  }
  0x29   : > { %4056 = dma.hbm_to_vmem [thread:$0]  (!%p4630_p11), %s7586_s1, 32768, %s4623_s28, [#allocation6], %s7594_s23, %s7594_s23, %s4543_s27  }
  0x2a   : > { %s4349_s11 = scalar_lea.hbm %s7588_s3, 32 }
  0x2b   : > { %p4350_p1 = scmp.ne.s32.totalorder %s7588_s3, %s4349_s11  ;;  %p4356_p10 = scmp.lt.u32.totalorder %s4349_s11, %s7588_s3 }
  0x2d   : > { %p4352_p2 = pnand %p4350_p1, %p4646_p13 }
  0x2f   : > { %p4353_p6 = pneg %p4352_p2 }
  0x31   : > { %p4358_p3 = pnand %p4356_p10, %p4353_p6 }
  0x33   : > { %4361 = shalt.err (!%p4358_p3)
}
  0x34   : > { %s4362_s28 = scalar_lea.vmem %s4634_s6, 32  ;;  %p4370_p12 = scmp.lt.s32.totalorder %s4634_s6, %s4634_s6 }
  0x35   : > { %p4363_p5 = scmp.ne.s32.totalorder %s4634_s6, %s4362_s28  ;;  %p4371_p0 = scmp.lt.s32.totalorder %s4362_s28, %s4362_s28 }
  0x37   : > { %p4365_p7 = pnand %p4363_p5, %p4646_p13  ;;  %p4372_p1 = por %p4371_p0, %p4370_p12 }
  0x39   : > { %p4366_p9 = pneg %p4365_p7 }
  0x3b   : > { %p4373_p2 = pnand %p4372_p1, %p4366_p9 }
  0x3d   : > { %4376 = shalt.err (!%p4373_p2)
}
  0x3e   : > { %4062 = dma.hbm_to_vmem [thread:$0]  (!%p4630_p11), %s7588_s3, 32, %s4634_s6, [#allocation9]  }
  0x3f   : > { %s4377_s10 = scalar_lea.hbm %s7587_s2, 128 }
  0x40   : > { %p4378_p6 = scmp.ne.s32.totalorder %s7587_s2, %s4377_s10  ;;  %p4384_p5 = scmp.lt.u32.totalorder %s4377_s10, %s7587_s2 }
  0x42   : > { %p4380_p10 = pnand %p4378_p6, %p4646_p13 }
  0x44   : > { %p4381_p3 = pneg %p4380_p10 }
  0x46   : > { %p4386_p7 = pnand %p4384_p5, %p4381_p3 }
  0x48   : > { %4389 = shalt.err (!%p4386_p7)
}
  0x49   : > { %s4390_s16 = scalar_lea.vmem %s191_s8, 128  ;;  %p4398_p1 = scmp.lt.s32.totalorder %s191_s8, %s191_s8 }
  0x4a   : > { %p4391_p9 = scmp.ne.s32.totalorder %s191_s8, %s4390_s16  ;;  %p4399_p2 = scmp.lt.s32.totalorder %s4390_s16, %s4390_s16 }
  0x4c   : > { %p4393_p12 = pnand %p4391_p9, %p4646_p13  ;;  %p4400_p4 = por %p4399_p2, %p4398_p1 }
  0x4e   : > { %p4394_p0 = pneg %p4393_p12 }
  0x50   : > { %p4401_p8 = pnand %p4400_p4, %p4394_p0 }
  0x52   : > { %4404 = shalt.err (!%p4401_p8)
}
  0x53   : > { %4059 = dma.hbm_to_vmem [thread:$0]  (!%p4630_p11), %s7587_s2, 128, %s191_s8, [#allocation6]  }
  0x54   : > { %s4544_s17 = smov [#allocation10]   ;;  %s4405_s10 = scalar_lea.hbm %s7589_s4, 32 }
  0x55   : > { %s212_s30 = sshll.u32 %s4544_s17, 4  ;;  %p4406_p6 = scmp.ne.s32.totalorder %s7589_s4, %s4405_s10  ;;  %s213_s30 = int_to_ptr.vmem [resolvable:$true] %s212_s30 }
  0x56   : > { %p4412_p10 = scmp.lt.u32.totalorder %s4405_s10, %s7589_s4 }
  0x57   : > { %p4408_p4 = pnand %p4406_p6, %p4646_p13 }
  0x59   : > { %p4409_p8 = pneg %p4408_p4 }
  0x5b   : > { %p4414_p3 = pnand %p4412_p10, %p4409_p8 }
  0x5d   : > { %4417 = shalt.err (!%p4414_p3)
}
  0x5e   : > { %s4418_s8 = scalar_lea.vmem %s213_s30, 32  ;;  %p4426_p12 = scmp.lt.s32.totalorder %s213_s30, %s213_s30 }
  0x5f   : > { %p4419_p5 = scmp.ne.s32.totalorder %s213_s30, %s4418_s8  ;;  %p4427_p0 = scmp.lt.s32.totalorder %s4418_s8, %s4418_s8 }
  0x61   : > { %p4421_p7 = pnand %p4419_p5, %p4646_p13  ;;  %p4428_p1 = por %p4427_p0, %p4426_p12 }
  0x63   : > { %p4422_p9 = pneg %p4421_p7 }
  0x65   : > { %p4429_p2 = pnand %p4428_p1, %p4422_p9 }
  0x67   : > { %4432 = shalt.err (!%p4429_p2)
}
  0x68   : > { %4065 = dma.hbm_to_vmem [thread:$0]  (!%p4630_p11), %s7589_s4, 32, %s213_s30, [#allocation9]  }
  0x69   : > { %s4731_s14 = sadd.s32 1, %s4537_s21   ;;  %s30_s28 = sadd.s32 1, %s4533_s20 }
  0x6a   : > { %s27_s29 = ssub.s32 %s4537_s21, %s4731_s14  ;;  %p37_p13 = scmp.ne.s32.totalorder %s4533_s20, %s4529_s19 }
  0x6b   : > { %p28_p6 = scmp.eq.s32.totalorder %s27_s29, 0  ;;  %p38_p4 = scmp.eq.s32.totalorder %s4537_s21, 0 }
  0x6c   : > { %p7739_p8 = scmp.eq.s32.totalorder %s4600_s22, 1  ;;  %p4078_p3 = scmp.lt.s32.totalorder %s4537_s21, 2 }
  0x6d   : > { %s4747_s7 = scalar_select %p28_p6, %s4533_s20, %s30_s28  }
  0x6e   : > { %p4741_p10 = por %p7739_p8, %p37_p13  ;;  %p39_p5 = por %p38_p4, %p37_p13 }
  0x6f   : > { %s223_s9 = sand.u32 1, %s4533_s20   ;;  %s3772_s30 = smul.u32 12544, %s4537_s21 }
  0x70   : > { %s4030_s10 = smul.u32 784, %s223_s9  ;;  %p4751_p11 = pnand %p4078_p3, %p39_p5 }
  0x71   : > { %s4758_s15 = scalar_lea.hbm %s7585_s0, %s3772_s30  ;;  %s4762_s6 = scalar_lea.sflag [#allocation3], %s223_s9 }
  0x72   : > { %s227_s8 = scalar_lea.vmem [#allocation2], %s4030_s10  ;;  %s4433_s28 = scalar_lea.hbm %s4758_s15, 12544 }
  0x73   : > { %s235_s16 = sshll.u32 %s227_s8, 4  ;;  %p4434_p7 = scmp.ne.s32.totalorder %s4758_s15, %s4433_s28  ;;  %s4760_s16 = int_to_ptr.vmem [resolvable:$true] %s235_s16 }
  0x74   : > { %p4435_p9 = pneg %p4751_p11  ;;  %s4438_s12 = scalar_lea.hbm %s7585_s0, 25088 }
  0x75   : > { %p4439_p1 = scmp.lt.u32.totalorder %s4758_s15, %s7585_s0  ;;  %p4440_p2 = scmp.lt.u32.totalorder %s4438_s12, %s4433_s28 }
  0x76   : > { %p4436_p12 = pnand %p4435_p9, %p4434_p7  ;;  %p4442_p6 = scmp.lt.u32.totalorder %s4433_s28, %s4758_s15 }
  0x77   : > { %p4441_p13 = por %p4440_p2, %p4439_p1 }
  0x78   : > { %p4437_p0 = pneg %p4436_p12 }
  0x79   : > { %p4443_p4 = por %p4442_p6, %p4441_p13 }
  0x7b   : > { %p4444_p8 = pnand %p4443_p4, %p4437_p0 }
  0x7d   : > { %4447 = shalt.err (!%p4444_p8)
}
  0x7e   : > { %s4448_s9 = scalar_lea.vmem %s4760_s16, 12544  ;;  %s4545_s10 = smov [#allocation2]  }
  0x7f   : > { %p4449_p3 = scmp.ne.s32.totalorder %s4760_s16, %s4448_s9  ;;  %s4453_s8 = sshll.u32 %s4545_s10, 4  ;;  %s4454_s8 = int_to_ptr.vmem [resolvable:$false] %s4453_s8 }
  0x80   : > { %s4455_s23 = scalar_lea.vmem %s4454_s8, 25088  ;;  %p4456_p12 = scmp.lt.s32.totalorder %s4760_s16, %s4454_s8 }
  0x81   : > { %p4451_p5 = pnand %p4449_p3, %p4435_p9  ;;  %p4457_p1 = scmp.lt.s32.totalorder %s4455_s23, %s4448_s9 }
  0x83   : > { %p4452_p7 = pneg %p4451_p5  ;;  %p4458_p2 = por %p4457_p1, %p4456_p12 }
  0x85   : > { %p4459_p13 = pnand %p4458_p2, %p4452_p7 }
  0x87   : > { %4462 = shalt.err (!%p4459_p13)
}
  0x88   : > { %s7742_s28 = smov 256   ;;  %p7743_p9 = scmp.ne.s32.totalorder %s7736_s26, 0 }
  0x89   : > { %4069 = dma.hbm_to_vmem [thread:$0]  (!%p4751_p11), %s4758_s15, 12544, %s4760_s16, %s4762_s6, %s7742_s28, %s7742_s28, %s4543_s27  }
  0x8a   : > { %247 = sbr.rel (%p7743_p9) target bundleno = 959 (0x3bf), region = 40 }
  0x91   : > { %s4796_s29 = sand.u32 1, %s4529_s19   ;;  %p7744_p0 = scmp.ne.s32.totalorder %s7734_s24, 0 }
  0x92   : > { %s4031_s30 = smul.u32 784, %s4796_s29  ;;  %s250_s12 = scalar_lea.sflag [#allocation3], %s4796_s29 }
  0x94   : > { %s4800_s13 = scalar_lea.vmem [#allocation2], %s4031_s30 }
  0x95   : > { %4508 = dma.done.wait (%p7744_p0), %s250_s12, 12544  }
  0x96   : > { %4510 = vsyncadd (%p7744_p0), %s250_s12, 4294954752  ;;  %p7745_p11 = scmp.eq.s32.totalorder %s4600_s22, 0 }
  0x98   : > { %4512 = dma.done.wait (%p7745_p11), [#allocation6], 32896   ;;  %p7746_p6 = pmov %p7745_p11 }
  0x9a   : > { %4514 = vsyncadd (%p7746_p6), [#allocation6], 4294934400  ;;  %p7747_p4 = pmov %p7746_p6 }
  0x9c   : > { %4516 = dma.done.wait (%p7747_p4), [#allocation9], 64   ;;  %p7748_p8 = pmov %p7747_p4 }
  0x9d   : > { %v300_v0 = vld [vmem:[%s4800_s13 + $0x10] sm:$0xff]  ;;  %v301_v1 = vld [vmem:[%s4800_s13 + $0x18] sm:$0xff]  ;;  %v298_v2 = vld [vmem:[%s4800_s13] sm:$0xff]  ;;  %s4032_s24 = smul.u32 3136, %s4796_s29  ;;  %s3625_s6 = scalar_lea.sflag [#allocation4], %s4796_s29 }
  0x9e   : > { %4518 = vsyncadd (%p7748_p8), [#allocation9], 4294967232  ;;  %v399_v3 = vadd.f32 %v301_v1, %v300_v0  ;;  %v299_v4 = vld [vmem:[%s4800_s13 + $0x8] sm:$0xff]  ;;  %v545_v5 = vmul.f32 %v300_v0, %v300_v0  ;;  %v546_v6 = vmul.f32 %v301_v1, %v301_v1  ;;  %v543_v7 = vmul.f32 %v298_v2, %v298_v2  ;;  %v302_v8 = vld [vmem:[%s4800_s13 + $0x20] sm:$0xff]  ;;  %s3773_s27 = smul.u32 50176, %s4600_s22  ;;  %s4546_s10 = smov [#allocation11]  }
  0x9f   : > { %v303_v9 = vld [vmem:[%s4800_s13 + $0x28] sm:$0xff]  ;;  %v396_v10 = vadd.f32 %v299_v4, %v298_v2  ;;  %v544_v11 = vmul.f32 %v299_v4, %v299_v4  ;;  %v547_v13 = vmul.f32 %v302_v8, %v302_v8  ;;  %v304_v16 = vld [vmem:[%s4800_s13 + $0x30] sm:$0xff]  ;;  %v305_v17 = vld [vmem:[%s4800_s13 + $0x38] sm:$0xff]  ;;  %s6566_s26 = scalar_lea.vmem [#allocation11], %s4032_s24  ;;  %s4467_s8 = sshll.u32 %s4546_s10, 4  ;;  %s4468_s8 = int_to_ptr.vmem [resolvable:$false] %s4467_s8 }
  0xa0   : > { %400 = vadd.xlane.f32.xlu1 %v399_v3  ;;  %v644_v12 = vadd.f32 %v546_v6, %v545_v5  ;;  %v548_v14 = vmul.f32 %v303_v9, %v303_v9  ;;  %v306_v18 = vld [vmem:[%s4800_s13 + $0x40] sm:$0xff]  ;;  %v549_v20 = vmul.f32 %v304_v16, %v304_v16  ;;  %v550_v21 = vmul.f32 %v305_v17, %v305_v17  ;;  %v307_v22 = vld [vmem:[%s4800_s13 + $0x48] sm:$0xff]  ;;  %v308_v36 = vld [vmem:[%s4800_s13 + $0x50] sm:$0xff]  ;;  %s3639_s11 = sshll.u32 %s6566_s26, 4  ;;  %s7533_s16 = scalar_lea.hbm %s7590_s5, %s3773_s27  ;;  %s7537_s11 = int_to_ptr.vmem [resolvable:$true] %s3639_s11 }
  0xa1   : > { %397 = vadd.xlane.f32.xlu0 %v396_v10  ;;  %v641_v15 = vadd.f32 %v544_v11, %v543_v7  ;;  %v1499_v23 = vld [vmem:[#allocation5 + $0x8] sm:$0xff]  ;;  %v1501_v24 = vld [vmem:[#allocation5 + $0x18] sm:$0xff]  ;;  %v402_v25 = vadd.f32 %v303_v9, %v302_v8  ;;  %v1498_v28 = vld [vmem:[#allocation5] sm:$0xff]  ;;  %v551_v32 = vmul.f32 %v306_v18, %v306_v18  ;;  %v552_v33 = vmul.f32 %v307_v22, %v307_v22  ;;  %s4463_s9 = scalar_lea.vmem %s7537_s11, 50176  ;;  %s4469_s23 = scalar_lea.vmem %s4468_s8, 100352 }
  0xa2   : > { %v647_v19 = vadd.f32 %v548_v14, %v547_v13  ;;  %v1563_v26 = vld [vmem:[#allocation5 + $0x208] sm:$0xff]  ;;  %v1565_v27 = vld [vmem:[#allocation5 + $0x218] sm:$0xff]  ;;  %v1500_v29 = vld [vmem:[#allocation5 + $0x10] sm:$0xff]  ;;  %v3774_v34 = vpack.c.bf16 %v1501_v24, %v1499_v23  ;;  %v650_v35 = vadd.f32 %v550_v21, %v549_v20  ;;  %v405_v42 = vadd.f32 %v305_v17, %v304_v16  ;;  %p4464_p3 = scmp.ne.s32.totalorder %s7537_s11, %s4463_s9  ;;  %p4470_p12 = scmp.lt.s32.totalorder %s7537_s11, %s4468_s8 }
  0xa3   : > { %v1562_v30 = vld [vmem:[#allocation5 + $0x200] sm:$0xff]  ;;  %v1564_v31 = vld [vmem:[#allocation5 + $0x210] sm:$0xff]  ;;  %v3838_v37 = vpack.c.bf16 %v1565_v27, %v1563_v26  ;;  %v3776_v38 = vpack.c.bf16 %v1500_v29, %v1498_v28  ;;  %v1503_v40 = vld [vmem:[#allocation5 + $0x28] sm:$0xff]  ;;  %v653_v52 = vadd.f32 %v552_v33, %v551_v32  ;;  %v553_v53 = vmul.f32 %v308_v36, %v308_v36  ;;  %p4471_p1 = scmp.lt.s32.totalorder %s4469_s23, %s4463_s9 }
  0xa4   : > { %645 = vadd.xlane.f32.xlu1 %v644_v12  ;;  %v3840_v39 = vpack.c.bf16 %v1564_v31, %v1562_v30  ;;  %v1505_v41 = vld [vmem:[#allocation5 + $0x38] sm:$0xff]  ;;  %3775 = vmatprep.subr.bf16.mxu0 %v3774_v34  ;;  %v1567_v44 = vld [vmem:[#allocation5 + $0x228] sm:$0xff]  ;;  %v310_v46 = vld [vmem:[%s4800_s13 + $0x60] sm:$0xff]  ;;  %v408_v58 = vadd.f32 %v307_v22, %v306_v18  ;;  %p4465_p5 = pnand %p4464_p3, %p4741_p10 }
  0xa5   : > { %642 = vadd.xlane.f32.xlu0 %v641_v15  ;;  %v309_v43 = vld [vmem:[%s4800_s13 + $0x58] sm:$0xff]  ;;  %3839 = vmatprep.subr.bf16.mxu1 %v3838_v37  ;;  %v3778_v47 = vpack.c.bf16 %v1505_v41, %v1503_v40  ;;  %v1502_v49 = vld [vmem:[#allocation5 + $0x20] sm:$0xff]  ;;  %v1504_v50 = vld [vmem:[#allocation5 + $0x30] sm:$0xff]  ;;  %v555_v2 = vmul.f32 %v310_v46, %v310_v46  ;;  %p4472_p2 = por %p4471_p1, %p4470_p12 }
  0xa6   : > { %v1569_v45 = vld [vmem:[#allocation5 + $0x238] sm:$0xff]  ;;  %3777 = vmatpush1.bf16.xpose.msra.mxu0 %v3776_v38  ;;  %3841 = vmatpush1.bf16.xpose.msra.mxu1 %v3840_v39  ;;  %v1566_v51 = vld [vmem:[#allocation5 + $0x220] sm:$0xff]  ;;  %v554_v54 = vmul.f32 %v309_v43, %v309_v43  ;;  %v1568_v55 = vld [vmem:[#allocation5 + $0x230] sm:$0xff]  ;;  %v3780_v62 = vpack.c.bf16 %v1504_v50, %v1502_v49  ;;  %v411_v5 = vadd.f32 %v309_v43, %v308_v36  ;;  %p4466_p7 = pneg %p4465_p5 }
  0xa7   : > { %v3842_v48 = vpack.c.bf16 %v1569_v45, %v1567_v44  ;;  %v1507_v56 = vld [vmem:[#allocation5 + $0x48] sm:$0xff]  ;;  %v1509_v57 = vld [vmem:[#allocation5 + $0x58] sm:$0xff]  ;;  %3779 = vmatprep.subr.bf16.mxu0 %v3778_v47  ;;  %v3844_v63 = vpack.c.bf16 %v1568_v55, %v1566_v51  ;;  %v312_v6 = vld [vmem:[%s4800_s13 + $0x70] sm:$0xff] }
  0xa8   : > { %648 = vadd.xlane.f32.xlu1 %v647_v19  ;;  %v311_v59 = vld [vmem:[%s4800_s13 + $0x68] sm:$0xff]  ;;  %v3782_v0 = vpack.c.bf16 %v1509_v57, %v1507_v56  ;;  %v656_v1 = vadd.f32 %v554_v54, %v553_v53  ;;  %v313_v7 = vld [vmem:[%s4800_s13 + $0x78] sm:$0xff]  ;;  %v314_v8 = vld [vmem:[%s4800_s13 + $0x80] sm:$0xff]  ;;  %v557_v13 = vmul.f32 %v312_v6, %v312_v6  ;;  %p4473_p13 = pnand %p4472_p2, %p4466_p7 }
  0xa9   : > { %403 = vadd.xlane.f32.xlu0 %v402_v25  ;;  %v1571_v60 = vld [vmem:[#allocation5 + $0x248] sm:$0xff]  ;;  %v1573_v61 = vld [vmem:[#allocation5 + $0x258] sm:$0xff]  ;;  %3843 = vmatprep.subr.bf16.mxu1 %v3842_v48  ;;  %v556_v3 = vmul.f32 %v311_v59, %v311_v59  ;;  %v1506_v9 = vld [vmem:[#allocation5 + $0x40] sm:$0xff]  ;;  %v558_v14 = vmul.f32 %v313_v7, %v313_v7  ;;  %v414_v18 = vadd.f32 %v311_v59, %v310_v46 }
  0xaa   : > { %v3846_v4 = vpack.c.bf16 %v1573_v61, %v1571_v60  ;;  %v1508_v10 = vld [vmem:[#allocation5 + $0x50] sm:$0xff]  ;;  %v1570_v11 = vld [vmem:[#allocation5 + $0x240] sm:$0xff]  ;;  %v1511_v16 = vld [vmem:[#allocation5 + $0x68] sm:$0xff]  ;;  %v559_v26 = vmul.f32 %v314_v8, %v314_v8  ;;  %v417_v29 = vadd.f32 %v313_v7, %v312_v6 }
  0xab   : > { %v659_v12 = vadd.f32 %v556_v3, %v555_v2  ;;  %v1572_v15 = vld [vmem:[#allocation5 + $0x250] sm:$0xff]  ;;  %v1513_v17 = vld [vmem:[#allocation5 + $0x78] sm:$0xff]  ;;  %v1575_v20 = vld [vmem:[#allocation5 + $0x268] sm:$0xff]  ;;  %v3784_v22 = vpack.c.bf16 %v1508_v10, %v1506_v9  ;;  %v662_v25 = vadd.f32 %v558_v14, %v557_v13 }
  0xac   : > { %651 = vadd.xlane.f32.xlu1 %v650_v35  ;;  %v315_v19 = vld [vmem:[%s4800_s13 + $0x88] sm:$0xff]  ;;  %v3848_v23 = vpack.c.bf16 %v1572_v15, %v1570_v11  ;;  %v3786_v24 = vpack.c.bf16 %v1513_v17, %v1511_v16  ;;  %v316_v30 = vld [vmem:[%s4800_s13 + $0x90] sm:$0xff]  ;;  %v317_v31 = vld [vmem:[%s4800_s13 + $0x98] sm:$0xff] }
  0xad   : > { %406 = vadd.xlane.f32.xlu0 %v405_v42  ;;  %v1577_v21 = vld [vmem:[#allocation5 + $0x278] sm:$0xff]  ;;  %v560_v27 = vmul.f32 %v315_v19, %v315_v19  ;;  %v318_v32 = vld [vmem:[%s4800_s13 + $0xa0] sm:$0xff]  ;;  %v561_v37 = vmul.f32 %v316_v30, %v316_v30  ;;  %v562_v38 = vmul.f32 %v317_v31, %v317_v31  ;;  %v1515_v40 = vld [vmem:[#allocation5 + $0x88] sm:$0xff]  ;;  %v420_v42 = vadd.f32 %v315_v19, %v314_v8 }
  0xae   : > { %3781 = vmatpush1.bf16.xpose.msra.mxu0 %v3780_v62  ;;  %3845 = vmatpush1.bf16.xpose.msra.mxu1 %v3844_v63  ;;  %v3850_v28 = vpack.c.bf16 %v1577_v21, %v1575_v20  ;;  %v1510_v33 = vld [vmem:[#allocation5 + $0x60] sm:$0xff]  ;;  %v1512_v34 = vld [vmem:[#allocation5 + $0x70] sm:$0xff]  ;;  %v1517_v41 = vld [vmem:[#allocation5 + $0x98] sm:$0xff]  ;;  %v563_v50 = vmul.f32 %v318_v32, %v318_v32  ;;  %v423_v53 = vadd.f32 %v317_v31, %v316_v30 }
  0xaf   : > { %3783 = vmatprep.subr.bf16.mxu0 %v3782_v0  ;;  %3847 = vmatprep.subr.bf16.mxu1 %v3846_v4  ;;  %v1574_v35 = vld [vmem:[#allocation5 + $0x260] sm:$0xff]  ;;  %v665_v36 = vadd.f32 %v560_v27, %v559_v26  ;;  %v1576_v39 = vld [vmem:[#allocation5 + $0x270] sm:$0xff]  ;;  %v319_v43 = vld [vmem:[%s4800_s13 + $0xa8] sm:$0xff]  ;;  %v3788_v46 = vpack.c.bf16 %v1512_v34, %v1510_v33  ;;  %v3790_v48 = vpack.c.bf16 %v1517_v41, %v1515_v40 }
  0xb0   : > { %654 = vadd.xlane.f32.xlu1 %v653_v52  ;;  %v1579_v44 = vld [vmem:[#allocation5 + $0x288] sm:$0xff]  ;;  %v1581_v45 = vld [vmem:[#allocation5 + $0x298] sm:$0xff]  ;;  %v3852_v47 = vpack.c.bf16 %v1576_v39, %v1574_v35  ;;  %v668_v49 = vadd.f32 %v562_v38, %v561_v37  ;;  %v564_v51 = vmul.f32 %v319_v43, %v319_v43  ;;  %v320_v54 = vld [vmem:[%s4800_s13 + $0xb0] sm:$0xff]  ;;  %v426_v2 = vadd.f32 %v319_v43, %v318_v32 }
  0xb1   : > { %409 = vadd.xlane.f32.xlu0 %v408_v58  ;;  %v3854_v52 = vpack.c.bf16 %v1581_v45, %v1579_v44  ;;  %v321_v55 = vld [vmem:[%s4800_s13 + $0xb8] sm:$0xff]  ;;  %v322_v56 = vld [vmem:[%s4800_s13 + $0xc0] sm:$0xff]  ;;  %v565_v61 = vmul.f32 %v320_v54, %v320_v54  ;;  %v323_v3 = vld [vmem:[%s4800_s13 + $0xc8] sm:$0xff] }
  0xb2   : > { %v1514_v57 = vld [vmem:[#allocation5 + $0x80] sm:$0xff]  ;;  %v1516_v58 = vld [vmem:[#allocation5 + $0x90] sm:$0xff]  ;;  %v671_v60 = vadd.f32 %v564_v51, %v563_v50  ;;  %v566_v62 = vmul.f32 %v321_v55, %v321_v55  ;;  %v1519_v0 = vld [vmem:[#allocation5 + $0xa8] sm:$0xff]  ;;  %v567_v10 = vmul.f32 %v322_v56, %v322_v56  ;;  %v568_v11 = vmul.f32 %v323_v3, %v323_v3 }
  0xb3   : > { %v1578_v59 = vld [vmem:[#allocation5 + $0x280] sm:$0xff]  ;;  %v1580_v63 = vld [vmem:[#allocation5 + $0x290] sm:$0xff]  ;;  %v1583_v4 = vld [vmem:[#allocation5 + $0x2a8] sm:$0xff]  ;;  %v3792_v6 = vpack.c.bf16 %v1516_v58, %v1514_v57  ;;  %v429_v13 = vadd.f32 %v321_v55, %v320_v54  ;;  %v432_v26 = vadd.f32 %v323_v3, %v322_v56 }
  0xb4   : > { %657 = vadd.xlane.f32.xlu1 %v656_v1  ;;  %v1521_v1 = vld [vmem:[#allocation5 + $0xb8] sm:$0xff]  ;;  %v3856_v7 = vpack.c.bf16 %v1580_v63, %v1578_v59  ;;  %v674_v9 = vadd.f32 %v566_v62, %v565_v61  ;;  %v324_v14 = vld [vmem:[%s4800_s13 + $0xd0] sm:$0xff]  ;;  %v326_v16 = vld [vmem:[%s4800_s13 + $0xe0] sm:$0xff]  ;;  %v677_v20 = vadd.f32 %v568_v11, %v567_v10 }
  0xb5   : > { %412 = vadd.xlane.f32.xlu0 %v411_v5  ;;  %v1585_v5 = vld [vmem:[#allocation5 + $0x2b8] sm:$0xff]  ;;  %v3794_v8 = vpack.c.bf16 %v1521_v1, %v1519_v0  ;;  %v1518_v17 = vld [vmem:[#allocation5 + $0xa0] sm:$0xff]  ;;  %v569_v21 = vmul.f32 %v324_v14, %v324_v14  ;;  %v571_v34 = vmul.f32 %v326_v16, %v326_v16 }
  0xb6   : > { %3785 = vmatpush1.bf16.xpose.msra.mxu0 %v3784_v22  ;;  %3849 = vmatpush1.bf16.xpose.msra.mxu1 %v3848_v23  ;;  %v325_v15 = vld [vmem:[%s4800_s13 + $0xd8] sm:$0xff]  ;;  %v1582_v19 = vld [vmem:[#allocation5 + $0x2a0] sm:$0xff]  ;;  %v1584_v23 = vld [vmem:[#allocation5 + $0x2b0] sm:$0xff] }
  0xb7   : > { %3787 = vmatprep.subr.bf16.mxu0 %v3786_v24  ;;  %3851 = vmatprep.subr.bf16.mxu1 %v3850_v28  ;;  %v570_v22 = vmul.f32 %v325_v15, %v325_v15  ;;  %v1523_v24 = vld [vmem:[#allocation5 + $0xc8] sm:$0xff]  ;;  %v3860_v31 = vpack.c.bf16 %v1584_v23, %v1582_v19  ;;  %v435_v37 = vadd.f32 %v325_v15, %v324_v14  ;;  %v328_v38 = vld [vmem:[%s4800_s13 + $0xf0] sm:$0xff]  ;;  %v330_v40 = vld [vmem:[%s4800_s13 + $0x100] sm:$0xff] }
  0xb8   : > { %660 = vadd.xlane.f32.xlu1 %v659_v12  ;;  %v3858_v12 = vpack.c.bf16 %v1585_v5, %v1583_v4  ;;  %v327_v27 = vld [vmem:[%s4800_s13 + $0xe8] sm:$0xff]  ;;  %v329_v39 = vld [vmem:[%s4800_s13 + $0xf8] sm:$0xff]  ;;  %v1522_v41 = vld [vmem:[#allocation5 + $0xc0] sm:$0xff]  ;;  %v573_v45 = vmul.f32 %v328_v38, %v328_v38  ;;  %v575_v58 = vmul.f32 %v330_v40, %v330_v40 }
  0xb9   : > { %415 = vadd.xlane.f32.xlu0 %v414_v18  ;;  %v1520_v18 = vld [vmem:[#allocation5 + $0xb0] sm:$0xff]  ;;  %v1587_v28 = vld [vmem:[#allocation5 + $0x2c8] sm:$0xff]  ;;  %v680_v33 = vadd.f32 %v570_v22, %v569_v21  ;;  %v572_v35 = vmul.f32 %v327_v27, %v327_v27  ;;  %v1586_v43 = vld [vmem:[#allocation5 + $0x2c0] sm:$0xff]  ;;  %v438_v50 = vadd.f32 %v327_v27, %v326_v16  ;;  %v441_v61 = vadd.f32 %v329_v39, %v328_v38 }
  0xba   : > { %v3796_v30 = vpack.c.bf16 %v1520_v18, %v1518_v17  ;;  %v331_v51 = vld [vmem:[%s4800_s13 + $0x108] sm:$0xff]  ;;  %v332_v62 = vld [vmem:[%s4800_s13 + $0x110] sm:$0xff]  ;;  %v333_v63 = vld [vmem:[%s4800_s13 + $0x118] sm:$0xff] }
  0xbb   : > { %v683_v44 = vadd.f32 %v572_v35, %v571_v34  ;;  %v576_v59 = vmul.f32 %v331_v51, %v331_v51  ;;  %v334_v0 = vld [vmem:[%s4800_s13 + $0x120] sm:$0xff]  ;;  %v577_v5 = vmul.f32 %v332_v62, %v332_v62  ;;  %v444_v10 = vadd.f32 %v331_v51, %v330_v40  ;;  %v335_v11 = vld [vmem:[%s4800_s13 + $0x128] sm:$0xff]  ;;  %v336_v22 = vld [vmem:[%s4800_s13 + $0x130] sm:$0xff] }
  0xbc   : > { %663 = vadd.xlane.f32.xlu1 %v662_v25  ;;  %v1525_v25 = vld [vmem:[#allocation5 + $0xd8] sm:$0xff]  ;;  %v1526_v1 = vld [vmem:[#allocation5 + $0xe0] sm:$0xff]  ;;  %v579_v18 = vmul.f32 %v334_v0, %v334_v0  ;;  %v580_v19 = vmul.f32 %v335_v11, %v335_v11  ;;  %v447_v21 = vadd.f32 %v333_v63, %v332_v62  ;;  %v450_v34 = vadd.f32 %v335_v11, %v334_v0 }
  0xbd   : > { %418 = vadd.xlane.f32.xlu0 %v417_v29  ;;  %v1589_v29 = vld [vmem:[#allocation5 + $0x2d8] sm:$0xff]  ;;  %v3798_v32 = vpack.c.bf16 %v1525_v25, %v1523_v24  ;;  %v1590_v3 = vld [vmem:[#allocation5 + $0x2e0] sm:$0xff]  ;;  %v689_v4 = vadd.f32 %v576_v59, %v575_v58 }
  0xbe   : > { %3789 = vmatpush1.bf16.xpose.msra.mxu0 %v3788_v46  ;;  %3853 = vmatpush1.bf16.xpose.msra.mxu1 %v3852_v47  ;;  %v574_v46 = vmul.f32 %v329_v39, %v329_v39  ;;  %v1588_v47 = vld [vmem:[#allocation5 + $0x2d0] sm:$0xff]  ;;  %v337_v23 = vld [vmem:[%s4800_s13 + $0x138] sm:$0xff]  ;;  %v1530_v25 = vld [vmem:[#allocation5 + $0x100] sm:$0xff] }
  0xbf   : > { %3791 = vmatprep.subr.bf16.mxu0 %v3790_v48  ;;  %3855 = vmatprep.subr.bf16.mxu1 %v3854_v52  ;;  %v1527_v48 = vld [vmem:[#allocation5 + $0xe8] sm:$0xff]  ;;  %v3864_v55 = vpack.c.bf16 %v1588_v47, %v1586_v43  ;;  %v338_v24 = vld [vmem:[%s4800_s13 + $0x140] sm:$0xff] }
  0xc0   : > { %666 = vadd.xlane.f32.xlu1 %v665_v36  ;;  %v3862_v36 = vpack.c.bf16 %v1589_v29, %v1587_v28  ;;  %v1591_v52 = vld [vmem:[#allocation5 + $0x2e8] sm:$0xff]  ;;  %v686_v57 = vadd.f32 %v574_v46, %v573_v45  ;;  %v1594_v27 = vld [vmem:[#allocation5 + $0x300] sm:$0xff]  ;;  %v695_v28 = vadd.f32 %v580_v19, %v579_v18  ;;  %v581_v29 = vmul.f32 %v336_v22, %v336_v22 }
  0xc1   : > { %421 = vadd.xlane.f32.xlu0 %v420_v42  ;;  %v1524_v42 = vld [vmem:[#allocation5 + $0xd0] sm:$0xff]  ;;  %v339_v35 = vld [vmem:[%s4800_s13 + $0x148] sm:$0xff]  ;;  %v453_v45 = vadd.f32 %v337_v23, %v336_v22  ;;  %v341_v47 = vld [vmem:[%s4800_s13 + $0x158] sm:$0xff] }
  0xc2   : > { %v3800_v54 = vpack.c.bf16 %v1524_v42, %v1522_v41  ;;  %v583_v42 = vmul.f32 %v338_v24, %v338_v24  ;;  %v584_v43 = vmul.f32 %v339_v35, %v339_v35  ;;  %v340_v46 = vld [vmem:[%s4800_s13 + $0x150] sm:$0xff]  ;;  %v456_v58 = vadd.f32 %v339_v35, %v338_v24  ;;  %v343_v59 = vld [vmem:[%s4800_s13 + $0x168] sm:$0xff] }
  0xc3   : > { %v1598_v51 = vld [vmem:[#allocation5 + $0x320] sm:$0xff]  ;;  %v347_v19 = vld [vmem:[%s4800_s13 + $0x188] sm:$0xff] }
  0xc4   : > { %669 = vadd.xlane.f32.xlu1 %v668_v49  ;;  %v1529_v49 = vld [vmem:[#allocation5 + $0xf8] sm:$0xff]  ;;  %v1602_v11 = vld [vmem:[#allocation5 + $0x340] sm:$0xff] }
  0xc5   : > { %424 = vadd.xlane.f32.xlu0 %v423_v53  ;;  %v1593_v53 = vld [vmem:[#allocation5 + $0x2f8] sm:$0xff]  ;;  %v3802_v56 = vpack.c.bf16 %v1529_v49, %v1527_v48  ;;  %v342_v48 = vld [vmem:[%s4800_s13 + $0x160] sm:$0xff] }
  0xc6   : > { %3793 = vmatpush1.bf16.xpose.msra.mxu0 %v3792_v6  ;;  %3857 = vmatpush1.bf16.xpose.msra.mxu1 %v3856_v7  ;;  %v578_v6 = vmul.f32 %v333_v63, %v333_v63  ;;  %v1592_v7 = vld [vmem:[#allocation5 + $0x2f0] sm:$0xff]  ;;  %v1534_v49 = vld [vmem:[#allocation5 + $0x120] sm:$0xff]  ;;  %v462_v18 = vadd.f32 %v343_v59, %v342_v48 }
  0xc7   : > { %3795 = vmatprep.subr.bf16.mxu0 %v3794_v8  ;;  %3859 = vmatprep.subr.bf16.mxu1 %v3858_v12  ;;  %v1531_v8 = vld [vmem:[#allocation5 + $0x108] sm:$0xff]  ;;  %v3868_v15 = vpack.c.bf16 %v1592_v7, %v1590_v3  ;;  %v588_v3 = vmul.f32 %v343_v59, %v343_v59  ;;  %v1606_v35 = vld [vmem:[#allocation5 + $0x360] sm:$0xff] }
  0xc8   : > { %672 = vadd.xlane.f32.xlu1 %v671_v60  ;;  %v3866_v60 = vpack.c.bf16 %v1593_v53, %v1591_v52  ;;  %v1595_v12 = vld [vmem:[#allocation5 + $0x308] sm:$0xff]  ;;  %v692_v17 = vadd.f32 %v578_v6, %v577_v5  ;;  %v701_v52 = vadd.f32 %v584_v43, %v583_v42  ;;  %v585_v53 = vmul.f32 %v340_v46, %v340_v46  ;;  %v344_v6 = vld [vmem:[%s4800_s13 + $0x170] sm:$0xff] }
  0xc9   : > { %427 = vadd.xlane.f32.xlu0 %v426_v2  ;;  %v1528_v2 = vld [vmem:[#allocation5 + $0xf0] sm:$0xff]  ;;  %v459_v5 = vadd.f32 %v341_v47, %v340_v46  ;;  %v345_v7 = vld [vmem:[%s4800_s13 + $0x178] sm:$0xff]  ;;  %v351_v43 = vld [vmem:[%s4800_s13 + $0x1a8] sm:$0xff] }
  0xca   : > { %v3804_v14 = vpack.c.bf16 %v1528_v2, %v1526_v1  ;;  %v587_v2 = vmul.f32 %v342_v48, %v342_v48  ;;  %v1610_v59 = vld [vmem:[#allocation5 + $0x380] sm:$0xff] }
  0xcc   : > { %675 = vadd.xlane.f32.xlu1 %v674_v9  ;;  %v1533_v9 = vld [vmem:[#allocation5 + $0x118] sm:$0xff] }
  0xcd   : > { %430 = vadd.xlane.f32.xlu0 %v429_v13  ;;  %v1597_v13 = vld [vmem:[#allocation5 + $0x318] sm:$0xff]  ;;  %v3806_v16 = vpack.c.bf16 %v1533_v9, %v1531_v8  ;;  %v346_v8 = vld [vmem:[%s4800_s13 + $0x180] sm:$0xff] }
  0xce   : > { %3797 = vmatpush1.bf16.xpose.msra.mxu0 %v3796_v30  ;;  %3861 = vmatpush1.bf16.xpose.msra.mxu1 %v3860_v31  ;;  %v582_v30 = vmul.f32 %v337_v23, %v337_v23  ;;  %v1596_v31 = vld [vmem:[#allocation5 + $0x310] sm:$0xff]  ;;  %v1538_v9 = vld [vmem:[#allocation5 + $0x140] sm:$0xff]  ;;  %v468_v42 = vadd.f32 %v347_v19, %v346_v8 }
  0xcf   : > { %3799 = vmatprep.subr.bf16.mxu0 %v3798_v32  ;;  %3863 = vmatprep.subr.bf16.mxu1 %v3862_v36  ;;  %v1535_v32 = vld [vmem:[#allocation5 + $0x128] sm:$0xff]  ;;  %v3872_v39 = vpack.c.bf16 %v1596_v31, %v1594_v27  ;;  %v592_v27 = vmul.f32 %v347_v19, %v347_v19  ;;  %v1614_v19 = vld [vmem:[#allocation5 + $0x3a0] sm:$0xff] }
  0xd0   : > { %678 = vadd.xlane.f32.xlu1 %v677_v20  ;;  %v3870_v20 = vpack.c.bf16 %v1597_v13, %v1595_v12  ;;  %v1599_v36 = vld [vmem:[#allocation5 + $0x328] sm:$0xff]  ;;  %v698_v41 = vadd.f32 %v582_v30, %v581_v29  ;;  %v707_v12 = vadd.f32 %v588_v3, %v587_v2  ;;  %v589_v13 = vmul.f32 %v344_v6, %v344_v6  ;;  %v348_v30 = vld [vmem:[%s4800_s13 + $0x190] sm:$0xff] }
  0xd1   : > { %433 = vadd.xlane.f32.xlu0 %v432_v26  ;;  %v1532_v26 = vld [vmem:[#allocation5 + $0x110] sm:$0xff]  ;;  %v465_v29 = vadd.f32 %v345_v7, %v344_v6  ;;  %v349_v31 = vld [vmem:[%s4800_s13 + $0x198] sm:$0xff]  ;;  %v355_v3 = vld [vmem:[%s4800_s13 + $0x1c8] sm:$0xff] }
  0xd2   : > { %v3808_v38 = vpack.c.bf16 %v1532_v26, %v1530_v25  ;;  %v591_v26 = vmul.f32 %v346_v8, %v346_v8 }
  0xd4   : > { %681 = vadd.xlane.f32.xlu1 %v680_v33  ;;  %v1537_v33 = vld [vmem:[#allocation5 + $0x138] sm:$0xff] }
  0xd5   : > { %436 = vadd.xlane.f32.xlu0 %v435_v37  ;;  %v1601_v37 = vld [vmem:[#allocation5 + $0x338] sm:$0xff]  ;;  %v3810_v40 = vpack.c.bf16 %v1537_v33, %v1535_v32  ;;  %v350_v32 = vld [vmem:[%s4800_s13 + $0x1a0] sm:$0xff] }
  0xd6   : > { %3801 = vmatpush1.bf16.xpose.msra.mxu0 %v3800_v54  ;;  %3865 = vmatpush1.bf16.xpose.msra.mxu1 %v3864_v55  ;;  %v586_v54 = vmul.f32 %v341_v47, %v341_v47  ;;  %v1600_v55 = vld [vmem:[#allocation5 + $0x330] sm:$0xff]  ;;  %v1542_v33 = vld [vmem:[#allocation5 + $0x160] sm:$0xff]  ;;  %v474_v2 = vadd.f32 %v351_v43, %v350_v32 }
  0xd7   : > { %3803 = vmatprep.subr.bf16.mxu0 %v3802_v56  ;;  %3867 = vmatprep.subr.bf16.mxu1 %v3866_v60  ;;  %v1539_v56 = vld [vmem:[#allocation5 + $0x148] sm:$0xff]  ;;  %v3876_v63 = vpack.c.bf16 %v1600_v55, %v1598_v51  ;;  %v596_v51 = vmul.f32 %v351_v43, %v351_v43  ;;  %v1618_v43 = vld [vmem:[#allocation5 + $0x3c0] sm:$0xff] }
  0xd8   : > { %684 = vadd.xlane.f32.xlu1 %v683_v44  ;;  %v3874_v44 = vpack.c.bf16 %v1601_v37, %v1599_v36  ;;  %v1603_v60 = vld [vmem:[#allocation5 + $0x348] sm:$0xff]  ;;  %v704_v1 = vadd.f32 %v586_v54, %v585_v53  ;;  %v713_v36 = vadd.f32 %v592_v27, %v591_v26  ;;  %v593_v37 = vmul.f32 %v348_v30, %v348_v30  ;;  %v352_v54 = vld [vmem:[%s4800_s13 + $0x1b0] sm:$0xff] }
  0xd9   : > { %439 = vadd.xlane.f32.xlu0 %v438_v50  ;;  %v1536_v50 = vld [vmem:[#allocation5 + $0x130] sm:$0xff]  ;;  %v471_v53 = vadd.f32 %v349_v31, %v348_v30  ;;  %v353_v55 = vld [vmem:[%s4800_s13 + $0x1b8] sm:$0xff]  ;;  %v359_v27 = vld [vmem:[%s4800_s13 + $0x1e8] sm:$0xff] }
  0xda   : > { %v3812_v62 = vpack.c.bf16 %v1536_v50, %v1534_v49  ;;  %v595_v50 = vmul.f32 %v350_v32, %v350_v32 }
  0xdc   : > { %687 = vadd.xlane.f32.xlu1 %v686_v57  ;;  %v1541_v57 = vld [vmem:[#allocation5 + $0x158] sm:$0xff] }
  0xdd   : > { %442 = vadd.xlane.f32.xlu0 %v441_v61  ;;  %v1605_v61 = vld [vmem:[#allocation5 + $0x358] sm:$0xff]  ;;  %v3814_v0 = vpack.c.bf16 %v1541_v57, %v1539_v56  ;;  %v354_v56 = vld [vmem:[%s4800_s13 + $0x1c0] sm:$0xff] }
  0xde   : > { %3805 = vmatpush1.bf16.xpose.msra.mxu0 %v3804_v14  ;;  %3869 = vmatpush1.bf16.xpose.msra.mxu1 %v3868_v15  ;;  %v590_v14 = vmul.f32 %v345_v7, %v345_v7  ;;  %v1604_v15 = vld [vmem:[#allocation5 + $0x350] sm:$0xff]  ;;  %v1546_v57 = vld [vmem:[#allocation5 + $0x180] sm:$0xff]  ;;  %v480_v26 = vadd.f32 %v355_v3, %v354_v56 }
  0xdf   : > { %3807 = vmatprep.subr.bf16.mxu0 %v3806_v16  ;;  %3871 = vmatprep.subr.bf16.mxu1 %v3870_v20  ;;  %v1543_v16 = vld [vmem:[#allocation5 + $0x168] sm:$0xff]  ;;  %v3880_v23 = vpack.c.bf16 %v1604_v15, %v1602_v11  ;;  %v600_v11 = vmul.f32 %v355_v3, %v355_v3  ;;  %v1622_v3 = vld [vmem:[#allocation5 + $0x3e0] sm:$0xff] }
  0xe0   : > { %690 = vadd.xlane.f32.xlu1 %v689_v4  ;;  %v3878_v4 = vpack.c.bf16 %v1605_v61, %v1603_v60  ;;  %v1607_v20 = vld [vmem:[#allocation5 + $0x368] sm:$0xff]  ;;  %v710_v25 = vadd.f32 %v590_v14, %v589_v13  ;;  %v719_v60 = vadd.f32 %v596_v51, %v595_v50  ;;  %v597_v61 = vmul.f32 %v352_v54, %v352_v54  ;;  %v356_v14 = vld [vmem:[%s4800_s13 + $0x1d0] sm:$0xff] }
  0xe1   : > { %445 = vadd.xlane.f32.xlu0 %v444_v10  ;;  %v1540_v10 = vld [vmem:[#allocation5 + $0x150] sm:$0xff]  ;;  %v477_v13 = vadd.f32 %v353_v55, %v352_v54  ;;  %v357_v15 = vld [vmem:[%s4800_s13 + $0x1d8] sm:$0xff]  ;;  %v363_v51 = vld [vmem:[%s4800_s13 + $0x208] sm:$0xff] }
  0xe2   : > { %v3816_v22 = vpack.c.bf16 %v1540_v10, %v1538_v9  ;;  %v599_v10 = vmul.f32 %v354_v56, %v354_v56 }
  0xe4   : > { %693 = vadd.xlane.f32.xlu1 %v692_v17  ;;  %v1545_v17 = vld [vmem:[#allocation5 + $0x178] sm:$0xff] }
  0xe5   : > { %448 = vadd.xlane.f32.xlu0 %v447_v21  ;;  %v1609_v21 = vld [vmem:[#allocation5 + $0x378] sm:$0xff]  ;;  %v3818_v24 = vpack.c.bf16 %v1545_v17, %v1543_v16  ;;  %v358_v16 = vld [vmem:[%s4800_s13 + $0x1e0] sm:$0xff] }
  0xe6   : > { %3809 = vmatpush1.bf16.xpose.msra.mxu0 %v3808_v38  ;;  %3873 = vmatpush1.bf16.xpose.msra.mxu1 %v3872_v39  ;;  %v594_v38 = vmul.f32 %v349_v31, %v349_v31  ;;  %v1608_v39 = vld [vmem:[#allocation5 + $0x370] sm:$0xff]  ;;  %v1550_v17 = vld [vmem:[#allocation5 + $0x1a0] sm:$0xff]  ;;  %v486_v50 = vadd.f32 %v359_v27, %v358_v16 }
  0xe7   : > { %3811 = vmatprep.subr.bf16.mxu0 %v3810_v40  ;;  %3875 = vmatprep.subr.bf16.mxu1 %v3874_v44  ;;  %v1547_v40 = vld [vmem:[#allocation5 + $0x188] sm:$0xff]  ;;  %v3884_v47 = vpack.c.bf16 %v1608_v39, %v1606_v35  ;;  %v604_v35 = vmul.f32 %v359_v27, %v359_v27  ;;  %v372_v27 = vld [vmem:[%s4800_s13 + $0x250] sm:$0xff] }
  0xe8   : > { %696 = vadd.xlane.f32.xlu1 %v695_v28  ;;  %v3882_v28 = vpack.c.bf16 %v1609_v21, %v1607_v20  ;;  %v1611_v44 = vld [vmem:[#allocation5 + $0x388] sm:$0xff]  ;;  %v716_v49 = vadd.f32 %v594_v38, %v593_v37  ;;  %v725_v20 = vadd.f32 %v600_v11, %v599_v10  ;;  %v601_v21 = vmul.f32 %v356_v14, %v356_v14  ;;  %v360_v38 = vld [vmem:[%s4800_s13 + $0x1f0] sm:$0xff] }
  0xe9   : > { %451 = vadd.xlane.f32.xlu0 %v450_v34  ;;  %v1544_v34 = vld [vmem:[#allocation5 + $0x170] sm:$0xff]  ;;  %v483_v37 = vadd.f32 %v357_v15, %v356_v14  ;;  %v361_v39 = vld [vmem:[%s4800_s13 + $0x1f8] sm:$0xff]  ;;  %v367_v11 = vld [vmem:[%s4800_s13 + $0x228] sm:$0xff] }
  0xea   : > { %v3820_v46 = vpack.c.bf16 %v1544_v34, %v1542_v33  ;;  %v603_v34 = vmul.f32 %v358_v16, %v358_v16  ;;  %v1280_v16 = vlaneseq }
  0xec   : > { %699 = vadd.xlane.f32.xlu1 %v698_v41  ;;  %v1549_v41 = vld [vmem:[#allocation5 + $0x198] sm:$0xff] }
  0xed   : > { %454 = vadd.xlane.f32.xlu0 %v453_v45  ;;  %v1613_v45 = vld [vmem:[#allocation5 + $0x398] sm:$0xff]  ;;  %v3822_v48 = vpack.c.bf16 %v1549_v41, %v1547_v40  ;;  %v362_v40 = vld [vmem:[%s4800_s13 + $0x200] sm:$0xff] }
  0xee   : > { %3813 = vmatpush1.bf16.xpose.msra.mxu0 %v3812_v62  ;;  %3877 = vmatpush1.bf16.xpose.msra.mxu1 %v3876_v63  ;;  %v598_v62 = vmul.f32 %v353_v55, %v353_v55  ;;  %v1612_v63 = vld [vmem:[#allocation5 + $0x390] sm:$0xff]  ;;  %v1554_v41 = vld [vmem:[#allocation5 + $0x1c0] sm:$0xff]  ;;  %v492_v10 = vadd.f32 %v363_v51, %v362_v40 }
  0xef   : > { %3815 = vmatprep.subr.bf16.mxu0 %v3814_v0  ;;  %3879 = vmatprep.subr.bf16.mxu1 %v3878_v4  ;;  %v1551_v0 = vld [vmem:[#allocation5 + $0x1a8] sm:$0xff]  ;;  %v3888_v7 = vpack.c.bf16 %v1612_v63, %v1610_v59  ;;  %v608_v59 = vmul.f32 %v363_v51, %v363_v51 }
  0xf0   : > { %702 = vadd.xlane.f32.xlu1 %v701_v52  ;;  %v3886_v52 = vpack.c.bf16 %v1613_v45, %v1611_v44  ;;  %v1615_v4 = vld [vmem:[#allocation5 + $0x3a8] sm:$0xff]  ;;  %v722_v9 = vadd.f32 %v598_v62, %v597_v61  ;;  %v731_v44 = vadd.f32 %v604_v35, %v603_v34  ;;  %v605_v45 = vmul.f32 %v360_v38, %v360_v38  ;;  %v364_v62 = vld [vmem:[%s4800_s13 + $0x210] sm:$0xff] }
  0xf1   : > { %457 = vadd.xlane.f32.xlu0 %v456_v58  ;;  %v1548_v58 = vld [vmem:[#allocation5 + $0x190] sm:$0xff]  ;;  %v489_v61 = vadd.f32 %v361_v39, %v360_v38  ;;  %v365_v63 = vld [vmem:[%s4800_s13 + $0x218] sm:$0xff]  ;;  %v4896_v38 = vshrl.u32 %v1280_v16, 7 }
  0xf2   : > { %v3824_v6 = vpack.c.bf16 %v1548_v58, %v1546_v57  ;;  %v607_v58 = vmul.f32 %v362_v40, %v362_v40  ;;  %v377_v35 = vld [vmem:[%s4800_s13 + $0x278] sm:$0xff]  ;;  %v388_v16 = vld [vmem:[%s4800_s13 + $0x2d0] sm:$0xff] }
  0xf3   : > { %7749 = vst [vmem:[#allocation16_spill] sm:$0xff] %v4896_v38 }
  0xf4   : > { %705 = vadd.xlane.f32.xlu1 %v704_v1  ;;  %v1553_v1 = vld [vmem:[#allocation5 + $0x1b8] sm:$0xff] }
  0xf5   : > { %460 = vadd.xlane.f32.xlu0 %v459_v5  ;;  %v1617_v5 = vld [vmem:[#allocation5 + $0x3b8] sm:$0xff]  ;;  %v3826_v8 = vpack.c.bf16 %v1553_v1, %v1551_v0  ;;  %v366_v0 = vld [vmem:[%s4800_s13 + $0x220] sm:$0xff] }
  0xf6   : > { %3817 = vmatpush1.bf16.xpose.msra.mxu0 %v3816_v22  ;;  %3881 = vmatpush1.bf16.xpose.msra.mxu1 %v3880_v23  ;;  %v602_v22 = vmul.f32 %v357_v15, %v357_v15  ;;  %v1616_v23 = vld [vmem:[#allocation5 + $0x3b0] sm:$0xff]  ;;  %v1558_v1 = vld [vmem:[#allocation5 + $0x1e0] sm:$0xff] }
  0xf7   : > { %3819 = vmatprep.subr.bf16.mxu0 %v3818_v24  ;;  %3883 = vmatprep.subr.bf16.mxu1 %v3882_v28  ;;  %v1555_v24 = vld [vmem:[#allocation5 + $0x1c8] sm:$0xff]  ;;  %v3892_v31 = vpack.c.bf16 %v1616_v23, %v1614_v19  ;;  %v611_v19 = vmul.f32 %v366_v0, %v366_v0  ;;  %v368_v23 = vld [vmem:[%s4800_s13 + $0x230] sm:$0xff] }
  0xf8   : > { %708 = vadd.xlane.f32.xlu1 %v707_v12  ;;  %v3890_v12 = vpack.c.bf16 %v1617_v5, %v1615_v4  ;;  %v1619_v28 = vld [vmem:[#allocation5 + $0x3c8] sm:$0xff]  ;;  %v728_v33 = vadd.f32 %v602_v22, %v601_v21  ;;  %v737_v4 = vadd.f32 %v608_v59, %v607_v58  ;;  %v609_v5 = vmul.f32 %v364_v62, %v364_v62 }
  0xf9   : > { %463 = vadd.xlane.f32.xlu0 %v462_v18  ;;  %v1552_v18 = vld [vmem:[#allocation5 + $0x1b0] sm:$0xff]  ;;  %v495_v22 = vadd.f32 %v365_v63, %v364_v62 }
  0xfa   : > { %v3828_v30 = vpack.c.bf16 %v1552_v18, %v1550_v17 }
  0xfc   : > { %711 = vadd.xlane.f32.xlu1 %v710_v25  ;;  %v1557_v25 = vld [vmem:[#allocation5 + $0x1d8] sm:$0xff] }
  0xfd   : > { %466 = vadd.xlane.f32.xlu0 %v465_v29  ;;  %v1621_v29 = vld [vmem:[#allocation5 + $0x3d8] sm:$0xff]  ;;  %v3830_v32 = vpack.c.bf16 %v1557_v25, %v1555_v24  ;;  %v370_v25 = vld [vmem:[%s4800_s13 + $0x240] sm:$0xff] }
  0xfe   : > { %3821 = vmatpush1.bf16.xpose.msra.mxu0 %v3820_v46  ;;  %3885 = vmatpush1.bf16.xpose.msra.mxu1 %v3884_v47  ;;  %v606_v46 = vmul.f32 %v361_v39, %v361_v39  ;;  %v1620_v47 = vld [vmem:[#allocation5 + $0x3d0] sm:$0xff]  ;;  %v369_v24 = vld [vmem:[%s4800_s13 + $0x238] sm:$0xff]  ;;  %v498_v39 = vadd.f32 %v367_v11, %v366_v0  ;;  %v615_v40 = vmul.f32 %v370_v25, %v370_v25 }
  0xff   : > { %3823 = vmatprep.subr.bf16.mxu0 %v3822_v48  ;;  %3887 = vmatprep.subr.bf16.mxu1 %v3886_v52  ;;  %v1559_v48 = vld [vmem:[#allocation5 + $0x1e8] sm:$0xff]  ;;  %v3896_v55 = vpack.c.bf16 %v1620_v47, %v1618_v43  ;;  %v614_v34 = vmul.f32 %v369_v24, %v369_v24 }
 0x100   : > { %714 = vadd.xlane.f32.xlu1 %v713_v36  ;;  %v3894_v36 = vpack.c.bf16 %v1621_v29, %v1619_v28  ;;  %v1623_v52 = vld [vmem:[#allocation5 + $0x3e8] sm:$0xff]  ;;  %v734_v57 = vadd.f32 %v606_v46, %v605_v45  ;;  %v374_v29 = vld [vmem:[%s4800_s13 + $0x260] sm:$0xff]  ;;  %v380_v46 = vld [vmem:[%s4800_s13 + $0x290] sm:$0xff] }
 0x101   : > { %469 = vadd.xlane.f32.xlu0 %v468_v42  ;;  %v1556_v42 = vld [vmem:[#allocation5 + $0x1d0] sm:$0xff]  ;;  %v373_v28 = vld [vmem:[%s4800_s13 + $0x258] sm:$0xff]  ;;  %v625_v58 = vmul.f32 %v380_v46, %v380_v46 }
 0x102   : > { %v3832_v54 = vpack.c.bf16 %v1556_v42, %v1554_v41  ;;  %v617_v42 = vmul.f32 %v372_v27, %v372_v27  ;;  %v618_v43 = vmul.f32 %v373_v28, %v373_v28  ;;  %v381_v47 = vld [vmem:[%s4800_s13 + $0x298] sm:$0xff]  ;;  %v4908_v62 = vadd.f32 %v373_v28, %v372_v27  ;;  %v4951_v27 = vld [vmem:[#allocation5 + $0x600] sm:$0xff]  ;;  %v4953_v28 = vld [vmem:[#allocation5 + $0x610] sm:$0xff] }
 0x103   : > { %v626_v59 = vmul.f32 %v381_v47, %v381_v47 }
 0x104   : > { %717 = vadd.xlane.f32.xlu1 %v716_v49  ;;  %v1561_v49 = vld [vmem:[#allocation5 + $0x1f8] sm:$0xff] }
 0x105   : > { %472 = vadd.xlane.f32.xlu0 %v471_v53  ;;  %v1625_v53 = vld [vmem:[#allocation5 + $0x3f8] sm:$0xff]  ;;  %v3834_v56 = vpack.c.bf16 %v1561_v49, %v1559_v48  ;;  %v622_v49 = vmul.f32 %v377_v35, %v377_v35 }
 0x106   : > { %3825 = vmatpush1.bf16.xpose.msra.mxu0 %v3824_v6  ;;  %3889 = vmatpush1.bf16.xpose.msra.mxu1 %v3888_v7  ;;  %v610_v6 = vmul.f32 %v365_v63, %v365_v63  ;;  %v1624_v7 = vld [vmem:[#allocation5 + $0x3f0] sm:$0xff]  ;;  %v4910_v63 = vadd.f32 %v618_v43, %v617_v42 }
 0x107   : > { %3827 = vmatprep.subr.bf16.mxu0 %v3826_v8  ;;  %3891 = vmatprep.subr.bf16.mxu1 %v3890_v12  ;;  %v1627_v8 = vld [vmem:[#allocation5 + $0x408] sm:$0xff]  ;;  %v3900_v15 = vpack.c.bf16 %v1624_v7, %v1622_v3 }
 0x108   : > { %720 = vadd.xlane.f32.xlu1 %v719_v60  ;;  %v3898_v60 = vpack.c.bf16 %v1625_v53, %v1623_v52  ;;  %v1691_v12 = vld [vmem:[#allocation5 + $0x608] sm:$0xff]  ;;  %v740_v18 = vadd.f32 %v610_v6, %v609_v5  ;;  %v501_v52 = vadd.f32 %v369_v24, %v368_v23  ;;  %v4947_v24 = vld [vmem:[#allocation5 + $0x410] sm:$0xff] }
 0x109   : > { %475 = vadd.xlane.f32.xlu0 %v474_v2  ;;  %v1560_v2 = vld [vmem:[#allocation5 + $0x1f0] sm:$0xff]  ;;  %v1388_v3 = vld [vmem:[#allocation10] sm:$0x3] }
 0x10a   : > { %v3836_v14 = vpack.c.bf16 %v1560_v2, %v1558_v1  ;;  %v1278_v2 = vld [vmem:[#allocation8] sm:$0x3] }
 0x10c   : > { %723 = vadd.xlane.f32.xlu1 %v722_v9  ;;  %v1629_v9 = vld [vmem:[#allocation5 + $0x418] sm:$0xff] }
 0x10d   : > { %478 = vadd.xlane.f32.xlu0 %v477_v13  ;;  %v1693_v13 = vld [vmem:[#allocation5 + $0x618] sm:$0xff]  ;;  %v3902_v17 = vpack.c.bf16 %v1629_v9, %v1627_v8  ;;  %v384_v8 = vld [vmem:[%s4800_s13 + $0x2b0] sm:$0xff] }
 0x10e   : > { %3829 = vmatpush1.bf16.xpose.msra.mxu0 %v3828_v30  ;;  %3893 = vmatpush1.bf16.xpose.msra.mxu1 %v3892_v31  ;;  %v3966_v21 = vpack.c.bf16 %v1693_v13, %v1691_v12  ;;  %v375_v30 = vld [vmem:[%s4800_s13 + $0x268] sm:$0xff]  ;;  %v376_v31 = vld [vmem:[%s4800_s13 + $0x270] sm:$0xff]  ;;  %v385_v9 = vld [vmem:[%s4800_s13 + $0x2b8] sm:$0xff] }
 0x10f   : > { %3831 = vmatprep.subr.bf16.mxu0 %v3830_v32  ;;  %3895 = vmatprep.subr.bf16.mxu1 %v3894_v36  ;;  %v378_v36 = vld [vmem:[%s4800_s13 + $0x280] sm:$0xff]  ;;  %v620_v45 = vmul.f32 %v375_v30, %v375_v30  ;;  %v621_v48 = vmul.f32 %v376_v31, %v376_v31  ;;  %v4912_v0 = vadd.f32 %v375_v30, %v374_v29 }
 0x110   : > { %726 = vadd.xlane.f32.xlu1 %v725_v20  ;;  %v612_v20 = vmul.f32 %v367_v11, %v367_v11  ;;  %v4927_v11 = vadd.f32 %v381_v47, %v380_v46  ;;  %v630_v30 = vmul.f32 %v385_v9, %v385_v9  ;;  %v4976_v46 = vld [vmem:[#allocation5 + $0x430] sm:$0xff] }
 0x111   : > { %481 = vadd.xlane.f32.xlu0 %v480_v26  ;;  %v371_v26 = vld [vmem:[%s4800_s13 + $0x248] sm:$0xff]  ;;  %v4918_v5 = vadd.f32 %v622_v49, %v621_v48  ;;  %7754 = vst [vmem:[#allocation21_spill] sm:$0xff] %v4976_v46  ;;  %v4980_v49 = vadd.f32 %v385_v9, %v384_v8 }
 0x112   : > { %v743_v32 = vadd.f32 %v612_v20, %v611_v19  ;;  %v616_v41 = vmul.f32 %v371_v26, %v371_v26  ;;  %v4934_v19 = vadd.f32 %v626_v59, %v625_v58  ;;  %v5030_v48 = vld [vmem:[#allocation5 + $0x468] sm:$0xff]  ;;  %v5054_v46 = vld [vmem:[#allocation5 + $0x498] sm:$0xff] }
 0x113   : > { %7769 = vst [vmem:[#allocation36_spill] sm:$0xff] %v5054_v46 }
 0x114   : > { %729 = vadd.xlane.f32.xlu1 %v728_v33  ;;  %v613_v33 = vmul.f32 %v368_v23, %v368_v23  ;;  %v4945_v23 = vld [vmem:[#allocation5 + $0x400] sm:$0xff] }
 0x115   : > { %484 = vadd.xlane.f32.xlu0 %v483_v37  ;;  %v379_v37 = vld [vmem:[%s4800_s13 + $0x288] sm:$0xff] }
 0x116   : > { %3833 = vmatpush1.bf16.xpose.msra.mxu0 %v3832_v54  ;;  %3897 = vmatpush1.bf16.xpose.msra.mxu1 %v3896_v55  ;;  %v624_v51 = vmul.f32 %v379_v37, %v379_v37  ;;  %v746_v53 = vadd.f32 %v614_v34, %v613_v33  ;;  %v4901_v54 = vsub.s32 1, %v4896_v38  ;;  %v4904_v55 = vsub.s32 0, %v4896_v38  ;;  %v5038_v38 = vld [vmem:[#allocation5 + $0x678] sm:$0xff] }
 0x117   : > { %3835 = vmatprep.subr.bf16.mxu0 %v3834_v56  ;;  %3899 = vmatprep.subr.bf16.mxu1 %v3898_v60  ;;  %v504_v56 = vadd.f32 %v371_v26, %v370_v25  ;;  %v382_v60 = vld [vmem:[%s4800_s13 + $0x2a0] sm:$0xff]  ;;  %v4920_v6 = vadd.f32 %v379_v37, %v378_v36  ;;  %v4959_v37 = vld [vmem:[#allocation5 + $0x438] sm:$0xff]  ;;  %7766 = vst [vmem:[#allocation33_spill] sm:$0xff] %v5038_v38 }
 0x118   : > { %732 = vadd.xlane.f32.xlu1 %v731_v44  ;;  %v619_v44 = vmul.f32 %v374_v29, %v374_v29  ;;  %7750 = vst [vmem:[#allocation17_spill] sm:$0xff] %v4901_v54  ;;  %7751 = vst [vmem:[#allocation18_spill] sm:$0xff] %v4904_v55  ;;  %v627_v13 = vmul.f32 %v382_v60, %v382_v60  ;;  %v4937_v20 = vrot.slane %v1278_v2, %v4901_v54 }
 0x119   : > { %487 = vadd.xlane.f32.xlu0 %v486_v50  ;;  %v623_v50 = vmul.f32 %v378_v36, %v378_v36  ;;  %v629_v29 = vmul.f32 %v384_v8, %v384_v8  ;;  %v4970_v43 = vrot.slane %v1388_v3, %v4904_v55  ;;  %v393_v8 = vld [vmem:[%s4800_s13 + $0x2f8] sm:$0xff] }
 0x11a   : > { %v4914_v1 = vadd.f32 %v620_v45, %v619_v44  ;;  %v4974_v45 = vld [vmem:[#allocation5 + $0x420] sm:$0xff] }
 0x11b   : > { %v4922_v7 = vadd.f32 %v624_v51, %v623_v50  ;;  %7753 = vst [vmem:[#allocation20_spill] sm:$0xff] %v4974_v45  ;;  %v5044_v45 = vld [vmem:[#allocation5 + $0x460] sm:$0xff] }
 0x11c   : > { %735 = vadd.xlane.f32.xlu1 %v734_v57  ;;  %v749_v57 = vadd.f32 %v616_v41, %v615_v40  ;;  %v4963_v40 = vld [vmem:[#allocation5 + $0x638] sm:$0xff] }
 0x11d   : > { %490 = vadd.xlane.f32.xlu0 %v489_v61  ;;  %v383_v61 = vld [vmem:[%s4800_s13 + $0x2a8] sm:$0xff] }
 0x11e   : > { %3837 = vmatpush1.bf16.xpose.msra.mxu0 %v3836_v14  ;;  %3901 = vmatpush1.bf16.xpose.msra.mxu1 %v3900_v15  ;;  %v4929_v12 = vadd.f32 %v383_v61, %v382_v60  ;;  %v628_v14 = vmul.f32 %v383_v61, %v383_v61  ;;  %v387_v15 = vld [vmem:[%s4800_s13 + $0x2c8] sm:$0xff]  ;;  %v5028_v60 = vld [vmem:[#allocation5 + $0x650] sm:$0xff] }
 0x11f   : > { %3903 = vmatprep.subr.bf16.mxu0 %v3902_v17  ;;  %3967 = vmatprep.subr.bf16.mxu1 %v3966_v21  ;;  %v389_v17 = vld [vmem:[%s4800_s13 + $0x2d8] sm:$0xff]  ;;  %v4940_v21 = vrot.slane %v1388_v3, %v4901_v54  ;;  %v632_v34 = vmul.f32 %v387_v15, %v387_v15  ;;  %v392_v3 = vld [vmem:[%s4800_s13 + $0x2f0] sm:$0xff] }
 0x120   : > { %738 = vadd.xlane.f32.xlu1 %v737_v4  ;;  %v4916_v4 = vadd.f32 %v377_v35, %v376_v31  ;;  %v633_v35 = vmul.f32 %v388_v16, %v388_v16  ;;  %v634_v36 = vmul.f32 %v389_v17, %v389_v17  ;;  %v4967_v42 = vadd.f32 %v628_v14, %v627_v13  ;;  %v5015_v61 = vld [vmem:[#allocation5 + $0x648] sm:$0xff] }
 0x121   : > { %493 = vadd.xlane.f32.xlu0 %v492_v10  ;;  %v386_v10 = vld [vmem:[%s4800_s13 + $0x2c0] sm:$0xff]  ;;  %v4984_v51 = vadd.f32 %v389_v17, %v388_v16  ;;  %v395_v16 = vld [vmem:[%s4800_s13 + $0x308] sm:$0xff]  ;;  %7762 = vst [vmem:[#allocation29_spill] sm:$0xff] %v5015_v61 }
 0x122   : > { %v631_v31 = vmul.f32 %v386_v10, %v386_v10  ;;  %v4982_v50 = vadd.f32 %v387_v15, %v386_v10  ;;  %v5004_v14 = vadd.f32 %v634_v36, %v633_v35  ;;  %v394_v15 = vld [vmem:[%s4800_s13 + $0x300] sm:$0xff]  ;;  %v5008_v17 = vld [vmem:[#allocation5 + $0x448] sm:$0xff]  ;;  %v640_v54 = vmul.f32 %v395_v16, %v395_v16 }
 0x123   : > { %7756 = vst [vmem:[#allocation23_spill] sm:$0xff] %v4984_v51  ;;  %7761 = vst [vmem:[#allocation28_spill] sm:$0xff] %v5008_v17  ;;  %v5036_v36 = vld [vmem:[#allocation5 + $0x668] sm:$0xff]  ;;  %v5102_v61 = vld [vmem:[#allocation5 + $0x6a0] sm:$0xff] }
 0x124   : > { %741 = vadd.xlane.f32.xlu1 %v740_v18  ;;  %7755 = vst [vmem:[#allocation22_spill] sm:$0xff] %v4982_v50  ;;  %v5002_v13 = vadd.f32 %v632_v34, %v631_v31  ;;  %7760 = vst [vmem:[#allocation27_spill] sm:$0xff] %v5004_v14  ;;  %v5017_v31 = vld [vmem:[#allocation5 + $0x658] sm:$0xff]  ;;  %v5071_v50 = vld [vmem:[#allocation5 + $0x680] sm:$0xff] }
 0x125   : > { %496 = vadd.xlane.f32.xlu0 %v495_v22  ;;  %v4943_v22 = vrot.slane %v1278_v2, %v4904_v55  ;;  %v4996_v2 = vld [vmem:[#allocation5 + $0x630] sm:$0xff]  ;;  %7763 = vst [vmem:[#allocation30_spill] sm:$0xff] %v5017_v31  ;;  %v5034_v55 = vld [vmem:[#allocation5 + $0x478] sm:$0xff]  ;;  %7765 = vst [vmem:[#allocation32_spill] sm:$0xff] %v5036_v36 }
 0x126   : > { %7758 = vst [vmem:[#allocation25_spill] sm:$0xff] %v4996_v2  ;;  %7759 = vst [vmem:[#allocation26_spill] sm:$0xff] %v5002_v13  ;;  %v5042_v2 = vadd.f32 %v393_v8, %v392_v3  ;;  %v5056_v13 = vld [vmem:[#allocation5 + $0x688] sm:$0xff]  ;;  %v5127_v36 = vld [vmem:[#allocation5 + $0x4c0] sm:$0xff] }
 0x127   : > { %7770 = vst [vmem:[#allocation37_spill] sm:$0xff] %v5056_v13  ;;  %7776 = vst [vmem:[#allocation43_spill] sm:$0xff] %v5071_v50  ;;  %v5138_v13 = vld [vmem:[#allocation5 + $0x6c0] sm:$0xff]  ;;  %v5150_v50 = vld [vmem:[#allocation5 + $0x4e8] sm:$0xff] }
 0x128   : > { %744 = vadd.xlane.f32.xlu1 %v743_v32  ;;  %v4955_v32 = vld [vmem:[#allocation5 + $0x428] sm:$0xff]  ;;  %7767 = vst [vmem:[#allocation34_spill] sm:$0xff] %v5042_v2  ;;  %v5069_v2 = vld [vmem:[#allocation5 + $0x490] sm:$0xff]  ;;  %7780 = vst [vmem:[#allocation47_spill] sm:$0xff] %v5102_v61 }
 0x129   : > { %499 = vadd.xlane.f32.xlu0 %v498_v39  ;;  %v4961_v39 = vld [vmem:[#allocation5 + $0x628] sm:$0xff]  ;;  %7775 = vst [vmem:[#allocation42_spill] sm:$0xff] %v5069_v2  ;;  %7786 = vst [vmem:[#allocation53_spill] sm:$0xff] %v5127_v36 }
 0x12a   : > { %7752 = vst [vmem:[#allocation19_spill] sm:$0xff] %v4961_v39  ;;  %v5073_v39 = vld [vmem:[#allocation5 + $0x690] sm:$0xff]  ;;  %7788 = vst [vmem:[#allocation55_spill] sm:$0xff] %v5138_v13 }
 0x12b   : > { %7777 = vst [vmem:[#allocation44_spill] sm:$0xff] %v5073_v39  ;;  %7790 = vst [vmem:[#allocation57_spill] sm:$0xff] %v5150_v50  ;;  %v5152_v39 = vld [vmem:[#allocation5 + $0x4f8] sm:$0xff] }
 0x12c   : > { %747 = vadd.xlane.f32.xlu1 %v746_v53  ;;  %v390_v53 = vld [vmem:[%s4800_s13 + $0x2e0] sm:$0xff]  ;;  %7791 = vst [vmem:[#allocation58_spill] sm:$0xff] %v5152_v39 }
 0x12d   : > { %502 = vadd.xlane.f32.xlu0 %v501_v52  ;;  %v401_v18 = vpop.xlane.xlu1 %400  ;;  %v4986_v52 = vld [vmem:[#allocation5 + $0x620] sm:$0xff] }
 0x12e   : > { %v4949_v25 = vmul.f32 0.00390625, %v401_v18  ;;  %v398_v26 = vpop.xlane.xlu0 %397  ;;  %7757 = vst [vmem:[#allocation24_spill] sm:$0xff] %v4986_v52 }
 0x12f   : > { %v4957_v33 = vmul.f32 0.00390625, %v398_v26  ;;  %v5026_v26 = vld [vmem:[#allocation5 + $0x640] sm:$0xff] }
 0x130   : > { %v887_v41 = vmul.f32 %v4949_v25, %v4949_v25  ;;  %750 = vadd.xlane.f32.xlu1 %v749_v57  ;;  %v391_v57 = vld [vmem:[%s4800_s13 + $0x2e8] sm:$0xff] }
 0x131   : > { %505 = vadd.xlane.f32.xlu0 %v504_v56  ;;  %v646_v47 = vpop.xlane.xlu1 %645  ;;  %v4990_v56 = vadd.f32 %v630_v30, %v629_v29  ;;  %v886_v9 = vmul.f32 %v4957_v33, %v4957_v33  ;;  %v635_v29 = vmul.f32 %v390_v53, %v390_v53  ;;  %v636_v30 = vmul.f32 %v391_v57, %v391_v57 }
 0x132   : > { %v838_v58 = vmul.f32 0.00390625, %v646_v47  ;;  %v643_v59 = vpop.xlane.xlu0 %642  ;;  %v5013_v47 = vld [vmem:[#allocation5 + $0x458] sm:$0xff] }
 0x133   : > { %v837_v10 = vmul.f32 0.00390625, %v643_v59  ;;  %v5024_v59 = vld [vmem:[#allocation5 + $0x450] sm:$0xff] }
 0x134   : > { %v936_v18 = vsub.f32 %v838_v58, %v887_v41  ;;  %753 = vadd.xlane.f32.xlu1 %v4910_v63  ;;  %v637_v41 = vmul.f32 %v392_v3, %v392_v3  ;;  %v638_v63 = vmul.f32 %v393_v8, %v393_v8  ;;  %v5022_v58 = vld [vmem:[#allocation5 + $0x440] sm:$0xff]  ;;  %v5061_v3 = vadd.f32 %v636_v30, %v635_v29  ;;  %v5082_v29 = vld [vmem:[#allocation5 + $0x4a8] sm:$0xff]  ;;  %v5084_v30 = vld [vmem:[#allocation5 + $0x4b8] sm:$0xff] }
 0x135   : > { %v935_v34 = vsub.f32 %v837_v10, %v886_v9  ;;  %508 = vadd.xlane.f32.xlu0 %v4908_v62  ;;  %v649_v35 = vpop.xlane.xlu1 %648  ;;  %v5032_v10 = vadd.f32 %v391_v57, %v390_v53  ;;  %v639_v62 = vmul.f32 %v394_v15, %v394_v15  ;;  %v5048_v53 = vld [vmem:[#allocation5 + $0x660] sm:$0xff]  ;;  %v5050_v57 = vld [vmem:[#allocation5 + $0x670] sm:$0xff]  ;;  %v5063_v8 = vadd.f32 %v395_v16, %v394_v15 }
 0x136   : > { %v1083_v44 = vadd.f32 1e-06, %v936_v18  ;;  %v404_v9 = vpop.xlane.xlu0 %403  ;;  %v839_v52 = vmul.f32 0.00390625, %v649_v35  ;;  %v5046_v18 = vld [vmem:[#allocation5 + $0x470] sm:$0xff]  ;;  %7772 = vst [vmem:[#allocation39_spill] sm:$0xff] %v5061_v3  ;;  %v5078_v15 = vadd.f32 %v638_v63, %v637_v41  ;;  %v5086_v35 = vld [vmem:[#allocation5 + $0x6a8] sm:$0xff] }
 0x137   : > { %7764 = vst [vmem:[#allocation31_spill] sm:$0xff] %v5032_v10  ;;  %v1082_v14 = vadd.f32 1e-06, %v935_v34  ;;  %v5040_v51 = vmul.f32 0.00390625, %v404_v9  ;;  %v5052_v10 = vld [vmem:[#allocation5 + $0x488] sm:$0xff]  ;;  %v5058_v34 = vld [vmem:[#allocation5 + $0x698] sm:$0xff]  ;;  %v5090_v3 = vadd.f32 %v640_v54, %v639_v62 }
 0x138   : > { %7768 = vst [vmem:[#allocation35_spill] sm:$0xff] %v5052_v10  ;;  %7771 = vst [vmem:[#allocation38_spill] sm:$0xff] %v5058_v34  ;;  %4124 = vrsqrt.f32 %v1083_v44  ;;  %756 = vadd.xlane.f32.xlu1 %v4914_v1  ;;  %v5067_v9 = vld [vmem:[#allocation5 + $0x480] sm:$0xff]  ;;  %v5112_v41 = vld [vmem:[#allocation5 + $0x4d8] sm:$0xff] }
 0x139   : > { %7773 = vst [vmem:[#allocation40_spill] sm:$0xff] %v5063_v8  ;;  %7774 = vst [vmem:[#allocation41_spill] sm:$0xff] %v5067_v9  ;;  %4126 = vrsqrt.f32 %v1082_v14  ;;  %v888_v44 = vmul.f32 %v5040_v51, %v5040_v51  ;;  %511 = vadd.xlane.f32.xlu0 %v4912_v0  ;;  %v652_v1 = vpop.xlane.xlu1 %651  ;;  %v5088_v8 = vld [vmem:[#allocation5 + $0x6b8] sm:$0xff]  ;;  %v5098_v16 = vld [vmem:[#allocation5 + $0x4a0] sm:$0xff] }
 0x13a   : > { %7778 = vst [vmem:[#allocation45_spill] sm:$0xff] %v5078_v15  ;;  %v407_v14 = vpop.xlane.xlu0 %406  ;;  %7779 = vst [vmem:[#allocation46_spill] sm:$0xff] %v5090_v3  ;;  %v5100_v15 = vld [vmem:[#allocation5 + $0x4b0] sm:$0xff]  ;;  %v840_v54 = vmul.f32 0.00390625, %v652_v1  ;;  %v5110_v3 = vld [vmem:[#allocation5 + $0x4c8] sm:$0xff] }
 0x13b   : > { %v937_v31 = vsub.f32 %v839_v52, %v888_v44  ;;  %v5104_v17 = vmul.f32 0.00390625, %v407_v14  ;;  %v5108_v0 = vld [vmem:[#allocation5 + $0x6b0] sm:$0xff]  ;;  %7782 = vst [vmem:[#allocation49_spill] sm:$0xff] %v5110_v3  ;;  %7783 = vst [vmem:[#allocation50_spill] sm:$0xff] %v5112_v41  ;;  %v5123_v14 = vld [vmem:[#allocation5 + $0x6c8] sm:$0xff] }
 0x13c   : > { %7781 = vst [vmem:[#allocation48_spill] sm:$0xff] %v5108_v0  ;;  %759 = vadd.xlane.f32.xlu1 %v4918_v5  ;;  %7784 = vst [vmem:[#allocation51_spill] sm:$0xff] %v5123_v14  ;;  %v5125_v62 = vld [vmem:[#allocation5 + $0x6d8] sm:$0xff]  ;;  %v5136_v1 = vld [vmem:[#allocation5 + $0x4d0] sm:$0xff] }
 0x13d   : > { %7785 = vst [vmem:[#allocation52_spill] sm:$0xff] %v5125_v62  ;;  %v1084_v38 = vadd.f32 1e-06, %v937_v31  ;;  %v889_v5 = vmul.f32 %v5104_v17, %v5104_v17  ;;  %514 = vadd.xlane.f32.xlu0 %v4916_v4  ;;  %v655_v63 = vpop.xlane.xlu1 %654  ;;  %7787 = vst [vmem:[#allocation54_spill] sm:$0xff] %v5136_v1  ;;  %v5140_v34 = vld [vmem:[#allocation5 + $0x6d0] sm:$0xff]  ;;  %v5174_v4 = vld [vmem:[#allocation5 + $0x6f8] sm:$0xff] }
 0x13e   : > { %7789 = vst [vmem:[#allocation56_spill] sm:$0xff] %v5140_v34  ;;  %v410_v10 = vpop.xlane.xlu0 %409  ;;  %v841_v46 = vmul.f32 0.00390625, %v655_v63  ;;  %v5176_v31 = vld [vmem:[#allocation5 + $0x4e0] sm:$0xff]  ;;  %v4225_v1 = vld [vmem:[%s4800_s13 + $0x8] sm:$0xff]  ;;  %v5188_v44 = vld [vmem:[#allocation5 + $0x6f0] sm:$0xff] }
 0x13f   : > { %4128 = vrsqrt.f32 %v1084_v38  ;;  %v938_v9 = vsub.f32 %v840_v54, %v889_v5  ;;  %v5154_v2 = vmul.f32 0.00390625, %v410_v10  ;;  %v5165_v54 = vld [vmem:[#allocation5 + $0x6e8] sm:$0xff]  ;;  %v5178_v38 = vld [vmem:[#allocation5 + $0x4f0] sm:$0xff]  ;;  %v5186_v3 = vld [vmem:[#allocation5 + $0x6e0] sm:$0xff] }
 0x140   : > { %762 = vadd.xlane.f32.xlu1 %v4922_v7  ;;  %v4222_v10 = vld [vmem:[%s4800_s13 + $0x18] sm:$0xff]  ;;  %v4223_v34 = vld [vmem:[%s4800_s13 + $0x10] sm:$0xff] }
 0x141   : > { %v987_v7 = vsub.f32 %v4222_v10, %v4949_v25  ;;  %v1085_v63 = vadd.f32 1e-06, %v938_v9  ;;  %v890_v5 = vmul.f32 %v5154_v2, %v5154_v2  ;;  %517 = vadd.xlane.f32.xlu0 %v4920_v6  ;;  %v658_v52 = vpop.xlane.xlu1 %657  ;;  %v986_v10 = vsub.f32 %v4223_v34, %v4949_v25  ;;  %v4224_v9 = vld [vmem:[%s4800_s13] sm:$0xff]  ;;  %v5192_v0 = vld [vmem:[#allocation5 + $0x508] sm:$0xff]  ;;  %v5194_v25 = vld [vmem:[#allocation5 + $0x518] sm:$0xff] }
 0x142   : > { %v4125_v13 = vpop.eup %4124  ;;  %v984_v36 = vsub.f32 %v4224_v9, %v4957_v33  ;;  %v985_v6 = vsub.f32 %v4225_v1, %v4957_v33  ;;  %v413_v14 = vpop.xlane.xlu0 %412  ;;  %v842_v62 = vmul.f32 0.00390625, %v658_v52  ;;  %7792 = vst [vmem:[#allocation59_spill] sm:$0xff] %v5192_v0  ;;  %v5213_v1 = vld [vmem:[#allocation5 + $0x718] sm:$0xff] }
 0x143   : > { %v4127_v50 = vpop.eup %4126  ;;  %4130 = vrsqrt.f32 %v1085_v63  ;;  %v939_v39 = vsub.f32 %v841_v46, %v890_v5  ;;  %v5190_v41 = vmul.f32 0.00390625, %v413_v14  ;;  %v1183_v61 = vmul.f32 %v4125_v13, %v987_v7 }
 0x144   : > { %765 = vadd.xlane.f32.xlu1 %v4934_v19  ;;  %v1181_v34 = vmul.f32 %v4127_v50, %v985_v6  ;;  %v1180_v33 = vmul.f32 %v4127_v50, %v984_v36  ;;  %v1182_v7 = vmul.f32 %v4125_v13, %v986_v10  ;;  %v5211_v6 = vld [vmem:[#allocation5 + $0x708] sm:$0xff]  ;;  %v4226_v19 = vld [vmem:[%s4800_s13 + $0x20] sm:$0xff] }
 0x145   : > { %v1086_v9 = vadd.f32 1e-06, %v939_v39  ;;  %v891_v46 = vmul.f32 %v5190_v41, %v5190_v41  ;;  %520 = vadd.xlane.f32.xlu0 %v4927_v11  ;;  %v661_v14 = vpop.xlane.xlu1 %660  ;;  %v1293_v5 = vmul.f32 %v4937_v20, %v1183_v61  ;;  %v988_v52 = vsub.f32 %v4226_v19, %v5040_v51 }
 0x146   : > { %v416_v50 = vpop.xlane.xlu0 %415  ;;  %v1291_v36 = vmul.f32 %v4937_v20, %v1181_v34  ;;  %v1290_v63 = vmul.f32 %v4943_v22, %v1180_v33  ;;  %v843_v10 = vmul.f32 0.00390625, %v661_v14  ;;  %v4227_v34 = vld [vmem:[%s4800_s13 + $0x28] sm:$0xff]  ;;  %v1292_v14 = vmul.f32 %v4943_v22, %v1182_v7 }
 0x147   : > { %4132 = vrsqrt.f32 %v1086_v9  ;;  %v940_v11 = vsub.f32 %v842_v62, %v891_v46  ;;  %v5215_v13 = vmul.f32 0.00390625, %v416_v50  ;;  %v989_v33 = vsub.f32 %v4227_v34, %v5040_v51  ;;  %v5245_v34 = vld [vmem:[#allocation5 + $0x510] sm:$0xff] }
 0x148   : > { %v5222_v61 = vadd.f32 %v4940_v21, %v1291_v36  ;;  %768 = vadd.xlane.f32.xlu1 %v4967_v42  ;;  %v5226_v39 = vadd.f32 %v4970_v43, %v1290_v63  ;;  %v5237_v19 = vadd.f32 %v4940_v21, %v1293_v5  ;;  %v4228_v51 = vld [vmem:[%s4800_s13 + $0x30] sm:$0xff]  ;;  %v4229_v5 = vld [vmem:[%s4800_s13 + $0x38] sm:$0xff] }
 0x149   : > { %v4129_v0 = vpop.eup %4128  ;;  %v1087_v9 = vadd.f32 1e-06, %v940_v11  ;;  %v892_v62 = vmul.f32 %v5215_v13, %v5215_v13  ;;  %523 = vadd.xlane.f32.xlu0 %v4929_v12  ;;  %v664_v46 = vpop.xlane.xlu1 %663  ;;  %v5243_v11 = vld [vmem:[#allocation5 + $0x500] sm:$0xff] }
 0x14a   : > { %7793 = vst [vmem:[#allocation60_spill] sm:$0xff] %v5222_v61  ;;  %7794 = vst [vmem:[#allocation61_spill] sm:$0xff] %v5226_v39  ;;  %1860 = vmatprep.mubr.f32.mxu0 %v5222_v61  ;;  %2219 = vmatprep.mubr.f32.mxu1 %v5222_v61  ;;  %v419_v42 = vpop.xlane.xlu0 %418  ;;  %v1185_v50 = vmul.f32 %v4129_v0, %v989_v33  ;;  %v1184_v36 = vmul.f32 %v4129_v0, %v988_v52  ;;  %v844_v7 = vmul.f32 0.00390625, %v664_v46 }
 0x14b   : > { %7795 = vst [vmem:[#allocation62_spill] sm:$0xff] %v5237_v19  ;;  %4134 = vrsqrt.f32 %v1087_v9  ;;  %v941_v12 = vsub.f32 %v843_v10, %v892_v62  ;;  %v5239_v63 = vmul.f32 0.00390625, %v419_v42  ;;  %1861 = vmatmul.mubr.f32.vlgmr.msra.gmra.mrb[0].mxu0 %v5226_v39  ;;  %2220 = vmatmul.mubr.f32.vlgmr.msra.gmra.mrb[0].mxu1 %v5226_v39  ;;  %v990_v61 = vsub.f32 %v4228_v51, %v5104_v17 }
 0x14c   : > { %v991_v33 = vsub.f32 %v4229_v5, %v5104_v17  ;;  %v7796_v0 = vpack.c.bf16 %v4947_v24, %v4945_v23  ;;  %v7797_v52 = vpack.c.bf16 %v4953_v28, %v4951_v27  ;;  %v1295_v10 = vmul.f32 %v4937_v20, %v1185_v50  ;;  %1866 = vmatprep.mubr.f32.mxu0 %v5237_v19  ;;  %v5266_v27 = vld [vmem:[#allocation5 + $0x700] sm:$0xff]  ;;  %v5268_v28 = vld [vmem:[#allocation5 + $0x710] sm:$0xff] }
 0x14d   : > { %v4131_v9 = vpop.eup %4130  ;;  %v1088_v62 = vadd.f32 1e-06, %v941_v12  ;;  %v893_v46 = vmul.f32 %v5239_v63, %v5239_v63  ;;  %2225 = vmatprep.mubr.f32.mxu1 %v5237_v19  ;;  %v5263_v17 = vadd.f32 %v4970_v43, %v1292_v14  ;;  %v667_v23 = vpop.xlane.xlu1 %666  ;;  %v1294_v24 = vmul.f32 %v4943_v22, %v1184_v36  ;;  %526 = vadd.xlane.f32.xlu0 %v4980_v49  ;;  %v7805_v12 = vld [vmem:[#allocation26_spill] sm:$0xff] }
 0x14e   : > { %3905 = vmatpush1.bf16.xpose.msra.mxu0 %v7796_v0  ;;  %3969 = vmatpush1.bf16.xpose.msra.mxu1 %v7797_v52  ;;  %v422_v51 = vpop.xlane.xlu0 %421  ;;  %v845_v42 = vmul.f32 0.00390625, %v667_v23  ;;  %v5273_v50 = vadd.f32 %v4940_v21, %v1295_v10  ;;  %v1187_v14 = vmul.f32 %v4131_v9, %v991_v33  ;;  %v1186_v49 = vmul.f32 %v4131_v9, %v990_v61  ;;  %v4230_v0 = vld [vmem:[%s4800_s13 + $0x48] sm:$0xff]  ;;  %v4231_v10 = vld [vmem:[%s4800_s13 + $0x40] sm:$0xff] }
 0x14f   : > { %7798 = vst [vmem:[#allocation63_spill] sm:$0xff] %v5263_v17  ;;  %771 = vadd.xlane.f32.xlu1 %v4990_v56  ;;  %4136 = vrsqrt.f32 %v1088_v62  ;;  %v942_v36 = vsub.f32 %v844_v7, %v893_v46  ;;  %v5277_v5 = vmul.f32 0.00390625, %v422_v51  ;;  %1867 = vmatmul.mubr.f32.gmra.mrb[2].mxu0 %v5263_v17  ;;  %v993_v56 = vsub.f32 %v4230_v0, %v5154_v2  ;;  %v5301_v52 = vld [vmem:[#allocation5 + $0x528] sm:$0xff] }
 0x150   : > { %7799 = vst [vmem:[#allocation64_spill] sm:$0xff] %v5273_v50  ;;  %2226 = vmatmul.mubr.f32.gmra.mrb[2].mxu1 %v5263_v17  ;;  %1872 = vmatprep.mubr.f32.mxu0 %v5273_v50  ;;  %v1297_v33 = vmul.f32 %v4937_v20, %v1187_v14  ;;  %v992_v62 = vsub.f32 %v4231_v10, %v5154_v2  ;;  %v7802_v14 = vld [vmem:[#allocation19_spill] sm:$0xff]  ;;  %v5303_v2 = vld [vmem:[#allocation5 + $0x538] sm:$0xff] }
 0x151   : > { %2231 = vmatprep.mubr.f32.mxu1 %v5273_v50  ;;  %v4133_v7 = vpop.eup %4132  ;;  %v1089_v46 = vadd.f32 1e-06, %v942_v36  ;;  %v894_v61 = vmul.f32 %v5277_v5, %v5277_v5  ;;  %v5293_v9 = vadd.f32 %v4970_v43, %v1294_v24  ;;  %v670_v23 = vpop.xlane.xlu1 %669  ;;  %v7801_v51 = vpack.c.bf16 %v4959_v37, %v4955_v32  ;;  %v7804_v36 = vld [vmem:[#allocation22_spill] sm:$0xff]  ;;  %v7815_v17 = vld [vmem:[#allocation27_spill] sm:$0xff] }
 0x152   : > { %v7803_v0 = vpack.c.bf16 %v4963_v40, %v7802_v14  ;;  %529 = vadd.xlane.f32.xlu0 %v7804_v36  ;;  %v425_v10 = vpop.xlane.xlu0 %424  ;;  %v846_v24 = vmul.f32 0.00390625, %v670_v23  ;;  %v5308_v50 = vadd.f32 %v4940_v21, %v1297_v33  ;;  %v1296_v32 = vmul.f32 %v4943_v22, %v1186_v49  ;;  %v7808_v36 = vld [vmem:[#allocation21_spill] sm:$0xff]  ;;  %v5335_v49 = vld [vmem:[#allocation5 + $0x728] sm:$0xff] }
 0x153   : > { %7800 = vst [vmem:[#allocation65_spill] sm:$0xff] %v5293_v9  ;;  %3907 = vmatprep.subr.bf16.mxu0 %v7801_v51  ;;  %774 = vadd.xlane.f32.xlu1 %v7805_v12  ;;  %v1189_v37 = vmul.f32 %v4133_v7, %v993_v56  ;;  %4138 = vrsqrt.f32 %v1089_v46  ;;  %v943_v40 = vsub.f32 %v845_v42, %v894_v61  ;;  %v5311_v51 = vmul.f32 0.00390625, %v425_v10  ;;  %v4233_v56 = vld [vmem:[%s4800_s13 + $0x50] sm:$0xff] }
 0x154   : > { %3971 = vmatprep.subr.bf16.mxu1 %v7803_v0  ;;  %7806 = vst [vmem:[#allocation19_spill] sm:$0xff] %v5308_v50  ;;  %1873 = vmatmul.mubr.f32.gmra.mrb[4].mxu0 %v5293_v9  ;;  %v1188_v14 = vmul.f32 %v4133_v7, %v992_v62  ;;  %v4232_v0 = vld [vmem:[%s4800_s13 + $0x58] sm:$0xff]  ;;  %v994_v46 = vsub.f32 %v4233_v56, %v5190_v41 }
 0x155   : > { %2232 = vmatmul.mubr.f32.gmra.mrb[4].mxu1 %v5293_v9  ;;  %v995_v12 = vsub.f32 %v4232_v0, %v5190_v41  ;;  %1878 = vmatprep.mubr.f32.mxu0 %v5308_v50  ;;  %v1299_v33 = vmul.f32 %v4937_v20, %v1189_v37  ;;  %v4135_v42 = vpop.eup %4134  ;;  %v1090_v61 = vadd.f32 1e-06, %v943_v40  ;;  %v895_v7 = vmul.f32 %v5311_v51, %v5311_v51  ;;  %v673_v23 = vpop.xlane.xlu1 %672  ;;  %v7809_v10 = vld [vmem:[#allocation20_spill] sm:$0xff]  ;;  %v7811_v37 = vld [vmem:[#allocation25_spill] sm:$0xff]  ;;  %v7814_v40 = vld [vmem:[#allocation23_spill] sm:$0xff] }
 0x156   : > { %2237 = vmatprep.mubr.f32.mxu1 %v5308_v50  ;;  %v5327_v62 = vadd.f32 %v4970_v43, %v1296_v32  ;;  %v7810_v0 = vpack.c.bf16 %v7808_v36, %v7809_v10  ;;  %v7812_v50 = vld [vmem:[#allocation24_spill] sm:$0xff]  ;;  %v5337_v41 = vld [vmem:[#allocation5 + $0x738] sm:$0xff]  ;;  %532 = vadd.xlane.f32.xlu0 %v7814_v40  ;;  %v428_v56 = vpop.xlane.xlu0 %427  ;;  %v847_v32 = vmul.f32 0.00390625, %v673_v23  ;;  %v1298_v36 = vmul.f32 %v4943_v22, %v1188_v14  ;;  %v5369_v14 = vld [vmem:[#allocation5 + $0x520] sm:$0xff] }
 0x157   : > { %v7813_v9 = vpack.c.bf16 %v7811_v37, %v7812_v50  ;;  %777 = vadd.xlane.f32.xlu1 %v7815_v17  ;;  %v5342_v19 = vadd.f32 %v4940_v21, %v1299_v33  ;;  %v1191_v10 = vmul.f32 %v4135_v42, %v995_v12  ;;  %4140 = vrsqrt.f32 %v1090_v61  ;;  %v4234_v37 = vld [vmem:[%s4800_s13 + $0x68] sm:$0xff]  ;;  %v4235_v12 = vld [vmem:[%s4800_s13 + $0x60] sm:$0xff] }
 0x158   : > { %7807 = vst [vmem:[#allocation22_spill] sm:$0xff] %v5327_v62  ;;  %3909 = vmatpush1.bf16.xpose.msra.mxu0 %v7810_v0  ;;  %v944_v50 = vsub.f32 %v846_v24, %v895_v7  ;;  %v1190_v0 = vmul.f32 %v4135_v42, %v994_v46  ;;  %v997_v17 = vsub.f32 %v4234_v37, %v5215_v13  ;;  %v7818_v40 = vld [vmem:[#allocation28_spill] sm:$0xff]  ;;  %v7821_v37 = vld [vmem:[#allocation29_spill] sm:$0xff] }
 0x159   : > { %3973 = vmatpush1.bf16.xpose.msra.mxu1 %v7813_v9  ;;  %7816 = vst [vmem:[#allocation26_spill] sm:$0xff] %v5342_v19  ;;  %v5345_v9 = vmul.f32 0.00390625, %v428_v56  ;;  %1879 = vmatmul.mubr.f32.gmra.mrb[6].mxu0 %v5327_v62  ;;  %v1301_v33 = vmul.f32 %v4937_v20, %v1191_v10  ;;  %v4137_v24 = vpop.eup %4136  ;;  %v996_v61 = vsub.f32 %v4235_v12, %v5215_v13  ;;  %v676_v23 = vpop.xlane.xlu1 %675  ;;  %v7820_v10 = vld [vmem:[#allocation30_spill] sm:$0xff]  ;;  %v5371_v13 = vld [vmem:[#allocation5 + $0x530] sm:$0xff] }
 0x15a   : > { %2238 = vmatmul.mubr.f32.gmra.mrb[6].mxu1 %v5327_v62  ;;  %1884 = vmatprep.mubr.f32.mxu0 %v5342_v19  ;;  %v1091_v7 = vadd.f32 1e-06, %v944_v50  ;;  %v5361_v46 = vadd.f32 %v4970_v43, %v1298_v36  ;;  %v7819_v56 = vpack.c.bf16 %v5013_v47, %v7818_v40  ;;  %v7823_v50 = vld [vmem:[#allocation31_spill] sm:$0xff]  ;;  %v431_v12 = vpop.xlane.xlu0 %430  ;;  %v848_v36 = vmul.f32 0.00390625, %v676_v23 }
 0x15b   : > { %2243 = vmatprep.mubr.f32.mxu1 %v5342_v19  ;;  %v896_v42 = vmul.f32 %v5345_v9, %v5345_v9  ;;  %v7822_v19 = vpack.c.bf16 %v7820_v10, %v7821_v37  ;;  %535 = vadd.xlane.f32.xlu0 %v7823_v50  ;;  %v7824_v62 = vld [vmem:[#allocation39_spill] sm:$0xff]  ;;  %v5376_v39 = vadd.f32 %v4940_v21, %v1301_v33 }
 0x15c   : > { %7817 = vst [vmem:[#allocation21_spill] sm:$0xff] %v5361_v46  ;;  %3911 = vmatprep.subr.bf16.mxu0 %v7819_v56  ;;  %780 = vadd.xlane.f32.xlu1 %v7824_v62  ;;  %v1300_v47 = vmul.f32 %v4943_v22, %v1190_v0  ;;  %v1193_v40 = vmul.f32 %v4137_v24, %v997_v17  ;;  %4142 = vrsqrt.f32 %v1091_v7  ;;  %v5379_v56 = vmul.f32 0.00390625, %v431_v12  ;;  %v4236_v37 = vld [vmem:[%s4800_s13 + $0x78] sm:$0xff]  ;;  %v4237_v17 = vld [vmem:[%s4800_s13 + $0x70] sm:$0xff] }
 0x15d   : > { %3975 = vmatprep.subr.bf16.mxu1 %v7822_v19  ;;  %7825 = vst [vmem:[#allocation20_spill] sm:$0xff] %v5376_v39  ;;  %v945_v19 = vsub.f32 %v847_v32, %v896_v42  ;;  %1885 = vmatmul.mubr.f32.gmra.mrb[8].mxu0 %v5361_v46  ;;  %v1192_v10 = vmul.f32 %v4137_v24, %v996_v61  ;;  %v4139_v32 = vpop.eup %4138  ;;  %v679_v23 = vpop.xlane.xlu1 %678 }
 0x15e   : > { %2244 = vmatmul.mubr.f32.gmra.mrb[8].mxu1 %v5361_v46  ;;  %v999_v62 = vsub.f32 %v4236_v37, %v5239_v63  ;;  %1890 = vmatprep.mubr.f32.mxu0 %v5376_v39  ;;  %v1303_v33 = vmul.f32 %v4937_v20, %v1193_v40  ;;  %v998_v7 = vsub.f32 %v4237_v17, %v5239_v63  ;;  %v5403_v40 = vld [vmem:[#allocation5 + $0x720] sm:$0xff]  ;;  %v5405_v63 = vld [vmem:[#allocation5 + $0x730] sm:$0xff]  ;;  %v434_v37 = vpop.xlane.xlu0 %433 }
 0x15f   : > { %2249 = vmatprep.mubr.f32.mxu1 %v5376_v39  ;;  %v1092_v42 = vadd.f32 1e-06, %v945_v19  ;;  %v897_v24 = vmul.f32 %v5379_v56, %v5379_v56  ;;  %v5395_v61 = vadd.f32 %v4970_v43, %v1300_v47  ;;  %v7827_v50 = vpack.c.bf16 %v5024_v59, %v5022_v58  ;;  %v7829_v19 = vld [vmem:[#allocation34_spill] sm:$0xff]  ;;  %v7830_v17 = vld [vmem:[#allocation45_spill] sm:$0xff] }
 0x160   : > { %v7828_v12 = vpack.c.bf16 %v5028_v60, %v5026_v26  ;;  %538 = vadd.xlane.f32.xlu0 %v7829_v19  ;;  %783 = vadd.xlane.f32.xlu1 %v7830_v17  ;;  %v849_v47 = vmul.f32 0.00390625, %v679_v23  ;;  %v5410_v0 = vadd.f32 %v4940_v21, %v1303_v33  ;;  %v1302_v58 = vmul.f32 %v4943_v22, %v1192_v10  ;;  %v7834_v17 = vld [vmem:[#allocation33_spill] sm:$0xff]  ;;  %v5437_v10 = vld [vmem:[#allocation5 + $0x548] sm:$0xff] }
 0x161   : > { %7826 = vst [vmem:[#allocation25_spill] sm:$0xff] %v5395_v61  ;;  %3913 = vmatpush1.bf16.xpose.msra.mxu0 %v7827_v50  ;;  %v1195_v59 = vmul.f32 %v4139_v32, %v999_v62  ;;  %4144 = vrsqrt.f32 %v1092_v42  ;;  %v946_v60 = vsub.f32 %v848_v36, %v897_v24  ;;  %v5413_v26 = vmul.f32 0.00390625, %v434_v37  ;;  %v4141_v36 = vpop.eup %4140  ;;  %v4239_v62 = vld [vmem:[%s4800_s13 + $0x80] sm:$0xff]  ;;  %v682_v23 = vpop.xlane.xlu1 %681 }
 0x162   : > { %3977 = vmatpush1.bf16.xpose.msra.mxu1 %v7828_v12  ;;  %7831 = vst [vmem:[#allocation24_spill] sm:$0xff] %v5410_v0  ;;  %1891 = vmatmul.mubr.f32.gmra.mrb[10].mxu0 %v5395_v61  ;;  %v1194_v50 = vmul.f32 %v4139_v32, %v998_v7  ;;  %v4238_v12 = vld [vmem:[%s4800_s13 + $0x88] sm:$0xff]  ;;  %v1000_v42 = vsub.f32 %v4239_v62, %v5277_v5  ;;  %v437_v62 = vpop.xlane.xlu0 %436 }
 0x163   : > { %2250 = vmatmul.mubr.f32.gmra.mrb[10].mxu1 %v5395_v61  ;;  %v1001_v19 = vsub.f32 %v4238_v12, %v5277_v5  ;;  %1896 = vmatprep.mubr.f32.mxu0 %v5410_v0  ;;  %v1305_v33 = vmul.f32 %v4937_v20, %v1195_v59  ;;  %v1093_v24 = vadd.f32 1e-06, %v946_v60  ;;  %v898_v32 = vmul.f32 %v5413_v26, %v5413_v26  ;;  %v7835_v59 = vld [vmem:[#allocation32_spill] sm:$0xff]  ;;  %v5439_v5 = vld [vmem:[#allocation5 + $0x558] sm:$0xff] }
 0x164   : > { %2255 = vmatprep.mubr.f32.mxu1 %v5410_v0  ;;  %v5429_v7 = vadd.f32 %v4970_v43, %v1302_v58  ;;  %v7833_v37 = vpack.c.bf16 %v5034_v55, %v5030_v48  ;;  %v7836_v12 = vpack.c.bf16 %v7834_v17, %v7835_v59  ;;  %v7837_v60 = vld [vmem:[#allocation40_spill] sm:$0xff]  ;;  %v7838_v0 = vld [vmem:[#allocation46_spill] sm:$0xff]  ;;  %v850_v58 = vmul.f32 0.00390625, %v682_v23 }
 0x165   : > { %541 = vadd.xlane.f32.xlu0 %v7837_v60  ;;  %786 = vadd.xlane.f32.xlu1 %v7838_v0  ;;  %v5444_v61 = vadd.f32 %v4940_v21, %v1305_v33  ;;  %v1304_v55 = vmul.f32 %v4943_v22, %v1194_v50  ;;  %v1197_v48 = vmul.f32 %v4141_v36, %v1001_v19  ;;  %4146 = vrsqrt.f32 %v1093_v24  ;;  %v4241_v19 = vld [vmem:[%s4800_s13 + $0x90] sm:$0xff]  ;;  %v685_v23 = vpop.xlane.xlu1 %684 }
 0x166   : > { %7832 = vst [vmem:[#allocation23_spill] sm:$0xff] %v5429_v7  ;;  %3915 = vmatprep.subr.bf16.mxu0 %v7833_v37  ;;  %3979 = vmatprep.subr.bf16.mxu1 %v7836_v12  ;;  %v947_v37 = vsub.f32 %v849_v47, %v898_v32  ;;  %v5447_v17 = vmul.f32 0.00390625, %v437_v62  ;;  %v1196_v59 = vmul.f32 %v4141_v36, %v1000_v42  ;;  %v4240_v12 = vld [vmem:[%s4800_s13 + $0x98] sm:$0xff]  ;;  %v4143_v47 = vpop.eup %4142 }
 0x167   : > { %7839 = vst [vmem:[#allocation27_spill] sm:$0xff] %v5444_v61  ;;  %1897 = vmatmul.mubr.f32.gmra.mrb[12].mxu0 %v5429_v7  ;;  %2256 = vmatmul.mubr.f32.gmra.mrb[12].mxu1 %v5429_v7  ;;  %v1003_v0 = vsub.f32 %v4240_v12, %v5311_v51  ;;  %v1307_v33 = vmul.f32 %v4937_v20, %v1197_v48  ;;  %v5471_v48 = vld [vmem:[#allocation5 + $0x748] sm:$0xff]  ;;  %v851_v12 = vmul.f32 0.00390625, %v685_v23 }
 0x168   : > { %1902 = vmatprep.mubr.f32.mxu0 %v5444_v61  ;;  %2261 = vmatprep.mubr.f32.mxu1 %v5444_v61  ;;  %v1002_v24 = vsub.f32 %v4241_v19, %v5311_v51  ;;  %v1094_v32 = vadd.f32 1e-06, %v947_v37  ;;  %v899_v36 = vmul.f32 %v5447_v17, %v5447_v17  ;;  %v5463_v42 = vadd.f32 %v4970_v43, %v1304_v55  ;;  %v5473_v51 = vld [vmem:[#allocation5 + $0x758] sm:$0xff]  ;;  %v440_v37 = vpop.xlane.xlu0 %439  ;;  %v7844_v61 = vld [vmem:[#allocation36_spill] sm:$0xff] }
 0x169   : > { %v7841_v60 = vpack.c.bf16 %v5046_v18, %v5044_v45  ;;  %v7842_v62 = vpack.c.bf16 %v5050_v57, %v5048_v53  ;;  %v5476_v19 = vadd.f32 %v4940_v21, %v1307_v33  ;;  %v1306_v55 = vmul.f32 %v4943_v22, %v1196_v59  ;;  %v7845_v45 = vld [vmem:[#allocation35_spill] sm:$0xff]  ;;  %v7847_v53 = vld [vmem:[#allocation38_spill] sm:$0xff]  ;;  %v7848_v57 = vld [vmem:[#allocation37_spill] sm:$0xff] }
 0x16a   : > { %7840 = vst [vmem:[#allocation28_spill] sm:$0xff] %v5463_v42  ;;  %v1199_v50 = vmul.f32 %v4143_v47, %v1003_v0  ;;  %v7846_v18 = vpack.c.bf16 %v7844_v61, %v7845_v45  ;;  %4148 = vrsqrt.f32 %v1094_v32  ;;  %v5485_v7 = vmul.f32 0.00390625, %v440_v37  ;;  %v4242_v59 = vld [vmem:[%s4800_s13 + $0xa8] sm:$0xff]  ;;  %v688_v45 = vpop.xlane.xlu1 %687  ;;  %v4244_v32 = vld [vmem:[%s4800_s13 + $0xb8] sm:$0xff] }
 0x16b   : > { %3917 = vmatpush1.bf16.xpose.msra.mxu0 %v7841_v60  ;;  %3981 = vmatpush1.bf16.xpose.msra.mxu1 %v7842_v62  ;;  %7843 = vst [vmem:[#allocation30_spill] sm:$0xff] %v5476_v19  ;;  %v7849_v60 = vpack.c.bf16 %v7847_v53, %v7848_v57  ;;  %v948_v62 = vsub.f32 %v850_v58, %v899_v36  ;;  %v4145_v58 = vpop.eup %4144  ;;  %v4243_v36 = vld [vmem:[%s4800_s13 + $0xa0] sm:$0xff]  ;;  %v852_v57 = vmul.f32 0.00390625, %v688_v45 }
 0x16c   : > { %3919 = vmatprep.subr.bf16.mxu0 %v7846_v18  ;;  %1903 = vmatmul.mubr.f32.gmra.mrb[14].mxu0 %v5463_v42  ;;  %v1198_v33 = vmul.f32 %v4143_v47, %v1002_v24  ;;  %v1005_v0 = vsub.f32 %v4242_v59, %v5345_v9  ;;  %v1309_v61 = vmul.f32 %v4937_v20, %v1199_v50  ;;  %v5503_v18 = vld [vmem:[#allocation5 + $0x540] sm:$0xff]  ;;  %v5505_v53 = vld [vmem:[#allocation5 + $0x550] sm:$0xff]  ;;  %v443_v50 = vpop.xlane.xlu0 %442 }
 0x16d   : > { %3983 = vmatprep.subr.bf16.mxu1 %v7849_v60  ;;  %2262 = vmatmul.mubr.f32.gmra.mrb[14].mxu1 %v5463_v42  ;;  %v1004_v23 = vsub.f32 %v4243_v36, %v5345_v9  ;;  %v1095_v37 = vadd.f32 1e-06, %v948_v62  ;;  %v900_v47 = vmul.f32 %v5485_v7, %v5485_v7  ;;  %v5501_v24 = vadd.f32 %v4970_v43, %v1306_v55  ;;  %v7853_v45 = vld [vmem:[#allocation42_spill] sm:$0xff] }
 0x16e   : > { %1908 = vmatprep.mubr.f32.mxu0 %v5476_v19  ;;  %2267 = vmatprep.mubr.f32.mxu1 %v5476_v19  ;;  %v5508_v60 = vadd.f32 %v4940_v21, %v1309_v61  ;;  %v1308_v9 = vmul.f32 %v4943_v22, %v1198_v33  ;;  %v1201_v62 = vmul.f32 %v4145_v58, %v1005_v0  ;;  %v5511_v36 = vmul.f32 0.00390625, %v443_v50  ;;  %v4245_v0 = vld [vmem:[%s4800_s13 + $0xb0] sm:$0xff] }
 0x16f   : > { %7850 = vst [vmem:[#allocation29_spill] sm:$0xff] %v5501_v24  ;;  %4150 = vrsqrt.f32 %v1095_v37  ;;  %v949_v59 = vsub.f32 %v851_v12, %v900_v47  ;;  %v1200_v55 = vmul.f32 %v4145_v58, %v1004_v23  ;;  %v1007_v19 = vsub.f32 %v4244_v32, %v5379_v56  ;;  %v4147_v12 = vpop.eup %4146  ;;  %v691_v32 = vpop.xlane.xlu1 %690  ;;  %v7854_v50 = vld [vmem:[#allocation41_spill] sm:$0xff]  ;;  %v5535_v33 = vld [vmem:[#allocation5 + $0x740] sm:$0xff] }
 0x170   : > { %7851 = vst [vmem:[#allocation31_spill] sm:$0xff] %v5508_v60  ;;  %1909 = vmatmul.mubr.f32.gmra.mrb[16].mxu0 %v5501_v24  ;;  %v1311_v61 = vmul.f32 %v4937_v20, %v1201_v62  ;;  %v1006_v37 = vsub.f32 %v4245_v0, %v5379_v56  ;;  %v901_v58 = vmul.f32 %v5511_v36, %v5511_v36  ;;  %v7856_v62 = vld [vmem:[#allocation44_spill] sm:$0xff]  ;;  %v853_v0 = vmul.f32 0.00390625, %v691_v32 }
 0x171   : > { %2268 = vmatmul.mubr.f32.gmra.mrb[16].mxu1 %v5501_v24  ;;  %1914 = vmatprep.mubr.f32.mxu0 %v5508_v60  ;;  %v1096_v47 = vadd.f32 1e-06, %v949_v59  ;;  %v5527_v23 = vadd.f32 %v4970_v43, %v1308_v9  ;;  %v7857_v24 = vld [vmem:[#allocation43_spill] sm:$0xff]  ;;  %v5537_v56 = vld [vmem:[#allocation5 + $0x750] sm:$0xff]  ;;  %v446_v59 = vpop.xlane.xlu0 %445  ;;  %v1310_v9 = vmul.f32 %v4943_v22, %v1200_v55  ;;  %v1203_v46 = vmul.f32 %v4147_v12, %v1007_v19 }
 0x172   : > { %2273 = vmatprep.mubr.f32.mxu1 %v5508_v60  ;;  %v7855_v60 = vpack.c.bf16 %v7853_v45, %v7854_v50  ;;  %v7858_v42 = vpack.c.bf16 %v7856_v62, %v7857_v24  ;;  %v5540_v39 = vadd.f32 %v4940_v21, %v1311_v61  ;;  %v950_v24 = vsub.f32 %v852_v57, %v901_v58  ;;  %v4246_v55 = vld [vmem:[%s4800_s13 + $0xc8] sm:$0xff] }
 0x173   : > { %7852 = vst [vmem:[#allocation39_spill] sm:$0xff] %v5527_v23  ;;  %4152 = vrsqrt.f32 %v1096_v47  ;;  %v5549_v45 = vmul.f32 0.00390625, %v446_v59  ;;  %v1202_v61 = vmul.f32 %v4147_v12, %v1006_v37  ;;  %v1009_v19 = vsub.f32 %v4246_v55, %v5413_v26  ;;  %v694_v58 = vpop.xlane.xlu1 %693  ;;  %v5567_v32 = vld [vmem:[#allocation5 + $0x568] sm:$0xff]  ;;  %v5569_v50 = vld [vmem:[#allocation5 + $0x578] sm:$0xff] }
 0x174   : > { %3921 = vmatpush1.bf16.xpose.msra.mxu0 %v7855_v60  ;;  %3985 = vmatpush1.bf16.xpose.msra.mxu1 %v7858_v42  ;;  %7859 = vst [vmem:[#allocation34_spill] sm:$0xff] %v5540_v39  ;;  %v7860_v60 = vpack.c.bf16 %v5084_v30, %v5082_v29  ;;  %v7861_v42 = vpack.c.bf16 %v5088_v8, %v5086_v35  ;;  %v4149_v35 = vpop.eup %4148  ;;  %v4247_v30 = vld [vmem:[%s4800_s13 + $0xc0] sm:$0xff]  ;;  %v1097_v47 = vadd.f32 1e-06, %v950_v24  ;;  %v854_v62 = vmul.f32 0.00390625, %v694_v58  ;;  %v4248_v55 = vld [vmem:[%s4800_s13 + $0xd8] sm:$0xff] }
 0x175   : > { %1915 = vmatmul.mubr.f32.gmra.mrb[18].mxu0 %v5527_v23  ;;  %2274 = vmatmul.mubr.f32.gmra.mrb[18].mxu1 %v5527_v23  ;;  %v1313_v29 = vmul.f32 %v4937_v20, %v1203_v46  ;;  %v1008_v57 = vsub.f32 %v4247_v30, %v5413_v26  ;;  %v902_v12 = vmul.f32 %v5549_v45, %v5549_v45  ;;  %v449_v46 = vpop.xlane.xlu0 %448 }
 0x176   : > { %3923 = vmatprep.subr.bf16.mxu0 %v7860_v60  ;;  %3987 = vmatprep.subr.bf16.mxu1 %v7861_v42  ;;  %v5565_v37 = vadd.f32 %v4970_v43, %v1310_v9  ;;  %v1312_v26 = vmul.f32 %v4943_v22, %v1202_v61  ;;  %v1205_v60 = vmul.f32 %v4149_v35, %v1009_v19  ;;  %4154 = vrsqrt.f32 %v1097_v47  ;;  %v4249_v19 = vld [vmem:[%s4800_s13 + $0xd0] sm:$0xff]  ;;  %v5599_v61 = vld [vmem:[#allocation5 + $0x768] sm:$0xff] }
 0x177   : > { %1920 = vmatprep.mubr.f32.mxu0 %v5540_v39  ;;  %2279 = vmatprep.mubr.f32.mxu1 %v5540_v39  ;;  %v5572_v59 = vadd.f32 %v4940_v21, %v1313_v29  ;;  %v951_v42 = vsub.f32 %v853_v0, %v902_v12  ;;  %v5575_v24 = vmul.f32 0.00390625, %v449_v46  ;;  %v1204_v9 = vmul.f32 %v4149_v35, %v1008_v57  ;;  %v697_v58 = vpop.xlane.xlu1 %696  ;;  %v7871_v39 = vld [vmem:[#allocation50_spill] sm:$0xff] }
 0x178   : > { %7862 = vst [vmem:[#allocation45_spill] sm:$0xff] %v5565_v37  ;;  %v1011_v30 = vsub.f32 %v4248_v55, %v5447_v17  ;;  %v1315_v29 = vmul.f32 %v4937_v20, %v1205_v60  ;;  %v1010_v47 = vsub.f32 %v4249_v19, %v5447_v17  ;;  %v5591_v57 = vadd.f32 %v4970_v43, %v1312_v26  ;;  %v7866_v60 = vld [vmem:[#allocation48_spill] sm:$0xff]  ;;  %v7867_v55 = vld [vmem:[#allocation47_spill] sm:$0xff]  ;;  %v5601_v17 = vld [vmem:[#allocation5 + $0x778] sm:$0xff] }
 0x179   : > { %7863 = vst [vmem:[#allocation33_spill] sm:$0xff] %v5572_v59  ;;  %1921 = vmatmul.mubr.f32.gmra.mrb[20].mxu0 %v5565_v37  ;;  %2280 = vmatmul.mubr.f32.gmra.mrb[20].mxu1 %v5565_v37  ;;  %v4151_v0 = vpop.eup %4150  ;;  %v1098_v12 = vadd.f32 1e-06, %v951_v42  ;;  %v903_v35 = vmul.f32 %v5575_v24, %v5575_v24  ;;  %v7865_v46 = vpack.c.bf16 %v5100_v15, %v5098_v16  ;;  %7869 = vst [vmem:[#allocation40_spill] sm:$0xff] %v5599_v61  ;;  %v452_v42 = vpop.xlane.xlu0 %451  ;;  %v7872_v15 = vld [vmem:[#allocation49_spill] sm:$0xff]  ;;  %v7887_v61 = vld [vmem:[#allocation58_spill] sm:$0xff] }
 0x17a   : > { %1926 = vmatprep.mubr.f32.mxu0 %v5572_v59  ;;  %2285 = vmatprep.mubr.f32.mxu1 %v5572_v59  ;;  %7864 = vst [vmem:[#allocation32_spill] sm:$0xff] %v5591_v57  ;;  %v7868_v8 = vpack.c.bf16 %v7866_v60, %v7867_v55  ;;  %v855_v19 = vmul.f32 0.00390625, %v697_v58  ;;  %v5604_v59 = vadd.f32 %v4940_v21, %v1315_v29  ;;  %v5613_v23 = vmul.f32 0.00390625, %v452_v42 }
 0x17b   : > { %v1314_v26 = vmul.f32 %v4943_v22, %v1204_v9  ;;  %v1207_v37 = vmul.f32 %v4151_v0, %v1011_v30  ;;  %v7873_v16 = vpack.c.bf16 %v7871_v39, %v7872_v15  ;;  %4156 = vrsqrt.f32 %v1098_v12  ;;  %v4250_v9 = vld [vmem:[%s4800_s13 + $0xe8] sm:$0xff]  ;;  %v700_v15 = vpop.xlane.xlu1 %699  ;;  %v4252_v12 = vld [vmem:[%s4800_s13 + $0xf8] sm:$0xff] }
 0x17c   : > { %3925 = vmatpush1.bf16.xpose.msra.mxu0 %v7865_v46  ;;  %3989 = vmatpush1.bf16.xpose.msra.mxu1 %v7868_v8  ;;  %7870 = vst [vmem:[#allocation46_spill] sm:$0xff] %v5604_v59  ;;  %v7874_v46 = vld [vmem:[#allocation52_spill] sm:$0xff]  ;;  %v7875_v8 = vld [vmem:[#allocation51_spill] sm:$0xff]  ;;  %v952_v55 = vsub.f32 %v854_v62, %v903_v35  ;;  %v1206_v29 = vmul.f32 %v4151_v0, %v1010_v47 }
 0x17d   : > { %3927 = vmatprep.subr.bf16.mxu0 %v7873_v16  ;;  %v7876_v60 = vpack.c.bf16 %v7874_v46, %v7875_v8  ;;  %1927 = vmatmul.mubr.f32.gmra.mrb[22].mxu0 %v5591_v57  ;;  %v1013_v30 = vsub.f32 %v4250_v9, %v5485_v7  ;;  %v1317_v39 = vmul.f32 %v4937_v20, %v1207_v37  ;;  %v4153_v62 = vpop.eup %4152  ;;  %v4251_v35 = vld [vmem:[%s4800_s13 + $0xe0] sm:$0xff]  ;;  %v455_v37 = vpop.xlane.xlu0 %454  ;;  %v856_v8 = vmul.f32 0.00390625, %v700_v15 }
 0x17e   : > { %2286 = vmatmul.mubr.f32.gmra.mrb[22].mxu1 %v5591_v57  ;;  %1932 = vmatprep.mubr.f32.mxu0 %v5604_v59  ;;  %v1012_v58 = vsub.f32 %v4251_v35, %v5485_v7  ;;  %v1099_v42 = vadd.f32 1e-06, %v952_v55  ;;  %v904_v0 = vmul.f32 %v5613_v23, %v5613_v23  ;;  %v5629_v47 = vadd.f32 %v4970_v43, %v1314_v26  ;;  %v5631_v16 = vld [vmem:[#allocation5 + $0x560] sm:$0xff]  ;;  %v5633_v46 = vld [vmem:[#allocation5 + $0x570] sm:$0xff] }
 0x17f   : > { %3991 = vmatprep.subr.bf16.mxu1 %v7876_v60  ;;  %2291 = vmatprep.mubr.f32.mxu1 %v5604_v59  ;;  %7878 = vst [vmem:[#allocation35_spill] sm:$0xff] %v5631_v16  ;;  %7879 = vst [vmem:[#allocation38_spill] sm:$0xff] %v5633_v46  ;;  %v5636_v60 = vadd.f32 %v4940_v21, %v1317_v39  ;;  %v1316_v7 = vmul.f32 %v4943_v22, %v1206_v29  ;;  %v5639_v35 = vmul.f32 0.00390625, %v455_v37  ;;  %v7881_v15 = vld [vmem:[#allocation54_spill] sm:$0xff]  ;;  %v7882_v37 = vld [vmem:[#allocation53_spill] sm:$0xff] }
 0x180   : > { %7877 = vst [vmem:[#allocation36_spill] sm:$0xff] %v5629_v47  ;;  %v1209_v55 = vmul.f32 %v4153_v62, %v1013_v30  ;;  %4158 = vrsqrt.f32 %v1099_v42  ;;  %v953_v9 = vsub.f32 %v855_v19, %v904_v0  ;;  %v1208_v26 = vmul.f32 %v4153_v62, %v1012_v58  ;;  %v4155_v19 = vpop.eup %4154  ;;  %v4253_v30 = vld [vmem:[%s4800_s13 + $0xf0] sm:$0xff] }
 0x181   : > { %7880 = vst [vmem:[#allocation37_spill] sm:$0xff] %v5636_v60  ;;  %1933 = vmatmul.mubr.f32.gmra.mrb[24].mxu0 %v5629_v47  ;;  %v1015_v59 = vsub.f32 %v4252_v12, %v5511_v36  ;;  %v1014_v42 = vsub.f32 %v4253_v30, %v5511_v36  ;;  %v905_v62 = vmul.f32 %v5639_v35, %v5639_v35  ;;  %v703_v12 = vpop.xlane.xlu1 %702  ;;  %v5663_v29 = vld [vmem:[#allocation5 + $0x760] sm:$0xff]  ;;  %v5665_v36 = vld [vmem:[#allocation5 + $0x770] sm:$0xff] }
 0x182   : > { %2292 = vmatmul.mubr.f32.gmra.mrb[24].mxu1 %v5629_v47  ;;  %1938 = vmatprep.mubr.f32.mxu0 %v5636_v60  ;;  %v1319_v39 = vmul.f32 %v4937_v20, %v1209_v55  ;;  %v1100_v0 = vadd.f32 1e-06, %v953_v9  ;;  %v5655_v58 = vadd.f32 %v4970_v43, %v1316_v7  ;;  %v7884_v55 = vld [vmem:[#allocation56_spill] sm:$0xff]  ;;  %v7885_v47 = vld [vmem:[#allocation55_spill] sm:$0xff]  ;;  %v458_v9 = vpop.xlane.xlu0 %457  ;;  %v857_v30 = vmul.f32 0.00390625, %v703_v12 }
 0x183   : > { %2297 = vmatprep.mubr.f32.mxu1 %v5636_v60  ;;  %v7883_v60 = vpack.c.bf16 %v7881_v15, %v7882_v37  ;;  %v7886_v57 = vpack.c.bf16 %v7884_v55, %v7885_v47  ;;  %v1318_v7 = vmul.f32 %v4943_v22, %v1208_v26  ;;  %v1211_v46 = vmul.f32 %v4155_v19, %v1015_v59  ;;  %v7888_v15 = vld [vmem:[#allocation57_spill] sm:$0xff]  ;;  %v5695_v55 = vld [vmem:[#allocation5 + $0x588] sm:$0xff] }
 0x184   : > { %v5668_v16 = vadd.f32 %v4940_v21, %v1319_v39  ;;  %4160 = vrsqrt.f32 %v1100_v0  ;;  %v954_v47 = vsub.f32 %v856_v8, %v905_v62  ;;  %v5677_v37 = vmul.f32 0.00390625, %v458_v9  ;;  %v4254_v26 = vld [vmem:[%s4800_s13 + $0x108] sm:$0xff]  ;;  %v4255_v8 = vld [vmem:[%s4800_s13 + $0x100] sm:$0xff] }
 0x185   : > { %3929 = vmatpush1.bf16.xpose.msra.mxu0 %v7883_v60  ;;  %3993 = vmatpush1.bf16.xpose.msra.mxu1 %v7886_v57  ;;  %v7889_v60 = vpack.c.bf16 %v7887_v61, %v7888_v15  ;;  %v7890_v57 = vpack.c.bf16 %v5174_v4, %v5165_v54  ;;  %v1210_v39 = vmul.f32 %v4155_v19, %v1014_v42  ;;  %v4157_v54 = vpop.eup %4156  ;;  %v706_v12 = vpop.xlane.xlu1 %705  ;;  %v5697_v9 = vld [vmem:[#allocation5 + $0x598] sm:$0xff] }
 0x186   : > { %1939 = vmatmul.mubr.f32.gmra.mrb[26].mxu0 %v5655_v58  ;;  %2298 = vmatmul.mubr.f32.gmra.mrb[26].mxu1 %v5655_v58  ;;  %v1017_v59 = vsub.f32 %v4254_v26, %v5549_v45  ;;  %v1321_v61 = vmul.f32 %v4937_v20, %v1211_v46  ;;  %v1016_v0 = vsub.f32 %v4255_v8, %v5549_v45  ;;  %v1101_v62 = vadd.f32 1e-06, %v954_v47  ;;  %v461_v46 = vpop.xlane.xlu0 %460  ;;  %v4256_v8 = vld [vmem:[%s4800_s13 + $0x118] sm:$0xff] }
 0x187   : > { %3931 = vmatprep.subr.bf16.mxu0 %v7889_v60  ;;  %3995 = vmatprep.subr.bf16.mxu1 %v7890_v57  ;;  %v906_v19 = vmul.f32 %v5677_v37, %v5677_v37  ;;  %v5693_v42 = vadd.f32 %v4970_v43, %v1318_v7  ;;  %v858_v15 = vmul.f32 0.00390625, %v706_v12  ;;  %v1320_v45 = vmul.f32 %v4943_v22, %v1210_v39 }
 0x188   : > { %1944 = vmatprep.mubr.f32.mxu0 %v5668_v16  ;;  %2303 = vmatprep.mubr.f32.mxu1 %v5668_v16  ;;  %v5700_v60 = vadd.f32 %v4940_v21, %v1321_v61  ;;  %v1213_v57 = vmul.f32 %v4157_v54, %v1017_v59  ;;  %4162 = vrsqrt.f32 %v1101_v62  ;;  %v5703_v26 = vmul.f32 0.00390625, %v461_v46  ;;  %v4257_v59 = vld [vmem:[%s4800_s13 + $0x110] sm:$0xff] }
 0x189   : > { %v955_v47 = vsub.f32 %v857_v30, %v906_v19  ;;  %v1212_v7 = vmul.f32 %v4157_v54, %v1016_v0  ;;  %v1019_v4 = vsub.f32 %v4256_v8, %v5575_v24  ;;  %v1018_v62 = vsub.f32 %v4257_v59, %v5575_v24  ;;  %v709_v12 = vpop.xlane.xlu1 %708  ;;  %v5727_v8 = vld [vmem:[#allocation5 + $0x788] sm:$0xff]  ;;  %v5729_v24 = vld [vmem:[#allocation5 + $0x798] sm:$0xff] }
 0x18a   : > { %7891 = vst [vmem:[#allocation42_spill] sm:$0xff] %v5700_v60  ;;  %1945 = vmatmul.mubr.f32.gmra.mrb[28].mxu0 %v5693_v42  ;;  %2304 = vmatmul.mubr.f32.gmra.mrb[28].mxu1 %v5693_v42  ;;  %v1323_v61 = vmul.f32 %v4937_v20, %v1213_v57  ;;  %v4159_v30 = vpop.eup %4158  ;;  %v907_v54 = vmul.f32 %v5703_v26, %v5703_v26  ;;  %v859_v59 = vmul.f32 0.00390625, %v709_v12 }
 0x18b   : > { %1950 = vmatprep.mubr.f32.mxu0 %v5700_v60  ;;  %2309 = vmatprep.mubr.f32.mxu1 %v5700_v60  ;;  %v1102_v19 = vadd.f32 1e-06, %v955_v47  ;;  %v5719_v0 = vadd.f32 %v4970_v43, %v1320_v45  ;;  %v7892_v46 = vpack.c.bf16 %v5178_v38, %v5176_v31  ;;  %v7893_v57 = vpack.c.bf16 %v5188_v44, %v5186_v3  ;;  %v464_v47 = vpop.xlane.xlu0 %463  ;;  %v7894_v31 = vld [vmem:[#allocation59_spill] sm:$0xff] }
 0x18c   : > { %v5732_v39 = vadd.f32 %v4940_v21, %v1323_v61  ;;  %v1322_v45 = vmul.f32 %v4943_v22, %v1212_v7  ;;  %v1215_v60 = vmul.f32 %v4159_v30, %v1019_v4  ;;  %v7895_v38 = vpack.c.bf16 %v5194_v25, %v7894_v31  ;;  %v4258_v7 = vld [vmem:[%s4800_s13 + $0x128] sm:$0xff] }
 0x18d   : > { %3933 = vmatpush1.bf16.xpose.msra.mxu0 %v7892_v46  ;;  %3997 = vmatpush1.bf16.xpose.msra.mxu1 %v7893_v57  ;;  %v7896_v3 = vpack.c.bf16 %v5213_v1, %v5211_v6  ;;  %4164 = vrsqrt.f32 %v1102_v19  ;;  %v956_v44 = vsub.f32 %v858_v15, %v907_v54  ;;  %v5741_v46 = vmul.f32 0.00390625, %v464_v47  ;;  %v4259_v15 = vld [vmem:[%s4800_s13 + $0x120] sm:$0xff]  ;;  %v712_v12 = vpop.xlane.xlu1 %711 }
 0x18e   : > { %3935 = vmatprep.subr.bf16.mxu0 %v7895_v38  ;;  %1951 = vmatmul.mubr.f32.gmra.mrb[30].mxu0 %v5719_v0  ;;  %v1214_v61 = vmul.f32 %v4159_v30, %v1018_v62  ;;  %v1021_v4 = vsub.f32 %v4258_v7, %v5613_v23  ;;  %v1325_v25 = vmul.f32 %v4937_v20, %v1215_v60  ;;  %v4161_v6 = vpop.eup %4160  ;;  %v5759_v57 = vld [vmem:[#allocation5 + $0x580] sm:$0xff]  ;;  %v5761_v47 = vld [vmem:[#allocation5 + $0x590] sm:$0xff]  ;;  %v860_v31 = vmul.f32 0.00390625, %v712_v12 }
 0x18f   : > { %3999 = vmatprep.subr.bf16.mxu1 %v7896_v3  ;;  %2310 = vmatmul.mubr.f32.gmra.mrb[30].mxu1 %v5719_v0  ;;  %v1020_v19 = vsub.f32 %v4259_v15, %v5613_v23  ;;  %v1103_v54 = vadd.f32 1e-06, %v956_v44  ;;  %v908_v30 = vmul.f32 %v5741_v46, %v5741_v46  ;;  %v5757_v62 = vadd.f32 %v4970_v43, %v1322_v45  ;;  %v467_v60 = vpop.xlane.xlu0 %466  ;;  %v4260_v15 = vld [vmem:[%s4800_s13 + $0x138] sm:$0xff] }
 0x190   : > { %1956 = vmatprep.mubr.f32.mxu0 %v5732_v39  ;;  %2315 = vmatprep.mubr.f32.mxu1 %v5732_v39  ;;  %v5764_v38 = vadd.f32 %v4940_v21, %v1325_v25  ;;  %v1324_v23 = vmul.f32 %v4943_v22, %v1214_v61  ;;  %v1217_v3 = vmul.f32 %v4161_v6, %v1021_v4  ;;  %v5767_v7 = vmul.f32 0.00390625, %v467_v60  ;;  %v4261_v4 = vld [vmem:[%s4800_s13 + $0x130] sm:$0xff] }
 0x191   : > { %4166 = vrsqrt.f32 %v1103_v54  ;;  %v957_v44 = vsub.f32 %v859_v59, %v908_v30  ;;  %v1216_v45 = vmul.f32 %v4161_v6, %v1020_v19  ;;  %v1023_v1 = vsub.f32 %v4260_v15, %v5639_v35  ;;  %v715_v12 = vpop.xlane.xlu1 %714  ;;  %v5791_v15 = vld [vmem:[#allocation5 + $0x780] sm:$0xff] }
 0x192   : > { %7897 = vst [vmem:[#allocation41_spill] sm:$0xff] %v5764_v38  ;;  %1957 = vmatmul.mubr.f32.gmra.mrb[32].mxu0 %v5757_v62  ;;  %v1327_v25 = vmul.f32 %v4937_v20, %v1217_v3  ;;  %v4163_v59 = vpop.eup %4162  ;;  %v1022_v54 = vsub.f32 %v4261_v4, %v5639_v35  ;;  %v909_v6 = vmul.f32 %v5767_v7, %v5767_v7  ;;  %v5793_v35 = vld [vmem:[#allocation5 + $0x790] sm:$0xff]  ;;  %v861_v4 = vmul.f32 0.00390625, %v715_v12  ;;  %v5823_v12 = vld [vmem:[#allocation5 + $0x5a8] sm:$0xff] }
 0x193   : > { %2316 = vmatmul.mubr.f32.gmra.mrb[32].mxu1 %v5757_v62  ;;  %1962 = vmatprep.mubr.f32.mxu0 %v5764_v38  ;;  %v1104_v30 = vadd.f32 1e-06, %v957_v44  ;;  %v5783_v19 = vadd.f32 %v4970_v43, %v1324_v23  ;;  %v7898_v60 = vpack.c.bf16 %v5245_v34, %v5243_v11  ;;  %v7899_v3 = vpack.c.bf16 %v5268_v28, %v5266_v27  ;;  %v470_v44 = vpop.xlane.xlu0 %469 }
 0x194   : > { %2321 = vmatprep.mubr.f32.mxu1 %v5764_v38  ;;  %v5796_v61 = vadd.f32 %v4940_v21, %v1327_v25  ;;  %v1326_v23 = vmul.f32 %v4943_v22, %v1216_v45  ;;  %v1219_v38 = vmul.f32 %v4163_v59, %v1023_v1  ;;  %v7900_v11 = vpack.c.bf16 %v5303_v2, %v5301_v52  ;;  %v4262_v45 = vld [vmem:[%s4800_s13 + $0x148] sm:$0xff] }
 0x195   : > { %3937 = vmatpush1.bf16.xpose.msra.mxu0 %v7898_v60  ;;  %4001 = vmatpush1.bf16.xpose.msra.mxu1 %v7899_v3  ;;  %v7901_v34 = vpack.c.bf16 %v5337_v41, %v5335_v49  ;;  %4168 = vrsqrt.f32 %v1104_v30  ;;  %v958_v27 = vsub.f32 %v860_v31, %v909_v6  ;;  %v5805_v28 = vmul.f32 0.00390625, %v470_v44  ;;  %v4263_v41 = vld [vmem:[%s4800_s13 + $0x140] sm:$0xff]  ;;  %v718_v6 = vpop.xlane.xlu1 %717  ;;  %v5825_v60 = vld [vmem:[#allocation5 + $0x5b8] sm:$0xff] }
 0x196   : > { %3939 = vmatprep.subr.bf16.mxu0 %v7900_v11  ;;  %1963 = vmatmul.mubr.f32.gmra.mrb[34].mxu0 %v5783_v19  ;;  %v1218_v25 = vmul.f32 %v4163_v59, %v1022_v54  ;;  %v1025_v1 = vsub.f32 %v4262_v45, %v5677_v37  ;;  %v1329_v52 = vmul.f32 %v4937_v20, %v1219_v38  ;;  %v862_v3 = vmul.f32 0.00390625, %v718_v6  ;;  %v4264_v45 = vld [vmem:[%s4800_s13 + $0x158] sm:$0xff] }
 0x197   : > { %4003 = vmatprep.subr.bf16.mxu1 %v7901_v34  ;;  %2322 = vmatmul.mubr.f32.gmra.mrb[34].mxu1 %v5783_v19  ;;  %v4165_v49 = vpop.eup %4164  ;;  %v1024_v31 = vsub.f32 %v4263_v41, %v5677_v37  ;;  %v1105_v30 = vadd.f32 1e-06, %v958_v27  ;;  %v910_v59 = vmul.f32 %v5805_v28, %v5805_v28  ;;  %v5821_v54 = vadd.f32 %v4970_v43, %v1326_v23  ;;  %v473_v38 = vpop.xlane.xlu0 %472 }
 0x198   : > { %1968 = vmatprep.mubr.f32.mxu0 %v5796_v61  ;;  %2327 = vmatprep.mubr.f32.mxu1 %v5796_v61  ;;  %v5828_v44 = vadd.f32 %v4940_v21, %v1329_v52  ;;  %v1328_v37 = vmul.f32 %v4943_v22, %v1218_v25  ;;  %v1221_v11 = vmul.f32 %v4165_v49, %v1025_v1  ;;  %v5831_v27 = vmul.f32 0.00390625, %v473_v38  ;;  %v4265_v1 = vld [vmem:[%s4800_s13 + $0x150] sm:$0xff] }
 0x199   : > { %4170 = vrsqrt.f32 %v1105_v30  ;;  %v959_v34 = vsub.f32 %v861_v4, %v910_v59  ;;  %v1220_v23 = vmul.f32 %v4165_v49, %v1024_v31  ;;  %v1027_v41 = vsub.f32 %v4264_v45, %v5703_v26  ;;  %v721_v6 = vpop.xlane.xlu1 %720  ;;  %v5855_v45 = vld [vmem:[#allocation5 + $0x7a8] sm:$0xff] }
 0x19a   : > { %1969 = vmatmul.mubr.f32.gmra.mrb[36].mxu0 %v5821_v54  ;;  %v1331_v52 = vmul.f32 %v4937_v20, %v1221_v11  ;;  %v1026_v30 = vsub.f32 %v4265_v1, %v5703_v26  ;;  %v911_v49 = vmul.f32 %v5831_v27, %v5831_v27  ;;  %v5847_v31 = vadd.f32 %v4970_v43, %v1328_v37  ;;  %v5857_v26 = vld [vmem:[#allocation5 + $0x7b8] sm:$0xff] }
 0x19b   : > { %2328 = vmatmul.mubr.f32.gmra.mrb[36].mxu1 %v5821_v54  ;;  %1974 = vmatprep.mubr.f32.mxu0 %v5828_v44  ;;  %v4167_v4 = vpop.eup %4166  ;;  %v1106_v59 = vadd.f32 1e-06, %v959_v34  ;;  %v7902_v38 = vpack.c.bf16 %v5371_v13, %v5369_v14  ;;  %v7903_v11 = vpack.c.bf16 %v5405_v63, %v5403_v40  ;;  %v476_v34 = vpop.xlane.xlu0 %475  ;;  %v863_v1 = vmul.f32 0.00390625, %v721_v6  ;;  %v5887_v6 = vld [vmem:[#allocation5 + $0x5a0] sm:$0xff] }
 0x19c   : > { %2333 = vmatprep.mubr.f32.mxu1 %v5828_v44  ;;  %v5860_v25 = vadd.f32 %v4940_v21, %v1331_v52  ;;  %v1330_v37 = vmul.f32 %v4943_v22, %v1220_v23  ;;  %v1223_v2 = vmul.f32 %v4167_v4, %v1027_v41  ;;  %v7904_v14 = vpack.c.bf16 %v5439_v5, %v5437_v10  ;;  %v4266_v23 = vld [vmem:[%s4800_s13 + $0x168] sm:$0xff] }
 0x19d   : > { %3941 = vmatpush1.bf16.xpose.msra.mxu0 %v7902_v38  ;;  %4005 = vmatpush1.bf16.xpose.msra.mxu1 %v7903_v11  ;;  %v7905_v13 = vpack.c.bf16 %v5473_v51, %v5471_v48  ;;  %4172 = vrsqrt.f32 %v1106_v59  ;;  %v960_v40 = vsub.f32 %v862_v3, %v911_v49  ;;  %v5869_v63 = vmul.f32 0.00390625, %v476_v34  ;;  %v4267_v51 = vld [vmem:[%s4800_s13 + $0x160] sm:$0xff]  ;;  %v724_v49 = vpop.xlane.xlu1 %723 }
 0x19e   : > { %3943 = vmatprep.subr.bf16.mxu0 %v7904_v14  ;;  %1975 = vmatmul.mubr.f32.gmra.mrb[38].mxu0 %v5847_v31  ;;  %v1222_v52 = vmul.f32 %v4167_v4, %v1026_v30  ;;  %v1029_v41 = vsub.f32 %v4266_v23, %v5741_v46  ;;  %v1333_v10 = vmul.f32 %v4937_v20, %v1223_v2  ;;  %v5889_v38 = vld [vmem:[#allocation5 + $0x5b0] sm:$0xff]  ;;  %v864_v11 = vmul.f32 0.00390625, %v724_v49  ;;  %v4268_v23 = vld [vmem:[%s4800_s13 + $0x178] sm:$0xff] }
 0x19f   : > { %4007 = vmatprep.subr.bf16.mxu1 %v7905_v13  ;;  %2334 = vmatmul.mubr.f32.gmra.mrb[38].mxu1 %v5847_v31  ;;  %v4169_v48 = vpop.eup %4168  ;;  %v1028_v3 = vsub.f32 %v4267_v51, %v5741_v46  ;;  %v1107_v59 = vadd.f32 1e-06, %v960_v40  ;;  %v912_v4 = vmul.f32 %v5869_v63, %v5869_v63  ;;  %v5885_v30 = vadd.f32 %v4970_v43, %v1330_v37  ;;  %v479_v2 = vpop.xlane.xlu0 %478 }
 0x1a0   : > { %1980 = vmatprep.mubr.f32.mxu0 %v5860_v25  ;;  %2339 = vmatprep.mubr.f32.mxu1 %v5860_v25  ;;  %v5892_v34 = vadd.f32 %v4940_v21, %v1333_v10  ;;  %v1332_v46 = vmul.f32 %v4943_v22, %v1222_v52  ;;  %v1225_v14 = vmul.f32 %v4169_v48, %v1029_v41  ;;  %v5895_v40 = vmul.f32 0.00390625, %v479_v2  ;;  %v4269_v41 = vld [vmem:[%s4800_s13 + $0x170] sm:$0xff] }
 0x1a1   : > { %4174 = vrsqrt.f32 %v1107_v59  ;;  %v961_v13 = vsub.f32 %v863_v1, %v912_v4  ;;  %v1224_v37 = vmul.f32 %v4169_v48, %v1028_v3  ;;  %v1031_v51 = vsub.f32 %v4268_v23, %v5767_v7  ;;  %v727_v49 = vpop.xlane.xlu1 %726  ;;  %v5919_v23 = vld [vmem:[#allocation5 + $0x7a0] sm:$0xff] }
 0x1a2   : > { %1981 = vmatmul.mubr.f32.gmra.mrb[40].mxu0 %v5885_v30  ;;  %v1335_v10 = vmul.f32 %v4937_v20, %v1225_v14  ;;  %v1030_v59 = vsub.f32 %v4269_v41, %v5767_v7  ;;  %v913_v48 = vmul.f32 %v5895_v40, %v5895_v40  ;;  %v5911_v3 = vadd.f32 %v4970_v43, %v1332_v46  ;;  %v5921_v7 = vld [vmem:[#allocation5 + $0x7b0] sm:$0xff] }
 0x1a3   : > { %2340 = vmatmul.mubr.f32.gmra.mrb[40].mxu1 %v5885_v30  ;;  %1986 = vmatprep.mubr.f32.mxu0 %v5892_v34  ;;  %v4171_v1 = vpop.eup %4170  ;;  %v1108_v4 = vadd.f32 1e-06, %v961_v13  ;;  %v7906_v2 = vpack.c.bf16 %v5505_v53, %v5503_v18  ;;  %v7907_v14 = vpack.c.bf16 %v5537_v56, %v5535_v33  ;;  %v482_v13 = vpop.xlane.xlu0 %481  ;;  %v865_v41 = vmul.f32 0.00390625, %v727_v49  ;;  %v7910_v53 = vld [vmem:[#allocation40_spill] sm:$0xff] }
 0x1a4   : > { %2345 = vmatprep.mubr.f32.mxu1 %v5892_v34  ;;  %v5924_v52 = vadd.f32 %v4940_v21, %v1335_v10  ;;  %v1334_v46 = vmul.f32 %v4943_v22, %v1224_v37  ;;  %v1227_v5 = vmul.f32 %v4171_v1, %v1031_v51  ;;  %v7909_v18 = vpack.c.bf16 %v5569_v50, %v5567_v32  ;;  %v4270_v37 = vld [vmem:[%s4800_s13 + $0x188] sm:$0xff] }
 0x1a5   : > { %3945 = vmatpush1.bf16.xpose.msra.mxu0 %v7906_v2  ;;  %4009 = vmatpush1.bf16.xpose.msra.mxu1 %v7907_v14  ;;  %v7911_v33 = vpack.c.bf16 %v5601_v17, %v7910_v53  ;;  %4176 = vrsqrt.f32 %v1108_v4  ;;  %v962_v56 = vsub.f32 %v864_v11, %v913_v48  ;;  %v5933_v2 = vmul.f32 0.00390625, %v482_v13  ;;  %v4271_v11 = vld [vmem:[%s4800_s13 + $0x180] sm:$0xff]  ;;  %v730_v49 = vpop.xlane.xlu1 %729  ;;  %v5951_v14 = vld [vmem:[#allocation5 + $0x5c8] sm:$0xff]  ;;  %v5953_v13 = vld [vmem:[#allocation5 + $0x5d8] sm:$0xff] }
 0x1a6   : > { %7908 = vst [vmem:[#allocation44_spill] sm:$0xff] %v5924_v52  ;;  %3947 = vmatprep.subr.bf16.mxu0 %v7909_v18  ;;  %1987 = vmatmul.mubr.f32.gmra.mrb[42].mxu0 %v5911_v3  ;;  %v1226_v10 = vmul.f32 %v4171_v1, %v1030_v59  ;;  %v1033_v51 = vsub.f32 %v4270_v37, %v5805_v28  ;;  %v866_v18 = vmul.f32 0.00390625, %v730_v49 }
 0x1a7   : > { %4011 = vmatprep.subr.bf16.mxu1 %v7911_v33  ;;  %2346 = vmatmul.mubr.f32.gmra.mrb[42].mxu1 %v5911_v3  ;;  %v1337_v32 = vmul.f32 %v4937_v20, %v1227_v5  ;;  %v4173_v17 = vpop.eup %4172  ;;  %v1032_v4 = vsub.f32 %v4271_v11, %v5805_v28  ;;  %v1109_v48 = vadd.f32 1e-06, %v962_v56  ;;  %v914_v1 = vmul.f32 %v5933_v2, %v5933_v2  ;;  %v485_v5 = vpop.xlane.xlu0 %484  ;;  %v4272_v11 = vld [vmem:[%s4800_s13 + $0x198] sm:$0xff] }
 0x1a8   : > { %1992 = vmatprep.mubr.f32.mxu0 %v5924_v52  ;;  %2351 = vmatprep.mubr.f32.mxu1 %v5924_v52  ;;  %v5949_v59 = vadd.f32 %v4970_v43, %v1334_v46  ;;  %v1336_v28 = vmul.f32 %v4943_v22, %v1226_v10  ;;  %v1229_v33 = vmul.f32 %v4173_v17, %v1033_v51  ;;  %v5959_v37 = vmul.f32 0.00390625, %v485_v5  ;;  %v4273_v51 = vld [vmem:[%s4800_s13 + $0x190] sm:$0xff]  ;;  %v5983_v10 = vld [vmem:[#allocation5 + $0x7c8] sm:$0xff] }
 0x1a9   : > { %v5956_v53 = vadd.f32 %v4940_v21, %v1337_v32  ;;  %4178 = vrsqrt.f32 %v1109_v48  ;;  %v963_v56 = vsub.f32 %v865_v41, %v914_v1  ;;  %v1228_v46 = vmul.f32 %v4173_v17, %v1032_v4  ;;  %v733_v49 = vpop.xlane.xlu1 %732  ;;  %v7914_v5 = vld [vmem:[#allocation38_spill] sm:$0xff] }
 0x1aa   : > { %7912 = vst [vmem:[#allocation43_spill] sm:$0xff] %v5949_v59  ;;  %1993 = vmatmul.mubr.f32.gmra.mrb[44].mxu0 %v5949_v59  ;;  %v1035_v50 = vsub.f32 %v4272_v11, %v5831_v27  ;;  %v1339_v32 = vmul.f32 %v4937_v20, %v1229_v33  ;;  %v1034_v48 = vsub.f32 %v4273_v51, %v5831_v27  ;;  %v7915_v11 = vld [vmem:[#allocation35_spill] sm:$0xff]  ;;  %v5985_v27 = vld [vmem:[#allocation5 + $0x7d8] sm:$0xff]  ;;  %v867_v51 = vmul.f32 0.00390625, %v733_v49 }
 0x1ab   : > { %7913 = vst [vmem:[#allocation48_spill] sm:$0xff] %v5956_v53  ;;  %2352 = vmatmul.mubr.f32.gmra.mrb[44].mxu1 %v5949_v59  ;;  %1998 = vmatprep.mubr.f32.mxu0 %v5956_v53  ;;  %v4175_v41 = vpop.eup %4174  ;;  %v1110_v1 = vadd.f32 1e-06, %v963_v56  ;;  %v915_v17 = vmul.f32 %v5959_v37, %v5959_v37  ;;  %v5975_v4 = vadd.f32 %v4970_v43, %v1336_v28  ;;  %v488_v56 = vpop.xlane.xlu0 %487  ;;  %v6015_v49 = vld [vmem:[#allocation5 + $0x5c0] sm:$0xff] }
 0x1ac   : > { %2357 = vmatprep.mubr.f32.mxu1 %v5956_v53  ;;  %v7916_v53 = vpack.c.bf16 %v7914_v5, %v7915_v11  ;;  %v7917_v33 = vpack.c.bf16 %v5665_v36, %v5663_v29  ;;  %v5988_v59 = vadd.f32 %v4940_v21, %v1339_v32  ;;  %v1338_v28 = vmul.f32 %v4943_v22, %v1228_v46  ;;  %v4274_v46 = vld [vmem:[%s4800_s13 + $0x1a8] sm:$0xff]  ;;  %v6017_v11 = vld [vmem:[#allocation5 + $0x5d0] sm:$0xff] }
 0x1ad   : > { %v1231_v52 = vmul.f32 %v4175_v41, %v1035_v50  ;;  %v7919_v29 = vpack.c.bf16 %v5729_v24, %v5727_v8  ;;  %4180 = vrsqrt.f32 %v1110_v1  ;;  %v964_v36 = vsub.f32 %v866_v18, %v915_v17  ;;  %v4275_v24 = vld [vmem:[%s4800_s13 + $0x1a0] sm:$0xff]  ;;  %v736_v17 = vpop.xlane.xlu1 %735 }
 0x1ae   : > { %3949 = vmatpush1.bf16.xpose.msra.mxu0 %v7916_v53  ;;  %4013 = vmatpush1.bf16.xpose.msra.mxu1 %v7917_v33  ;;  %v7918_v53 = vpack.c.bf16 %v5697_v9, %v5695_v55  ;;  %v5997_v5 = vmul.f32 0.00390625, %v488_v56  ;;  %v1230_v32 = vmul.f32 %v4175_v41, %v1034_v48  ;;  %v1037_v50 = vsub.f32 %v4274_v46, %v5869_v63  ;;  %v4276_v46 = vld [vmem:[%s4800_s13 + $0x1b8] sm:$0xff] }
 0x1af   : > { %4015 = vmatprep.subr.bf16.mxu1 %v7919_v29  ;;  %1999 = vmatmul.mubr.f32.gmra.mrb[46].mxu0 %v5975_v4  ;;  %v1341_v55 = vmul.f32 %v4937_v20, %v1231_v52  ;;  %v4177_v8 = vpop.eup %4176  ;;  %v1036_v18 = vsub.f32 %v4275_v24, %v5869_v63  ;;  %v1111_v1 = vadd.f32 1e-06, %v964_v36  ;;  %v6013_v48 = vadd.f32 %v4970_v43, %v1338_v28  ;;  %v491_v52 = vpop.xlane.xlu0 %490 }
 0x1b0   : > { %3951 = vmatprep.subr.bf16.mxu0 %v7918_v53  ;;  %2358 = vmatmul.mubr.f32.gmra.mrb[46].mxu1 %v5975_v4  ;;  %v916_v41 = vmul.f32 %v5997_v5, %v5997_v5  ;;  %v868_v33 = vmul.f32 0.00390625, %v736_v17  ;;  %v1340_v63 = vmul.f32 %v4943_v22, %v1230_v32  ;;  %v1233_v53 = vmul.f32 %v4177_v8, %v1037_v50  ;;  %v4277_v50 = vld [vmem:[%s4800_s13 + $0x1b0] sm:$0xff] }
 0x1b1   : > { %2004 = vmatprep.mubr.f32.mxu0 %v5988_v59  ;;  %2363 = vmatprep.mubr.f32.mxu1 %v5988_v59  ;;  %v6020_v56 = vadd.f32 %v4940_v21, %v1341_v55  ;;  %4182 = vrsqrt.f32 %v1111_v1  ;;  %v6023_v36 = vmul.f32 0.00390625, %v491_v52  ;;  %v1232_v28 = vmul.f32 %v4177_v8, %v1036_v18  ;;  %v739_v17 = vpop.xlane.xlu1 %738 }
 0x1b2   : > { %v965_v29 = vsub.f32 %v867_v51, %v916_v41  ;;  %v1039_v24 = vsub.f32 %v4276_v46, %v5895_v40  ;;  %v1343_v55 = vmul.f32 %v4937_v20, %v1233_v53  ;;  %v1038_v1 = vsub.f32 %v4277_v50, %v5895_v40  ;;  %v6047_v46 = vld [vmem:[#allocation5 + $0x7c0] sm:$0xff]  ;;  %v6049_v40 = vld [vmem:[#allocation5 + $0x7d0] sm:$0xff] }
 0x1b3   : > { %2005 = vmatmul.mubr.f32.gmra.mrb[48].mxu0 %v6013_v48  ;;  %v4179_v51 = vpop.eup %4178  ;;  %v917_v8 = vmul.f32 %v6023_v36, %v6023_v36  ;;  %v6039_v18 = vadd.f32 %v4970_v43, %v1340_v63  ;;  %v7920_v52 = vpack.c.bf16 %v5761_v47, %v5759_v57  ;;  %v7921_v53 = vpack.c.bf16 %v5793_v35, %v5791_v15 }
 0x1b4   : > { %2364 = vmatmul.mubr.f32.gmra.mrb[48].mxu1 %v6013_v48  ;;  %2010 = vmatprep.mubr.f32.mxu0 %v6020_v56  ;;  %v1112_v41 = vadd.f32 1e-06, %v965_v29  ;;  %v494_v29 = vpop.xlane.xlu0 %493  ;;  %v869_v50 = vmul.f32 0.00390625, %v739_v17  ;;  %v6052_v32 = vadd.f32 %v4940_v21, %v1343_v55  ;;  %v1342_v63 = vmul.f32 %v4943_v22, %v1232_v28  ;;  %v4278_v28 = vld [vmem:[%s4800_s13 + $0x1c8] sm:$0xff] }
 0x1b5   : > { %2369 = vmatprep.mubr.f32.mxu1 %v6020_v56  ;;  %v1235_v9 = vmul.f32 %v4179_v51, %v1039_v24  ;;  %v7922_v57 = vpack.c.bf16 %v5825_v60, %v5823_v12  ;;  %v7923_v47 = vpack.c.bf16 %v5857_v26, %v5855_v45  ;;  %v966_v15 = vsub.f32 %v868_v33, %v917_v8  ;;  %v4279_v26 = vld [vmem:[%s4800_s13 + $0x1c0] sm:$0xff]  ;;  %v742_v8 = vpop.xlane.xlu1 %741  ;;  %v6079_v17 = vld [vmem:[#allocation5 + $0x5e8] sm:$0xff] }
 0x1b6   : > { %3953 = vmatpush1.bf16.xpose.msra.mxu0 %v7920_v52  ;;  %4017 = vmatpush1.bf16.xpose.msra.mxu1 %v7921_v53  ;;  %4184 = vrsqrt.f32 %v1112_v41  ;;  %v6061_v35 = vmul.f32 0.00390625, %v494_v29  ;;  %v1234_v55 = vmul.f32 %v4179_v51, %v1038_v1  ;;  %v1041_v24 = vsub.f32 %v4278_v28, %v5933_v2  ;;  %v6081_v52 = vld [vmem:[#allocation5 + $0x5f8] sm:$0xff] }
 0x1b7   : > { %3955 = vmatprep.subr.bf16.mxu0 %v7922_v57  ;;  %4019 = vmatprep.subr.bf16.mxu1 %v7923_v47  ;;  %v1345_v12 = vmul.f32 %v4937_v20, %v1235_v9  ;;  %v4181_v45 = vpop.eup %4180  ;;  %v1040_v33 = vsub.f32 %v4279_v26, %v5933_v2  ;;  %v1113_v41 = vadd.f32 1e-06, %v966_v15  ;;  %v6077_v1 = vadd.f32 %v4970_v43, %v1342_v63  ;;  %v4280_v28 = vld [vmem:[%s4800_s13 + $0x1d8] sm:$0xff] }
 0x1b8   : > { %2011 = vmatmul.mubr.f32.gmra.mrb[50].mxu0 %v6039_v18  ;;  %2370 = vmatmul.mubr.f32.gmra.mrb[50].mxu1 %v6039_v18  ;;  %v918_v51 = vmul.f32 %v6061_v35, %v6061_v35  ;;  %v497_v9 = vpop.xlane.xlu0 %496  ;;  %v870_v53 = vmul.f32 0.00390625, %v742_v8  ;;  %v1344_v2 = vmul.f32 %v4943_v22, %v1234_v55  ;;  %v1237_v57 = vmul.f32 %v4181_v45, %v1041_v24  ;;  %v4281_v24 = vld [vmem:[%s4800_s13 + $0x1d0] sm:$0xff] }
 0x1b9   : > { %2016 = vmatprep.mubr.f32.mxu0 %v6052_v32  ;;  %2375 = vmatprep.mubr.f32.mxu1 %v6052_v32  ;;  %v6084_v29 = vadd.f32 %v4940_v21, %v1345_v12  ;;  %4186 = vrsqrt.f32 %v1113_v41  ;;  %v6087_v15 = vmul.f32 0.00390625, %v497_v9  ;;  %v1236_v63 = vmul.f32 %v4181_v45, %v1040_v33  ;;  %v745_v8 = vpop.xlane.xlu1 %744 }
 0x1ba   : > { %v967_v47 = vsub.f32 %v869_v50, %v918_v51  ;;  %v1043_v26 = vsub.f32 %v4280_v28, %v5959_v37  ;;  %v1347_v12 = vmul.f32 %v4937_v20, %v1237_v57  ;;  %v1042_v41 = vsub.f32 %v4281_v24, %v5959_v37  ;;  %v6111_v28 = vld [vmem:[#allocation5 + $0x7e8] sm:$0xff]  ;;  %v6113_v37 = vld [vmem:[#allocation5 + $0x7f8] sm:$0xff] }
 0x1bb   : > { %v4183_v50 = vpop.eup %4182  ;;  %v919_v45 = vmul.f32 %v6087_v15, %v6087_v15  ;;  %v6103_v33 = vadd.f32 %v4970_v43, %v1344_v2  ;;  %v7924_v9 = vpack.c.bf16 %v5889_v38, %v5887_v6  ;;  %v7925_v57 = vpack.c.bf16 %v5921_v7, %v5919_v23 }
 0x1bc   : > { %2017 = vmatmul.mubr.f32.gmra.mrb[52].mxu0 %v6077_v1  ;;  %2376 = vmatmul.mubr.f32.gmra.mrb[52].mxu1 %v6077_v1  ;;  %v1114_v51 = vadd.f32 1e-06, %v967_v47  ;;  %v500_v47 = vpop.xlane.xlu0 %499  ;;  %v871_v24 = vmul.f32 0.00390625, %v745_v8  ;;  %v6116_v55 = vadd.f32 %v4940_v21, %v1347_v12  ;;  %v1346_v2 = vmul.f32 %v4943_v22, %v1236_v63  ;;  %v4282_v63 = vld [vmem:[%s4800_s13 + $0x1e8] sm:$0xff]  ;;  %v6143_v8 = vld [vmem:[#allocation5 + $0x5e0] sm:$0xff] }
 0x1bd   : > { %2022 = vmatprep.mubr.f32.mxu0 %v6084_v29  ;;  %2381 = vmatprep.mubr.f32.mxu1 %v6084_v29  ;;  %v1239_v60 = vmul.f32 %v4183_v50, %v1043_v26  ;;  %v7926_v6 = vpack.c.bf16 %v5953_v13, %v5951_v14  ;;  %v7927_v38 = vpack.c.bf16 %v5985_v27, %v5983_v10  ;;  %v6125_v7 = vmul.f32 0.00390625, %v500_v47  ;;  %v4283_v27 = vld [vmem:[%s4800_s13 + $0x1e0] sm:$0xff] }
 0x1be   : > { %3957 = vmatpush1.bf16.xpose.msra.mxu0 %v7924_v9  ;;  %4021 = vmatpush1.bf16.xpose.msra.mxu1 %v7925_v57  ;;  %4188 = vrsqrt.f32 %v1114_v51  ;;  %v968_v23 = vsub.f32 %v870_v53, %v919_v45  ;;  %v1238_v12 = vmul.f32 %v4183_v50, %v1042_v41  ;;  %v1045_v26 = vsub.f32 %v4282_v63, %v5997_v5  ;;  %v748_v45 = vpop.xlane.xlu1 %747  ;;  %v6145_v9 = vld [vmem:[#allocation5 + $0x5f0] sm:$0xff] }
 0x1bf   : > { %3959 = vmatprep.subr.bf16.mxu0 %v7926_v6  ;;  %4023 = vmatprep.subr.bf16.mxu1 %v7927_v38  ;;  %v1349_v14 = vmul.f32 %v4937_v20, %v1239_v60  ;;  %v4026_v13 = vpack.c.bf16 %v6113_v37, %v6111_v28  ;;  %v1044_v53 = vsub.f32 %v4283_v27, %v5997_v5  ;;  %v872_v57 = vmul.f32 0.00390625, %v748_v45  ;;  %v4284_v38 = vld [vmem:[%s4800_s13 + $0x1f8] sm:$0xff] }
 0x1c0   : > { %2023 = vmatmul.mubr.f32.gmra.mrb[54].mxu0 %v6103_v33  ;;  %2382 = vmatmul.mubr.f32.gmra.mrb[54].mxu1 %v6103_v33  ;;  %v4185_v10 = vpop.eup %4184  ;;  %v1115_v51 = vadd.f32 1e-06, %v968_v23  ;;  %v920_v50 = vmul.f32 %v6125_v7, %v6125_v7  ;;  %v6141_v41 = vadd.f32 %v4970_v43, %v1346_v2  ;;  %v503_v60 = vpop.xlane.xlu0 %502  ;;  %v1348_v5 = vmul.f32 %v4943_v22, %v1238_v12 }
 0x1c1   : > { %2028 = vmatprep.mubr.f32.mxu0 %v6116_v55  ;;  %2387 = vmatprep.mubr.f32.mxu1 %v6116_v55  ;;  %v6148_v28 = vadd.f32 %v4940_v21, %v1349_v14  ;;  %v1241_v37 = vmul.f32 %v4185_v10, %v1045_v26  ;;  %v6151_v6 = vmul.f32 0.00390625, %v503_v60  ;;  %v1240_v2 = vmul.f32 %v4185_v10, %v1044_v53  ;;  %v4285_v26 = vld [vmem:[%s4800_s13 + $0x1f0] sm:$0xff] }
 0x1c2   : > { %4190 = vrsqrt.f32 %v1115_v51  ;;  %v969_v47 = vsub.f32 %v871_v24, %v920_v50  ;;  %v1047_v23 = vsub.f32 %v4284_v38, %v6023_v36  ;;  %v3964_v12 = vpack.c.bf16 %v6145_v9, %v6143_v8  ;;  %v751_v51 = vpop.xlane.xlu1 %750  ;;  %v1750_v8 = vld [vmem:[#allocation5 + $0x7e0] sm:$0xff]  ;;  %v1752_v9 = vld [vmem:[#allocation5 + $0x7f0] sm:$0xff] }
 0x1c3   : > { %v1351_v63 = vmul.f32 %v4937_v20, %v1241_v37  ;;  %v4187_v24 = vpop.eup %4186  ;;  %v1046_v14 = vsub.f32 %v4285_v26, %v6023_v36  ;;  %v921_v10 = vmul.f32 %v6151_v6, %v6151_v6  ;;  %v6167_v53 = vadd.f32 %v4970_v43, %v1348_v5 }
 0x1c4   : > { %2029 = vmatmul.mubr.f32.gmra.mrb[56].mxu0 %v6141_v41  ;;  %2388 = vmatmul.mubr.f32.gmra.mrb[56].mxu1 %v6141_v41  ;;  %v1116_v27 = vadd.f32 1e-06, %v969_v47  ;;  %v7928_v50 = vpack.c.bf16 %v6017_v11, %v6015_v49  ;;  %v7929_v45 = vpack.c.bf16 %v6049_v40, %v6047_v46  ;;  %v506_v36 = vpop.xlane.xlu0 %505  ;;  %v873_v60 = vmul.f32 0.00390625, %v751_v51  ;;  %v4286_v40 = vld [vmem:[%s4800_s13 + $0x208] sm:$0xff] }
 0x1c5   : > { %2034 = vmatprep.mubr.f32.mxu0 %v6148_v28  ;;  %2393 = vmatprep.mubr.f32.mxu1 %v6148_v28  ;;  %v6176_v37 = vadd.f32 %v4940_v21, %v1351_v63  ;;  %v1350_v5 = vmul.f32 %v4943_v22, %v1240_v2  ;;  %v1243_v47 = vmul.f32 %v4187_v24, %v1047_v23  ;;  %v6182_v11 = vmul.f32 0.00390625, %v506_v36  ;;  %v4287_v2 = vld [vmem:[%s4800_s13 + $0x200] sm:$0xff]  ;;  %v4288_v36 = vld [vmem:[%s4800_s13 + $0x218] sm:$0xff] }
 0x1c6   : > { %3961 = vmatpush1.bf16.xpose.msra.mxu0 %v7928_v50  ;;  %4025 = vmatpush1.bf16.xpose.msra.mxu1 %v7929_v45  ;;  %v7930_v38 = vpack.c.bf16 %v6081_v52, %v6079_v17  ;;  %4192 = vrsqrt.f32 %v1116_v27  ;;  %v970_v49 = vsub.f32 %v872_v57, %v921_v10  ;;  %v1242_v46 = vmul.f32 %v4187_v24, %v1046_v14  ;;  %v754_v14 = vpop.xlane.xlu1 %753 }
 0x1c7   : > { %4027 = vmatprep.subr.bf16.mxu1 %v4026_v13  ;;  %v1049_v63 = vsub.f32 %v4286_v40, %v6061_v35  ;;  %v1353_v17 = vmul.f32 %v4937_v20, %v1243_v47  ;;  %v4028_v52 = vpack.c.bf16 %v1752_v9, %v1750_v8  ;;  %v1048_v57 = vsub.f32 %v4287_v2, %v6061_v35 }
 0x1c8   : > { %3963 = vmatprep.subr.bf16.mxu0 %v7930_v38  ;;  %2035 = vmatmul.mubr.f32.gmra.mrb[58].mxu0 %v6167_v53  ;;  %v4189_v13 = vpop.eup %4188  ;;  %v1117_v23 = vadd.f32 1e-06, %v970_v49  ;;  %v922_v26 = vmul.f32 %v6182_v11, %v6182_v11  ;;  %v6196_v24 = vadd.f32 %v4970_v43, %v1350_v5  ;;  %v509_v27 = vpop.xlane.xlu0 %508  ;;  %v874_v10 = vmul.f32 0.00390625, %v754_v14  ;;  %v4289_v49 = vld [vmem:[%s4800_s13 + $0x210] sm:$0xff] }
 0x1c9   : > { %2394 = vmatmul.mubr.f32.gmra.mrb[58].mxu1 %v6167_v53  ;;  %2040 = vmatprep.mubr.f32.mxu0 %v6176_v37  ;;  %v6199_v51 = vadd.f32 %v4940_v21, %v1353_v17  ;;  %v1352_v50 = vmul.f32 %v4943_v22, %v1242_v46  ;;  %v1245_v45 = vmul.f32 %v4189_v13, %v1049_v63  ;;  %v6202_v8 = vmul.f32 0.00390625, %v509_v27 }
 0x1ca   : > { %2399 = vmatprep.mubr.f32.mxu1 %v6176_v37  ;;  %4194 = vrsqrt.f32 %v1117_v23  ;;  %v971_v35 = vsub.f32 %v873_v60, %v922_v26  ;;  %v1244_v9 = vmul.f32 %v4189_v13, %v1048_v57  ;;  %v1051_v5 = vsub.f32 %v4288_v36, %v6087_v15  ;;  %v757_v17 = vpop.xlane.xlu1 %756 }
 0x1cb   : > { %v1355_v47 = vmul.f32 %v4937_v20, %v1245_v45  ;;  %v1050_v60 = vsub.f32 %v4289_v49, %v6087_v15  ;;  %v923_v40 = vmul.f32 %v6202_v8, %v6202_v8  ;;  %v6216_v63 = vadd.f32 %v4970_v43, %v1352_v50 }
 0x1cc   : > { %2041 = vmatmul.mubr.f32.gmra.mrb[60].mxu0 %v6196_v24  ;;  %v4191_v38 = vpop.eup %4190  ;;  %v1118_v46 = vadd.f32 1e-06, %v971_v35  ;;  %v512_v13 = vpop.xlane.xlu0 %511  ;;  %v875_v2 = vmul.f32 0.00390625, %v757_v17  ;;  %v1354_v23 = vmul.f32 %v4943_v22, %v1244_v9  ;;  %v4291_v35 = vld [vmem:[%s4800_s13 + $0x220] sm:$0xff] }
 0x1cd   : > { %2400 = vmatmul.mubr.f32.gmra.mrb[60].mxu1 %v6196_v24  ;;  %2046 = vmatprep.mubr.f32.mxu0 %v6199_v51  ;;  %v6219_v57 = vadd.f32 %v4940_v21, %v1355_v47  ;;  %v1247_v15 = vmul.f32 %v4191_v38, %v1051_v5  ;;  %v972_v26 = vsub.f32 %v874_v10, %v923_v40  ;;  %v6222_v14 = vmul.f32 0.00390625, %v512_v13 }
 0x1ce   : > { %2405 = vmatprep.mubr.f32.mxu1 %v6199_v51  ;;  %3965 = vmatpush1.bf16.xpose.msra.mxu0 %v3964_v12  ;;  %4196 = vrsqrt.f32 %v1118_v46  ;;  %v1246_v27 = vmul.f32 %v4191_v38, %v1050_v60  ;;  %v4290_v12 = vld [vmem:[%s4800_s13 + $0x228] sm:$0xff]  ;;  %v1052_v10 = vsub.f32 %v4291_v35, %v6125_v7  ;;  %v6236_v5 = vadd.f32 %v4970_v43, %v1354_v23  ;;  %v760_v47 = vpop.xlane.xlu1 %759  ;;  %v4292_v23 = vld [vmem:[%s4800_s13 + $0x238] sm:$0xff] }
 0x1cf   : > { %4029 = vmatpush1.bf16.xpose.msra.mxu1 %v4028_v52  ;;  %v1053_v52 = vsub.f32 %v4290_v12, %v6125_v7  ;;  %v1357_v50 = vmul.f32 %v4937_v20, %v1247_v15  ;;  %v1119_v9 = vadd.f32 1e-06, %v972_v26  ;;  %v924_v36 = vmul.f32 %v6222_v14, %v6222_v14  ;;  %v4293_v12 = vld [vmem:[%s4800_s13 + $0x230] sm:$0xff] }
 0x1d0   : > { %2047 = vmatmul.mubr.f32.gmra.mrb[62].mxu0 %v6216_v63  ;;  %v4193_v45 = vpop.eup %4192  ;;  %v515_v38 = vpop.xlane.xlu0 %514  ;;  %v876_v49 = vmul.f32 0.00390625, %v760_v47  ;;  %v1356_v46 = vmul.f32 %v4943_v22, %v1246_v27  ;;  %v1055_v15 = vsub.f32 %v4292_v23, %v6151_v6 }
 0x1d1   : > { %2406 = vmatmul.mubr.f32.gmra.mrb[62].mxu1 %v6216_v63  ;;  %2052 = vmatprep.mubr.f32.mxu0 %v6219_v57  ;;  %v6239_v60 = vadd.f32 %v4940_v21, %v1357_v50  ;;  %v1249_v40 = vmul.f32 %v4193_v45, %v1053_v52  ;;  %4198 = vrsqrt.f32 %v1119_v9  ;;  %v973_v7 = vsub.f32 %v875_v2, %v924_v36 }
 0x1d2   : > { %2411 = vmatprep.mubr.f32.mxu1 %v6219_v57  ;;  %v6242_v17 = vmul.f32 0.00390625, %v515_v38  ;;  %v1248_v13 = vmul.f32 %v4193_v45, %v1052_v10  ;;  %v1054_v2 = vsub.f32 %v4293_v12, %v6151_v6  ;;  %v6256_v45 = vadd.f32 %v4970_v43, %v1356_v46  ;;  %v763_v35 = vpop.xlane.xlu1 %762 }
 0x1d3   : > { %v1359_v26 = vmul.f32 %v4937_v20, %v1249_v40  ;;  %v1120_v52 = vadd.f32 1e-06, %v973_v7  ;;  %v877_v9 = vmul.f32 0.00390625, %v763_v35  ;;  %v4294_v7 = vld [vmem:[%s4800_s13 + $0x248] sm:$0xff] }
 0x1d4   : > { %2053 = vmatmul.mubr.f32.gmra.mrb[64].mxu0 %v6236_v5  ;;  %v4195_v27 = vpop.eup %4194  ;;  %v925_v50 = vmul.f32 %v6242_v17, %v6242_v17  ;;  %7931 = vst [vmem:[#allocation47_spill] sm:$0xff] %v6256_v45  ;;  %v518_v10 = vpop.xlane.xlu0 %517  ;;  %v1358_v47 = vmul.f32 %v4943_v22, %v1248_v13  ;;  %v1057_v23 = vsub.f32 %v4294_v7, %v6182_v11 }
 0x1d5   : > { %2412 = vmatmul.mubr.f32.gmra.mrb[64].mxu1 %v6236_v5  ;;  %2058 = vmatprep.mubr.f32.mxu0 %v6239_v60  ;;  %v6259_v36 = vadd.f32 %v4940_v21, %v1359_v26  ;;  %v1251_v38 = vmul.f32 %v4195_v27, %v1055_v15  ;;  %4200 = vrsqrt.f32 %v1120_v52  ;;  %v6262_v40 = vmul.f32 0.00390625, %v518_v10  ;;  %v4295_v15 = vld [vmem:[%s4800_s13 + $0x240] sm:$0xff] }
 0x1d6   : > { %2417 = vmatprep.mubr.f32.mxu1 %v6239_v60  ;;  %v974_v6 = vsub.f32 %v876_v49, %v925_v50  ;;  %v1250_v46 = vmul.f32 %v4195_v27, %v1054_v2  ;;  %v1056_v49 = vsub.f32 %v4295_v15, %v6182_v11  ;;  %v6276_v27 = vadd.f32 %v4970_v43, %v1358_v47  ;;  %v766_v2 = vpop.xlane.xlu1 %765 }
 0x1d7   : > { %7932 = vst [vmem:[#allocation50_spill] sm:$0xff] %v6259_v36  ;;  %v1361_v26 = vmul.f32 %v4937_v20, %v1251_v38  ;;  %v926_v52 = vmul.f32 %v6262_v40, %v6262_v40  ;;  %v878_v35 = vmul.f32 0.00390625, %v766_v2 }
 0x1d8   : > { %2059 = vmatmul.mubr.f32.gmra.mrb[66].mxu0 %v6256_v45  ;;  %v4197_v13 = vpop.eup %4196  ;;  %v1121_v12 = vadd.f32 1e-06, %v974_v6  ;;  %7933 = vst [vmem:[#allocation49_spill] sm:$0xff] %v6276_v27  ;;  %v521_v50 = vpop.xlane.xlu0 %520  ;;  %v1360_v38 = vmul.f32 %v4943_v22, %v1250_v46  ;;  %v4296_v6 = vld [vmem:[%s4800_s13 + $0x258] sm:$0xff] }
 0x1d9   : > { %2418 = vmatmul.mubr.f32.gmra.mrb[66].mxu1 %v6256_v45  ;;  %2064 = vmatprep.mubr.f32.mxu0 %v6259_v36  ;;  %v6279_v10 = vadd.f32 %v4940_v21, %v1361_v26  ;;  %v1253_v7 = vmul.f32 %v4197_v13, %v1057_v23  ;;  %v975_v11 = vsub.f32 %v877_v9, %v926_v52  ;;  %v6282_v15 = vmul.f32 0.00390625, %v521_v50  ;;  %v4297_v23 = vld [vmem:[%s4800_s13 + $0x250] sm:$0xff]  ;;  %v4299_v45 = vld [vmem:[%s4800_s13 + $0x268] sm:$0xff] }
 0x1da   : > { %2423 = vmatprep.mubr.f32.mxu1 %v6259_v36  ;;  %4202 = vrsqrt.f32 %v1121_v12  ;;  %v1252_v47 = vmul.f32 %v4197_v13, %v1056_v49  ;;  %v1059_v36 = vsub.f32 %v4296_v6, %v6202_v8  ;;  %v1058_v9 = vsub.f32 %v4297_v23, %v6202_v8  ;;  %v769_v49 = vpop.xlane.xlu1 %768 }
 0x1db   : > { %7934 = vst [vmem:[#allocation52_spill] sm:$0xff] %v6279_v10  ;;  %v1363_v26 = vmul.f32 %v4937_v20, %v1253_v7  ;;  %v4199_v46 = vpop.eup %4198  ;;  %v1122_v12 = vadd.f32 1e-06, %v975_v11  ;;  %v927_v52 = vmul.f32 %v6282_v15, %v6282_v15  ;;  %v6296_v13 = vadd.f32 %v4970_v43, %v1360_v38  ;;  %v4298_v38 = vld [vmem:[%s4800_s13 + $0x260] sm:$0xff] }
 0x1dc   : > { %2065 = vmatmul.mubr.f32.gmra.mrb[68].mxu0 %v6276_v27  ;;  %v524_v2 = vpop.xlane.xlu0 %523  ;;  %v879_v50 = vmul.f32 0.00390625, %v769_v49  ;;  %v1362_v7 = vmul.f32 %v4943_v22, %v1252_v47  ;;  %v1254_v11 = vmul.f32 %v4199_v46, %v1058_v9  ;;  %v1061_v49 = vsub.f32 %v4299_v45, %v6222_v14 }
 0x1dd   : > { %2424 = vmatmul.mubr.f32.gmra.mrb[68].mxu1 %v6276_v27  ;;  %2070 = vmatprep.mubr.f32.mxu0 %v6279_v10  ;;  %7935 = vst [vmem:[#allocation51_spill] sm:$0xff] %v6296_v13  ;;  %v6299_v6 = vadd.f32 %v4940_v21, %v1363_v26  ;;  %4204 = vrsqrt.f32 %v1122_v12  ;;  %v976_v8 = vsub.f32 %v878_v35, %v927_v52  ;;  %v6302_v23 = vmul.f32 0.00390625, %v524_v2 }
 0x1de   : > { %2429 = vmatprep.mubr.f32.mxu1 %v6279_v10  ;;  %v1255_v10 = vmul.f32 %v4199_v46, %v1059_v36  ;;  %v1060_v27 = vsub.f32 %v4298_v38, %v6222_v14  ;;  %v6316_v46 = vadd.f32 %v4970_v43, %v1362_v7  ;;  %v1364_v14 = vmul.f32 %v4943_v22, %v1254_v11 }
 0x1df   : > { %7936 = vst [vmem:[#allocation54_spill] sm:$0xff] %v6299_v6  ;;  %v4201_v35 = vpop.eup %4200  ;;  %v1123_v47 = vadd.f32 1e-06, %v976_v8  ;;  %v928_v26 = vmul.f32 %v6302_v23, %v6302_v23  ;;  %v4300_v8 = vld [vmem:[%s4800_s13 + $0x270] sm:$0xff] }
 0x1e0   : > { %2071 = vmatmul.mubr.f32.gmra.mrb[70].mxu0 %v6296_v13  ;;  %v1365_v36 = vmul.f32 %v4937_v20, %v1255_v10  ;;  %7937 = vst [vmem:[#allocation53_spill] sm:$0xff] %v6316_v46  ;;  %v1257_v45 = vmul.f32 %v4201_v35, %v1061_v49  ;;  %v1256_v12 = vmul.f32 %v4201_v35, %v1060_v27  ;;  %v527_v2 = vpop.xlane.xlu0 %526  ;;  %v772_v10 = vpop.xlane.xlu1 %771 }
 0x1e1   : > { %2430 = vmatmul.mubr.f32.gmra.mrb[70].mxu1 %v6296_v13  ;;  %2076 = vmatprep.mubr.f32.mxu0 %v6299_v6  ;;  %4206 = vrsqrt.f32 %v1123_v47  ;;  %v977_v52 = vsub.f32 %v879_v50, %v928_v26  ;;  %v1062_v7 = vsub.f32 %v4300_v8, %v6242_v17  ;;  %v6326_v38 = vmul.f32 0.00390625, %v527_v2  ;;  %v4301_v50 = vld [vmem:[%s4800_s13 + $0x278] sm:$0xff]  ;;  %v4305_v13 = vld [vmem:[%s4800_s13 + $0x290] sm:$0xff] }
 0x1e2   : > { %2435 = vmatprep.mubr.f32.mxu1 %v6299_v6  ;;  %v6319_v9 = vadd.f32 %v4940_v21, %v1365_v36  ;;  %v880_v36 = vmul.f32 0.00390625, %v772_v10  ;;  %v1367_v27 = vmul.f32 %v4937_v20, %v1257_v45  ;;  %v1063_v49 = vsub.f32 %v4301_v50, %v6242_v17 }
 0x1e3   : > { %v1124_v35 = vadd.f32 1e-06, %v977_v52  ;;  %v6334_v47 = vadd.f32 %v4970_v43, %v1364_v14  ;;  %v1366_v26 = vmul.f32 %v4943_v22, %v1256_v12  ;;  %v929_v2 = vmul.f32 %v6326_v38, %v6326_v38 }
 0x1e4   : > { %7938 = vst [vmem:[#allocation56_spill] sm:$0xff] %v6319_v9  ;;  %2077 = vmatmul.mubr.f32.gmra.mrb[72].mxu0 %v6316_v46  ;;  %v4203_v11 = vpop.eup %4202  ;;  %v6340_v10 = vadd.f32 %v4940_v21, %v1367_v27  ;;  %v530_v8 = vpop.xlane.xlu0 %529 }
 0x1e5   : > { %2436 = vmatmul.mubr.f32.gmra.mrb[72].mxu1 %v6316_v46  ;;  %2082 = vmatprep.mubr.f32.mxu0 %v6319_v9  ;;  %7939 = vst [vmem:[#allocation55_spill] sm:$0xff] %v6334_v47  ;;  %4208 = vrsqrt.f32 %v1124_v35  ;;  %v775_v17 = vpop.xlane.xlu1 %774  ;;  %v1259_v45 = vmul.f32 %v4203_v11, %v1063_v49  ;;  %v1258_v14 = vmul.f32 %v4203_v11, %v1062_v7  ;;  %v6344_v12 = vmul.f32 0.00390625, %v530_v8  ;;  %v4302_v35 = vld [vmem:[%s4800_s13 + $0x288] sm:$0xff]  ;;  %v4303_v11 = vld [vmem:[%s4800_s13 + $0x280] sm:$0xff]  ;;  %v4304_v8 = vld [vmem:[%s4800_s13 + $0x298] sm:$0xff] }
 0x1e6   : > { %2441 = vmatprep.mubr.f32.mxu1 %v6319_v9  ;;  %7940 = vst [vmem:[#allocation58_spill] sm:$0xff] %v6340_v10  ;;  %v978_v52 = vsub.f32 %v880_v36, %v929_v2  ;;  %v881_v50 = vmul.f32 0.00390625, %v775_v17  ;;  %v1065_v9 = vsub.f32 %v4302_v35, %v6262_v40  ;;  %v6351_v46 = vadd.f32 %v4970_v43, %v1366_v26 }
 0x1e7   : > { %v4205_v27 = vpop.eup %4204  ;;  %v1368_v7 = vmul.f32 %v4943_v22, %v1258_v14  ;;  %v1064_v36 = vsub.f32 %v4303_v11, %v6262_v40  ;;  %v930_v2 = vmul.f32 %v6344_v12, %v6344_v12  ;;  %v1067_v17 = vsub.f32 %v4304_v8, %v6282_v15 }
 0x1e8   : > { %2083 = vmatmul.mubr.f32.gmra.mrb[74].mxu0 %v6334_v47  ;;  %7941 = vst [vmem:[#allocation57_spill] sm:$0xff] %v6351_v46  ;;  %v1125_v49 = vadd.f32 1e-06, %v978_v52  ;;  %v1261_v14 = vmul.f32 %v4205_v27, %v1065_v9  ;;  %v4306_v9 = vld [vmem:[%s4800_s13 + $0x2a8] sm:$0xff] }
 0x1e9   : > { %2442 = vmatmul.mubr.f32.gmra.mrb[74].mxu1 %v6334_v47  ;;  %2088 = vmatprep.mubr.f32.mxu0 %v6340_v10  ;;  %v1369_v47 = vmul.f32 %v4937_v20, %v1259_v45  ;;  %v778_v26 = vpop.xlane.xlu1 %777  ;;  %v979_v40 = vsub.f32 %v881_v50, %v930_v2  ;;  %v6371_v8 = vadd.f32 %v4970_v43, %v1368_v7 }
 0x1ea   : > { %2447 = vmatprep.mubr.f32.mxu1 %v6340_v10  ;;  %v533_v10 = vpop.xlane.xlu0 %532  ;;  %4210 = vrsqrt.f32 %v1125_v49  ;;  %v882_v35 = vmul.f32 0.00390625, %v778_v26  ;;  %v1260_v6 = vmul.f32 %v4205_v27, %v1064_v36  ;;  %v1069_v50 = vsub.f32 %v4306_v9, %v6302_v23 }
 0x1eb   : > { %v6364_v45 = vadd.f32 %v4940_v21, %v1369_v47  ;;  %v6366_v52 = vmul.f32 0.00390625, %v533_v10  ;;  %v4207_v11 = vpop.eup %4206  ;;  %7943 = vst [vmem:[#allocation40_spill] sm:$0xff] %v6371_v8  ;;  %v1066_v47 = vsub.f32 %v4305_v13, %v6282_v15  ;;  %v1126_v10 = vadd.f32 1e-06, %v979_v40 }
 0x1ec   : > { %2089 = vmatmul.mubr.f32.gmra.mrb[76].mxu0 %v6351_v46  ;;  %v1370_v15 = vmul.f32 %v4943_v22, %v1260_v6  ;;  %v1263_v13 = vmul.f32 %v4207_v11, %v1067_v17  ;;  %v4308_v17 = vld [vmem:[%s4800_s13 + $0x2b8] sm:$0xff] }
 0x1ed   : > { %2448 = vmatmul.mubr.f32.gmra.mrb[76].mxu1 %v6351_v46  ;;  %7942 = vst [vmem:[#allocation59_spill] sm:$0xff] %v6364_v45  ;;  %2094 = vmatprep.mubr.f32.mxu0 %v6364_v45  ;;  %v1371_v46 = vmul.f32 %v4937_v20, %v1261_v14  ;;  %v931_v49 = vmul.f32 %v6366_v52, %v6366_v52  ;;  %v781_v7 = vpop.xlane.xlu1 %780  ;;  %4212 = vrsqrt.f32 %v1126_v10 }
 0x1ee   : > { %2453 = vmatprep.mubr.f32.mxu1 %v6364_v45  ;;  %v536_v2 = vpop.xlane.xlu0 %535  ;;  %v883_v14 = vmul.f32 0.00390625, %v781_v7  ;;  %v6391_v9 = vadd.f32 %v4970_v43, %v1370_v15  ;;  %v4307_v45 = vld [vmem:[%s4800_s13 + $0x2a0] sm:$0xff] }
 0x1ef   : > { %v6383_v27 = vadd.f32 %v4940_v21, %v1371_v46  ;;  %v980_v36 = vsub.f32 %v882_v35, %v931_v49  ;;  %v6386_v26 = vmul.f32 0.00390625, %v536_v2  ;;  %v4209_v40 = vpop.eup %4208  ;;  %v1262_v46 = vmul.f32 %v4207_v11, %v1066_v47 }
 0x1f0   : > { %2095 = vmatmul.mubr.f32.gmra.mrb[78].mxu0 %v6371_v8  ;;  %7945 = vst [vmem:[#allocation35_spill] sm:$0xff] %v6391_v9  ;;  %v1068_v6 = vsub.f32 %v4307_v45, %v6302_v23  ;;  %v1071_v35 = vsub.f32 %v4308_v17, %v6326_v38  ;;  %v1265_v45 = vmul.f32 %v4209_v40, %v1069_v50  ;;  %v4310_v50 = vld [vmem:[%s4800_s13 + $0x2c8] sm:$0xff] }
 0x1f1   : > { %2454 = vmatmul.mubr.f32.gmra.mrb[78].mxu1 %v6371_v8  ;;  %7944 = vst [vmem:[#allocation38_spill] sm:$0xff] %v6383_v27  ;;  %2100 = vmatprep.mubr.f32.mxu0 %v6383_v27  ;;  %v1373_v8 = vmul.f32 %v4937_v20, %v1263_v13  ;;  %v1127_v10 = vadd.f32 1e-06, %v980_v36  ;;  %v932_v49 = vmul.f32 %v6386_v26, %v6386_v26  ;;  %v784_v7 = vpop.xlane.xlu1 %783 }
 0x1f2   : > { %2459 = vmatprep.mubr.f32.mxu1 %v6383_v27  ;;  %v539_v2 = vpop.xlane.xlu0 %538  ;;  %v1372_v23 = vmul.f32 %v4943_v22, %v1262_v46  ;;  %v884_v13 = vmul.f32 0.00390625, %v784_v7  ;;  %v1375_v17 = vmul.f32 %v4937_v20, %v1265_v45  ;;  %v4309_v27 = vld [vmem:[%s4800_s13 + $0x2b0] sm:$0xff] }
 0x1f3   : > { %v6403_v11 = vadd.f32 %v4940_v21, %v1373_v8  ;;  %4214 = vrsqrt.f32 %v1127_v10  ;;  %v981_v47 = vsub.f32 %v883_v14, %v932_v49  ;;  %v6406_v15 = vmul.f32 0.00390625, %v539_v2 }
 0x1f4   : > { %2101 = vmatmul.mubr.f32.gmra.mrb[80].mxu0 %v6391_v9  ;;  %v6411_v36 = vadd.f32 %v4970_v43, %v1372_v23  ;;  %v4211_v8 = vpop.eup %4210  ;;  %v1070_v46 = vsub.f32 %v4309_v27, %v6326_v38  ;;  %v1073_v14 = vsub.f32 %v4310_v50, %v6344_v12 }
 0x1f5   : > { %2460 = vmatmul.mubr.f32.gmra.mrb[80].mxu1 %v6391_v9  ;;  %2106 = vmatprep.mubr.f32.mxu0 %v6403_v11  ;;  %v1264_v9 = vmul.f32 %v4209_v40, %v1068_v6  ;;  %v1128_v10 = vadd.f32 1e-06, %v981_v47  ;;  %v933_v49 = vmul.f32 %v6406_v15, %v6406_v15  ;;  %v787_v7 = vpop.xlane.xlu1 %786  ;;  %v6423_v40 = vadd.f32 %v4940_v21, %v1375_v17 }
 0x1f6   : > { %2465 = vmatprep.mubr.f32.mxu1 %v6403_v11  ;;  %7946 = vst [vmem:[#allocation66_spill] sm:$0xff] %v6411_v36  ;;  %v542_v2 = vpop.xlane.xlu0 %541  ;;  %v1267_v38 = vmul.f32 %v4211_v8, %v1071_v35  ;;  %v885_v45 = vmul.f32 0.00390625, %v787_v7  ;;  %v1266_v17 = vmul.f32 %v4211_v8, %v1070_v46  ;;  %v4312_v8 = vld [vmem:[%s4800_s13 + $0x2d0] sm:$0xff] }
 0x1f7   : > { %v1374_v6 = vmul.f32 %v4943_v22, %v1264_v9  ;;  %4216 = vrsqrt.f32 %v1128_v10  ;;  %v982_v27 = vsub.f32 %v884_v13, %v933_v49  ;;  %v6426_v23 = vmul.f32 0.00390625, %v542_v2  ;;  %v4311_v9 = vld [vmem:[%s4800_s13 + $0x2c0] sm:$0xff] }
 0x1f8   : > { %2107 = vmatmul.mubr.f32.gmra.mrb[82].mxu0 %v6411_v36  ;;  %v1377_v50 = vmul.f32 %v4937_v20, %v1267_v38  ;;  %v1072_v35 = vsub.f32 %v4311_v9, %v6344_v12  ;;  %v1376_v2 = vmul.f32 %v4943_v22, %v1266_v17  ;;  %v1074_v46 = vsub.f32 %v4312_v8, %v6366_v52  ;;  %v4313_v38 = vld [vmem:[%s4800_s13 + $0x2d8] sm:$0xff] }
 0x1f9   : > { %2466 = vmatmul.mubr.f32.gmra.mrb[82].mxu1 %v6411_v36  ;;  %2112 = vmatprep.mubr.f32.mxu0 %v6423_v40  ;;  %v6431_v47 = vadd.f32 %v4970_v43, %v1374_v6  ;;  %v4213_v36 = vpop.eup %4212  ;;  %v1129_v13 = vadd.f32 1e-06, %v982_v27  ;;  %v934_v10 = vmul.f32 %v6426_v23, %v6426_v23  ;;  %v1075_v27 = vsub.f32 %v4313_v38, %v6366_v52 }
 0x1fa   : > { %2471 = vmatprep.mubr.f32.mxu1 %v6423_v40  ;;  %v6441_v49 = vadd.f32 %v4940_v21, %v1377_v50  ;;  %v1269_v7 = vmul.f32 %v4213_v36, %v1073_v14  ;;  %v1268_v12 = vmul.f32 %v4213_v36, %v1072_v35  ;;  %v6451_v50 = vadd.f32 %v4970_v43, %v1376_v2  ;;  %v4314_v35 = vld [vmem:[%s4800_s13 + $0x2e8] sm:$0xff] }
 0x1fb   : > { %4218 = vrsqrt.f32 %v1129_v13  ;;  %v983_v6 = vsub.f32 %v885_v45, %v934_v10  ;;  %v1077_v10 = vsub.f32 %v4314_v35, %v6386_v26 }
 0x1fc   : > { %2113 = vmatmul.mubr.f32.gmra.mrb[84].mxu0 %v6431_v47  ;;  %v1379_v17 = vmul.f32 %v4937_v20, %v1269_v7  ;;  %v1378_v13 = vmul.f32 %v4943_v22, %v1268_v12  ;;  %v4315_v12 = vld [vmem:[%s4800_s13 + $0x2e0] sm:$0xff] }
 0x1fd   : > { %2472 = vmatmul.mubr.f32.gmra.mrb[84].mxu1 %v6431_v47  ;;  %2118 = vmatprep.mubr.f32.mxu0 %v6441_v49  ;;  %v4215_v14 = vpop.eup %4214  ;;  %v1130_v9 = vadd.f32 1e-06, %v983_v6 }
 0x1fe   : > { %2477 = vmatprep.mubr.f32.mxu1 %v6441_v49  ;;  %v6458_v52 = vadd.f32 %v4940_v21, %v1379_v17  ;;  %v1271_v36 = vmul.f32 %v4215_v14, %v1075_v27  ;;  %v1270_v45 = vmul.f32 %v4215_v14, %v1074_v46  ;;  %v6465_v2 = vadd.f32 %v4970_v43, %v1378_v13  ;;  %v4316_v17 = vld [vmem:[%s4800_s13 + $0x2f0] sm:$0xff]  ;;  %v4317_v13 = vld [vmem:[%s4800_s13 + $0x2f8] sm:$0xff] }
 0x1ff   : > { %4220 = vrsqrt.f32 %v1130_v9  ;;  %v1076_v46 = vsub.f32 %v4315_v12, %v6386_v26  ;;  %v1078_v14 = vsub.f32 %v4316_v17, %v6406_v15  ;;  %v4318_v12 = vld [vmem:[%s4800_s13 + $0x308] sm:$0xff] }
 0x200   : > { %2119 = vmatmul.mubr.f32.gmra.mrb[86].mxu0 %v6451_v50  ;;  %v1381_v7 = vmul.f32 %v4937_v20, %v1271_v36  ;;  %v1380_v8 = vmul.f32 %v4943_v22, %v1270_v45  ;;  %v1079_v36 = vsub.f32 %v4317_v13, %v6406_v15  ;;  %v4319_v13 = vld [vmem:[%s4800_s13 + $0x300] sm:$0xff] }
 0x201   : > { %2478 = vmatmul.mubr.f32.gmra.mrb[86].mxu1 %v6451_v50  ;;  %2124 = vmatprep.mubr.f32.mxu0 %v6458_v52  ;;  %v4217_v6 = vpop.eup %4216 }
 0x202   : > { %2483 = vmatprep.mubr.f32.mxu1 %v6458_v52  ;;  %v6474_v38 = vadd.f32 %v4940_v21, %v1381_v7  ;;  %v1273_v27 = vmul.f32 %v4217_v6, %v1077_v10  ;;  %v1272_v9 = vmul.f32 %v4217_v6, %v1076_v46  ;;  %v6483_v26 = vadd.f32 %v4970_v43, %v1380_v8 }
 0x203   : > { %v1081_v46 = vsub.f32 %v4318_v12, %v6426_v23 }
 0x204   : > { %2125 = vmatmul.mubr.f32.gmra.mrb[88].mxu0 %v6465_v2  ;;  %v1383_v45 = vmul.f32 %v4937_v20, %v1273_v27  ;;  %v1382_v10 = vmul.f32 %v4943_v22, %v1272_v9 }
 0x205   : > { %2484 = vmatmul.mubr.f32.gmra.mrb[88].mxu1 %v6465_v2  ;;  %2130 = vmatprep.mubr.f32.mxu0 %v6474_v38  ;;  %v4219_v35 = vpop.eup %4218 }
 0x206   : > { %2489 = vmatprep.mubr.f32.mxu1 %v6474_v38  ;;  %v6490_v7 = vadd.f32 %v4940_v21, %v1383_v45  ;;  %v1275_v15 = vmul.f32 %v4219_v35, %v1079_v36  ;;  %v1274_v6 = vmul.f32 %v4219_v35, %v1078_v14  ;;  %v6497_v8 = vadd.f32 %v4970_v43, %v1382_v10 }
 0x207   : > { %v1080_v45 = vsub.f32 %v4319_v13, %v6426_v23 }
 0x208   : > { %2131 = vmatmul.mubr.f32.gmra.mrb[90].mxu0 %v6483_v26  ;;  %v1385_v27 = vmul.f32 %v4937_v20, %v1275_v15  ;;  %v1384_v17 = vmul.f32 %v4943_v22, %v1274_v6 }
 0x209   : > { %2490 = vmatmul.mubr.f32.gmra.mrb[90].mxu1 %v6483_v26  ;;  %2136 = vmatprep.mubr.f32.mxu0 %v6490_v7  ;;  %v4221_v9 = vpop.eup %4220 }
 0x20a   : > { %2495 = vmatprep.mubr.f32.mxu1 %v6490_v7  ;;  %v6506_v14 = vadd.f32 %v4940_v21, %v1385_v27  ;;  %v1277_v36 = vmul.f32 %v4221_v9, %v1081_v46  ;;  %v1276_v35 = vmul.f32 %v4221_v9, %v1080_v45  ;;  %v6511_v10 = vadd.f32 %v4970_v43, %v1384_v17  ;;  %v7952_v46 = vld [vmem:[#allocation63_spill] sm:$0xff]  ;;  %v7954_v27 = vld [vmem:[#allocation16_spill] sm:$0xff]  ;;  %v7955_v9 = vld [vmem:[#allocation65_spill] sm:$0xff] }
 0x20b   : > { %v1766_v17 = vsub.s32 2, %v7954_v27  ;;  %v1770_v13 = vsub.s32 3, %v7954_v27  ;;  %v7956_v45 = vld [vmem:[#allocation19_spill] sm:$0xff] }
 0x20c   : > { %2137 = vmatmul.mubr.f32.gmra.mrb[92].mxu0 %v6497_v8  ;;  %v1387_v15 = vmul.f32 %v4937_v20, %v1277_v36  ;;  %v1386_v23 = vmul.f32 %v4943_v22, %v1276_v35  ;;  %v7949_v20 = vld [vmem:[#allocation60_spill] sm:$0xff]  ;;  %v7950_v22 = vld [vmem:[#allocation61_spill] sm:$0xff]  ;;  %v1754_v36 = vld [vmem:[#allocation7] sm:$0xff] }
 0x20d   : > { %2496 = vmatmul.mubr.f32.gmra.mrb[92].mxu1 %v6497_v8  ;;  %2142 = vmatprep.mubr.f32.mxu0 %v6506_v14  ;;  %v7957_v35 = vld [vmem:[#allocation22_spill] sm:$0xff] }
 0x20e   : > { %2501 = vmatprep.mubr.f32.mxu1 %v6506_v14  ;;  %v6518_v6 = vadd.f32 %v4940_v21, %v1387_v15  ;;  %v6523_v12 = vadd.f32 %v4970_v43, %v1386_v23  ;;  %v7951_v21 = vld [vmem:[#allocation62_spill] sm:$0xff]  ;;  %v7953_v43 = vld [vmem:[#allocation64_spill] sm:$0xff] }
 0x20f   : > { %v7958_v15 = vld [vmem:[#allocation18_spill] sm:$0xff] }
 0x210   : > { %2143 = vmatmul.mubr.f32.gmra.mrb[94].mxu0 %v6511_v10  ;;  %7947 = vst [vmem:[#allocation67_spill] sm:$0xff] %v6518_v6  ;;  %7948 = vst [vmem:[#allocation68_spill] sm:$0xff] %v6523_v12  ;;  %v6547_v23 = vrot.slane %v1754_v36, %v7958_v15 }
 0x211   : > { %2502 = vmatmul.mubr.f32.gmra.mrb[94].mxu1 %v6511_v10  ;;  %2148 = vmatprep.mubr.f32.mxu0 %v6518_v6 }
 0x212   : > { %2507 = vmatprep.mubr.f32.mxu1 %v6518_v6  ;;  %v7961_v6 = vld [vmem:[#allocation21_spill] sm:$0xff] }
 0x214   : > { %2149 = vmatmul.mubr.f32.gmra.mrb[96].mxu0 %v6523_v12 }
 0x215   : > { %2508 = vmatmul.mubr.f32.gmra.mrb[96].mxu1 %v6523_v12  ;;  %2578 = vmatprep.mubr.f32.mxu0 %v7949_v20 }
 0x216   : > { %2937 = vmatprep.mubr.f32.mxu1 %v7949_v20  ;;  %v6549_v20 = vrot.slane %v1754_v36, %v1766_v17 }
 0x218   : > { %2579 = vmatmul.mubr.f32.vlgmr.msra.gmra.mrb[98].mxu0 %v7950_v22 }
 0x219   : > { %2938 = vmatmul.mubr.f32.vlgmr.msra.gmra.mrb[98].mxu1 %v7950_v22  ;;  %2584 = vmatprep.mubr.f32.mxu0 %v7951_v21  ;;  %v7959_v22 = vld [vmem:[#allocation26_spill] sm:$0xff] }
 0x21a   : > { %2943 = vmatprep.mubr.f32.mxu1 %v7951_v21  ;;  %v7960_v21 = vld [vmem:[#allocation17_spill] sm:$0xff] }
 0x21c   : > { %2585 = vmatmul.mubr.f32.gmra.mrb[100].mxu0 %v7952_v46 }
 0x21d   : > { %2944 = vmatmul.mubr.f32.gmra.mrb[100].mxu1 %v7952_v46  ;;  %2590 = vmatprep.mubr.f32.mxu0 %v7953_v43  ;;  %v6554_v46 = vrot.slane %v1754_v36, %v7960_v21  ;;  %v7962_v21 = vld [vmem:[#allocation20_spill] sm:$0xff] }
 0x21e   : > { %2949 = vmatprep.mubr.f32.mxu1 %v7953_v43  ;;  %v6556_v43 = vrot.slane %v1754_v36, %v1770_v13 }
 0x220   : > { %2591 = vmatmul.mubr.f32.gmra.mrb[102].mxu0 %v7955_v9 }
 0x221   : > { %2950 = vmatmul.mubr.f32.gmra.mrb[102].mxu1 %v7955_v9  ;;  %2596 = vmatprep.mubr.f32.mxu0 %v7956_v45  ;;  %v1862_v9 = vpop.f32.mrb[0].mxu0 }
 0x222   : > { %2955 = vmatprep.mubr.f32.mxu1 %v7956_v45  ;;  %v2221_v45 = vpop.f32.mrb[0].mxu1  ;;  %v1863_v27 = vadd.f32 %v1862_v9, %v6547_v23  ;;  %v1864_v12 = vpop.f32.mrb[1].mxu0 }
 0x223   : > { %v2223_v15 = vpop.f32.mrb[1].mxu1  ;;  %v1865_v17 = vadd.f32 %v1864_v12, %v6554_v46 }
 0x224   : > { %2597 = vmatmul.mubr.f32.gmra.mrb[104].mxu0 %v7957_v35  ;;  %3232 = vst [vmem:[%s6566_s26] sm:$0xff] %v1863_v27  ;;  %v2227_v12 = vpop.f32.mrb[2].mxu1 }
 0x225   : > { %2956 = vmatmul.mubr.f32.gmra.mrb[104].mxu1 %v7957_v35  ;;  %2602 = vmatprep.mubr.f32.mxu0 %v7959_v22  ;;  %v2222_v35 = vadd.f32 %v2221_v45, %v6549_v20  ;;  %3233 = vst [vmem:[%s6566_s26 + $0x8] sm:$0xff] %v1865_v17  ;;  %v2228_v36 = vadd.f32 %v2227_v12, %v6549_v20  ;;  %v2229_v45 = vpop.f32.mrb[3].mxu1  ;;  %v7964_v17 = vld [vmem:[#allocation24_spill] sm:$0xff] }
 0x226   : > { %2961 = vmatprep.mubr.f32.mxu1 %v7959_v22  ;;  %v2224_v22 = vadd.f32 %v2223_v15, %v6556_v43  ;;  %v7963_v15 = vld [vmem:[#allocation25_spill] sm:$0xff] }
 0x227   : > { %3234 = vst [vmem:[%s6566_s26 + $0x10] sm:$0xff] %v2222_v35  ;;  %v2230_v35 = vadd.f32 %v2229_v45, %v6556_v43  ;;  %3242 = vst [vmem:[%s6566_s26 + $0x50] sm:$0xff] %v2228_v36 }
 0x228   : > { %2603 = vmatmul.mubr.f32.gmra.mrb[106].mxu0 %v7961_v6  ;;  %3235 = vst [vmem:[%s6566_s26 + $0x18] sm:$0xff] %v2224_v22 }
 0x229   : > { %2962 = vmatmul.mubr.f32.gmra.mrb[106].mxu1 %v7961_v6  ;;  %2608 = vmatprep.mubr.f32.mxu0 %v7962_v21  ;;  %v1868_v6 = vpop.f32.mrb[2].mxu0  ;;  %3243 = vst [vmem:[%s6566_s26 + $0x58] sm:$0xff] %v2230_v35 }
 0x22a   : > { %2967 = vmatprep.mubr.f32.mxu1 %v7962_v21  ;;  %v1869_v13 = vadd.f32 %v1868_v6, %v6547_v23  ;;  %v1870_v9 = vpop.f32.mrb[3].mxu0  ;;  %v2233_v21 = vpop.f32.mrb[4].mxu1 }
 0x22b   : > { %v1871_v27 = vadd.f32 %v1870_v9, %v6554_v46  ;;  %v1874_v22 = vpop.f32.mrb[4].mxu0  ;;  %v2234_v12 = vadd.f32 %v2233_v21, %v6549_v20  ;;  %v2235_v45 = vpop.f32.mrb[5].mxu1 }
 0x22c   : > { %2609 = vmatmul.mubr.f32.gmra.mrb[108].mxu0 %v7963_v15  ;;  %3240 = vst [vmem:[%s6566_s26 + $0x40] sm:$0xff] %v1869_v13  ;;  %v1875_v6 = vadd.f32 %v1874_v22, %v6547_v23  ;;  %v1876_v9 = vpop.f32.mrb[5].mxu0  ;;  %v2236_v36 = vadd.f32 %v2235_v45, %v6556_v43 }
 0x22d   : > { %2968 = vmatmul.mubr.f32.gmra.mrb[108].mxu1 %v7963_v15  ;;  %2614 = vmatprep.mubr.f32.mxu0 %v7964_v17  ;;  %3241 = vst [vmem:[%s6566_s26 + $0x48] sm:$0xff] %v1871_v27  ;;  %v7965_v15 = vld [vmem:[#allocation23_spill] sm:$0xff]  ;;  %v1877_v13 = vadd.f32 %v1876_v9, %v6554_v46  ;;  %3250 = vst [vmem:[%s6566_s26 + $0x90] sm:$0xff] %v2234_v12  ;;  %v1880_v35 = vpop.f32.mrb[6].mxu0 }
 0x22e   : > { %2973 = vmatprep.mubr.f32.mxu1 %v7964_v17  ;;  %v7966_v27 = vld [vmem:[#allocation27_spill] sm:$0xff]  ;;  %3248 = vst [vmem:[%s6566_s26 + $0x80] sm:$0xff] %v1875_v6  ;;  %3251 = vst [vmem:[%s6566_s26 + $0x98] sm:$0xff] %v2236_v36  ;;  %v2239_v17 = vpop.f32.mrb[6].mxu1  ;;  %v1881_v22 = vadd.f32 %v1880_v35, %v6547_v23  ;;  %v1882_v9 = vpop.f32.mrb[7].mxu0 }
 0x22f   : > { %3249 = vst [vmem:[%s6566_s26 + $0x88] sm:$0xff] %v1877_v13  ;;  %v2240_v21 = vadd.f32 %v2239_v17, %v6549_v20  ;;  %v2241_v45 = vpop.f32.mrb[7].mxu1  ;;  %v1883_v6 = vadd.f32 %v1882_v9, %v6554_v46  ;;  %v7968_v13 = vld [vmem:[#allocation30_spill] sm:$0xff] }
 0x230   : > { %2615 = vmatmul.mubr.f32.gmra.mrb[110].mxu0 %v7965_v15  ;;  %v2242_v12 = vadd.f32 %v2241_v45, %v6556_v43  ;;  %3256 = vst [vmem:[%s6566_s26 + $0xc0] sm:$0xff] %v1881_v22  ;;  %v1886_v36 = vpop.f32.mrb[8].mxu0 }
 0x231   : > { %2974 = vmatmul.mubr.f32.gmra.mrb[110].mxu1 %v7965_v15  ;;  %2620 = vmatprep.mubr.f32.mxu0 %v7966_v27  ;;  %v7967_v15 = vld [vmem:[#allocation28_spill] sm:$0xff]  ;;  %3258 = vst [vmem:[%s6566_s26 + $0xd0] sm:$0xff] %v2240_v21  ;;  %3257 = vst [vmem:[%s6566_s26 + $0xc8] sm:$0xff] %v1883_v6  ;;  %v1887_v35 = vadd.f32 %v1886_v36, %v6547_v23  ;;  %v1888_v9 = vpop.f32.mrb[9].mxu0  ;;  %v7970_v6 = vld [vmem:[#allocation31_spill] sm:$0xff] }
 0x232   : > { %2979 = vmatprep.mubr.f32.mxu1 %v7966_v27  ;;  %3259 = vst [vmem:[%s6566_s26 + $0xd8] sm:$0xff] %v2242_v12  ;;  %v2245_v27 = vpop.f32.mrb[8].mxu1  ;;  %v1889_v22 = vadd.f32 %v1888_v9, %v6554_v46 }
 0x233   : > { %v2246_v17 = vadd.f32 %v2245_v27, %v6549_v20  ;;  %v2247_v45 = vpop.f32.mrb[9].mxu1  ;;  %3264 = vst [vmem:[%s6566_s26 + $0x100] sm:$0xff] %v1887_v35 }
 0x234   : > { %2621 = vmatmul.mubr.f32.gmra.mrb[112].mxu0 %v7967_v15  ;;  %v2248_v21 = vadd.f32 %v2247_v45, %v6556_v43  ;;  %3265 = vst [vmem:[%s6566_s26 + $0x108] sm:$0xff] %v1889_v22  ;;  %v7972_v22 = vld [vmem:[#allocation34_spill] sm:$0xff] }
 0x235   : > { %2980 = vmatmul.mubr.f32.gmra.mrb[112].mxu1 %v7967_v15  ;;  %2626 = vmatprep.mubr.f32.mxu0 %v7968_v13  ;;  %v7969_v15 = vld [vmem:[#allocation29_spill] sm:$0xff]  ;;  %3266 = vst [vmem:[%s6566_s26 + $0x110] sm:$0xff] %v2246_v17  ;;  %v1892_v12 = vpop.f32.mrb[10].mxu0 }
 0x236   : > { %2985 = vmatprep.mubr.f32.mxu1 %v7968_v13  ;;  %3267 = vst [vmem:[%s6566_s26 + $0x118] sm:$0xff] %v2248_v21  ;;  %v2251_v13 = vpop.f32.mrb[10].mxu1  ;;  %v1893_v36 = vadd.f32 %v1892_v12, %v6547_v23  ;;  %v1894_v9 = vpop.f32.mrb[11].mxu0 }
 0x237   : > { %v2252_v27 = vadd.f32 %v2251_v13, %v6549_v20  ;;  %v2253_v45 = vpop.f32.mrb[11].mxu1  ;;  %v1895_v35 = vadd.f32 %v1894_v9, %v6554_v46 }
 0x238   : > { %2627 = vmatmul.mubr.f32.gmra.mrb[114].mxu0 %v7969_v15  ;;  %v2254_v17 = vadd.f32 %v2253_v45, %v6556_v43  ;;  %3272 = vst [vmem:[%s6566_s26 + $0x140] sm:$0xff] %v1893_v36 }
 0x239   : > { %2986 = vmatmul.mubr.f32.gmra.mrb[114].mxu1 %v7969_v15  ;;  %2632 = vmatprep.mubr.f32.mxu0 %v7970_v6  ;;  %v7971_v15 = vld [vmem:[#allocation39_spill] sm:$0xff]  ;;  %3274 = vst [vmem:[%s6566_s26 + $0x150] sm:$0xff] %v2252_v27  ;;  %3273 = vst [vmem:[%s6566_s26 + $0x148] sm:$0xff] %v1895_v35  ;;  %v7974_v35 = vld [vmem:[#allocation33_spill] sm:$0xff] }
 0x23a   : > { %2991 = vmatprep.mubr.f32.mxu1 %v7970_v6  ;;  %3275 = vst [vmem:[%s6566_s26 + $0x158] sm:$0xff] %v2254_v17  ;;  %v1898_v21 = vpop.f32.mrb[12].mxu0  ;;  %v2257_v6 = vpop.f32.mrb[12].mxu1 }
 0x23b   : > { %v1899_v12 = vadd.f32 %v1898_v21, %v6547_v23  ;;  %v2258_v13 = vadd.f32 %v2257_v6, %v6549_v20  ;;  %v1900_v9 = vpop.f32.mrb[13].mxu0  ;;  %v2259_v45 = vpop.f32.mrb[13].mxu1 }
 0x23c   : > { %2633 = vmatmul.mubr.f32.gmra.mrb[116].mxu0 %v7971_v15  ;;  %v1901_v36 = vadd.f32 %v1900_v9, %v6554_v46  ;;  %v2260_v27 = vadd.f32 %v2259_v45, %v6556_v43 }
 0x23d   : > { %2992 = vmatmul.mubr.f32.gmra.mrb[116].mxu1 %v7971_v15  ;;  %2638 = vmatprep.mubr.f32.mxu0 %v7972_v22  ;;  %v7973_v15 = vld [vmem:[#allocation45_spill] sm:$0xff]  ;;  %3280 = vst [vmem:[%s6566_s26 + $0x180] sm:$0xff] %v1899_v12  ;;  %3282 = vst [vmem:[%s6566_s26 + $0x190] sm:$0xff] %v2258_v13 }
 0x23e   : > { %2997 = vmatprep.mubr.f32.mxu1 %v7972_v22  ;;  %3281 = vst [vmem:[%s6566_s26 + $0x188] sm:$0xff] %v1901_v36  ;;  %3283 = vst [vmem:[%s6566_s26 + $0x198] sm:$0xff] %v2260_v27  ;;  %v7976_v36 = vld [vmem:[#allocation46_spill] sm:$0xff] }
 0x23f   : > { %v1904_v17 = vpop.f32.mrb[14].mxu0 }
 0x240   : > { %2639 = vmatmul.mubr.f32.gmra.mrb[118].mxu0 %v7973_v15  ;;  %v2263_v22 = vpop.f32.mrb[14].mxu1  ;;  %v1905_v21 = vadd.f32 %v1904_v17, %v6547_v23  ;;  %v1906_v9 = vpop.f32.mrb[15].mxu0 }
 0x241   : > { %2998 = vmatmul.mubr.f32.gmra.mrb[118].mxu1 %v7973_v15  ;;  %2644 = vmatprep.mubr.f32.mxu0 %v7974_v35  ;;  %v2264_v6 = vadd.f32 %v2263_v22, %v6549_v20  ;;  %v2265_v45 = vpop.f32.mrb[15].mxu1  ;;  %v7975_v15 = vld [vmem:[#allocation32_spill] sm:$0xff]  ;;  %v1907_v12 = vadd.f32 %v1906_v9, %v6554_v46 }
 0x242   : > { %3003 = vmatprep.mubr.f32.mxu1 %v7974_v35  ;;  %v2266_v13 = vadd.f32 %v2265_v45, %v6556_v43  ;;  %3288 = vst [vmem:[%s6566_s26 + $0x1c0] sm:$0xff] %v1905_v21 }
 0x243   : > { %3290 = vst [vmem:[%s6566_s26 + $0x1d0] sm:$0xff] %v2264_v6  ;;  %3289 = vst [vmem:[%s6566_s26 + $0x1c8] sm:$0xff] %v1907_v12  ;;  %v1910_v27 = vpop.f32.mrb[16].mxu0  ;;  %v7978_v12 = vld [vmem:[#allocation37_spill] sm:$0xff] }
 0x244   : > { %2645 = vmatmul.mubr.f32.gmra.mrb[120].mxu0 %v7975_v15  ;;  %3291 = vst [vmem:[%s6566_s26 + $0x1d8] sm:$0xff] %v2266_v13  ;;  %v2269_v35 = vpop.f32.mrb[16].mxu1  ;;  %v1911_v17 = vadd.f32 %v1910_v27, %v6547_v23  ;;  %v1912_v9 = vpop.f32.mrb[17].mxu0 }
 0x245   : > { %3004 = vmatmul.mubr.f32.gmra.mrb[120].mxu1 %v7975_v15  ;;  %2650 = vmatprep.mubr.f32.mxu0 %v7976_v36  ;;  %v2270_v22 = vadd.f32 %v2269_v35, %v6549_v20  ;;  %v2271_v45 = vpop.f32.mrb[17].mxu1  ;;  %v7977_v15 = vld [vmem:[#allocation36_spill] sm:$0xff]  ;;  %v1913_v21 = vadd.f32 %v1912_v9, %v6554_v46 }
 0x246   : > { %3009 = vmatprep.mubr.f32.mxu1 %v7976_v36  ;;  %v2272_v6 = vadd.f32 %v2271_v45, %v6556_v43  ;;  %3296 = vst [vmem:[%s6566_s26 + $0x200] sm:$0xff] %v1911_v17 }
 0x247   : > { %3298 = vst [vmem:[%s6566_s26 + $0x210] sm:$0xff] %v2270_v22  ;;  %3297 = vst [vmem:[%s6566_s26 + $0x208] sm:$0xff] %v1913_v21 }
 0x248   : > { %2651 = vmatmul.mubr.f32.gmra.mrb[122].mxu0 %v7977_v15  ;;  %3299 = vst [vmem:[%s6566_s26 + $0x218] sm:$0xff] %v2272_v6  ;;  %v1916_v13 = vpop.f32.mrb[18].mxu0  ;;  %v2275_v36 = vpop.f32.mrb[18].mxu1 }
 0x249   : > { %3010 = vmatmul.mubr.f32.gmra.mrb[122].mxu1 %v7977_v15  ;;  %2656 = vmatprep.mubr.f32.mxu0 %v7978_v12  ;;  %v1917_v27 = vadd.f32 %v1916_v13, %v6547_v23  ;;  %v2276_v35 = vadd.f32 %v2275_v36, %v6549_v20  ;;  %v1918_v9 = vpop.f32.mrb[19].mxu0  ;;  %v2277_v45 = vpop.f32.mrb[19].mxu1 }
 0x24a   : > { %3015 = vmatprep.mubr.f32.mxu1 %v7978_v12  ;;  %v1919_v17 = vadd.f32 %v1918_v9, %v6554_v46  ;;  %v2278_v22 = vadd.f32 %v2277_v45, %v6556_v43 }
 0x24b   : > { %3304 = vst [vmem:[%s6566_s26 + $0x240] sm:$0xff] %v1917_v27  ;;  %3306 = vst [vmem:[%s6566_s26 + $0x250] sm:$0xff] %v2276_v35  ;;  %v7979_v27 = vld [vmem:[#allocation42_spill] sm:$0xff] }
 0x24c   : > { %2657 = vmatmul.mubr.f32.gmra.mrb[124].mxu0 %v5655_v58  ;;  %3305 = vst [vmem:[%s6566_s26 + $0x248] sm:$0xff] %v1919_v17  ;;  %3307 = vst [vmem:[%s6566_s26 + $0x258] sm:$0xff] %v2278_v22  ;;  %v1922_v15 = vpop.f32.mrb[20].mxu0  ;;  %v2281_v21 = vpop.f32.mrb[20].mxu1 }
 0x24d   : > { %3016 = vmatmul.mubr.f32.gmra.mrb[124].mxu1 %v5655_v58  ;;  %2662 = vmatprep.mubr.f32.mxu0 %v5668_v16  ;;  %v1923_v58 = vadd.f32 %v1922_v15, %v6547_v23  ;;  %v2282_v6 = vadd.f32 %v2281_v21, %v6549_v20  ;;  %v1924_v12 = vpop.f32.mrb[21].mxu0  ;;  %v2283_v13 = vpop.f32.mrb[21].mxu1 }
 0x24e   : > { %3021 = vmatprep.mubr.f32.mxu1 %v5668_v16  ;;  %v1925_v16 = vadd.f32 %v1924_v12, %v6554_v46  ;;  %v2284_v36 = vadd.f32 %v2283_v13, %v6556_v43 }
 0x24f   : > { %3312 = vst [vmem:[%s6566_s26 + $0x280] sm:$0xff] %v1923_v58  ;;  %3314 = vst [vmem:[%s6566_s26 + $0x290] sm:$0xff] %v2282_v6 }
 0x250   : > { %2663 = vmatmul.mubr.f32.gmra.mrb[126].mxu0 %v5693_v42  ;;  %3313 = vst [vmem:[%s6566_s26 + $0x288] sm:$0xff] %v1925_v16  ;;  %3315 = vst [vmem:[%s6566_s26 + $0x298] sm:$0xff] %v2284_v36  ;;  %v1928_v35 = vpop.f32.mrb[22].mxu0 }
 0x251   : > { %3022 = vmatmul.mubr.f32.gmra.mrb[126].mxu1 %v5693_v42  ;;  %2668 = vmatprep.mubr.f32.mxu0 %v7979_v27  ;;  %v2287_v9 = vpop.f32.mrb[22].mxu1  ;;  %v1929_v42 = vadd.f32 %v1928_v35, %v6547_v23  ;;  %v1930_v17 = vpop.f32.mrb[23].mxu0 }
 0x252   : > { %3027 = vmatprep.mubr.f32.mxu1 %v7979_v27  ;;  %v2288_v45 = vadd.f32 %v2287_v9, %v6549_v20  ;;  %v2289_v22 = vpop.f32.mrb[23].mxu1  ;;  %v1931_v15 = vadd.f32 %v1930_v17, %v6554_v46  ;;  %v7980_v27 = vld [vmem:[#allocation41_spill] sm:$0xff] }
 0x253   : > { %v2290_v21 = vadd.f32 %v2289_v22, %v6556_v43  ;;  %3320 = vst [vmem:[%s6566_s26 + $0x2c0] sm:$0xff] %v1929_v42 }
 0x254   : > { %2669 = vmatmul.mubr.f32.gmra.mrb[128].mxu0 %v5719_v0  ;;  %3322 = vst [vmem:[%s6566_s26 + $0x2d0] sm:$0xff] %v2288_v45  ;;  %3321 = vst [vmem:[%s6566_s26 + $0x2c8] sm:$0xff] %v1931_v15  ;;  %v1934_v58 = vpop.f32.mrb[24].mxu0 }
 0x255   : > { %3028 = vmatmul.mubr.f32.gmra.mrb[128].mxu1 %v5719_v0  ;;  %2674 = vmatprep.mubr.f32.mxu0 %v5732_v39  ;;  %3323 = vst [vmem:[%s6566_s26 + $0x2d8] sm:$0xff] %v2290_v21  ;;  %v2293_v6 = vpop.f32.mrb[24].mxu1  ;;  %v1935_v0 = vadd.f32 %v1934_v58, %v6547_v23  ;;  %v1936_v13 = vpop.f32.mrb[25].mxu0 }
 0x256   : > { %3033 = vmatprep.mubr.f32.mxu1 %v5732_v39  ;;  %v2294_v12 = vadd.f32 %v2293_v6, %v6549_v20  ;;  %v2295_v16 = vpop.f32.mrb[25].mxu1  ;;  %v1937_v39 = vadd.f32 %v1936_v13, %v6554_v46 }
 0x257   : > { %v2296_v36 = vadd.f32 %v2295_v16, %v6556_v43  ;;  %3328 = vst [vmem:[%s6566_s26 + $0x300] sm:$0xff] %v1935_v0 }
 0x258   : > { %2675 = vmatmul.mubr.f32.gmra.mrb[130].mxu0 %v5757_v62  ;;  %3330 = vst [vmem:[%s6566_s26 + $0x310] sm:$0xff] %v2294_v12  ;;  %3329 = vst [vmem:[%s6566_s26 + $0x308] sm:$0xff] %v1937_v39 }
 0x259   : > { %3034 = vmatmul.mubr.f32.gmra.mrb[130].mxu1 %v5757_v62  ;;  %2680 = vmatprep.mubr.f32.mxu0 %v7980_v27  ;;  %3331 = vst [vmem:[%s6566_s26 + $0x318] sm:$0xff] %v2296_v36  ;;  %v1940_v35 = vpop.f32.mrb[26].mxu0  ;;  %v2299_v9 = vpop.f32.mrb[26].mxu1 }
 0x25a   : > { %3039 = vmatprep.mubr.f32.mxu1 %v7980_v27  ;;  %v1941_v62 = vadd.f32 %v1940_v35, %v6547_v23  ;;  %v2300_v42 = vadd.f32 %v2299_v9, %v6549_v20  ;;  %v1942_v45 = vpop.f32.mrb[27].mxu0  ;;  %v2301_v17 = vpop.f32.mrb[27].mxu1 }
 0x25b   : > { %v1943_v22 = vadd.f32 %v1942_v45, %v6554_v46  ;;  %v2302_v15 = vadd.f32 %v2301_v17, %v6556_v43 }
 0x25c   : > { %2681 = vmatmul.mubr.f32.gmra.mrb[132].mxu0 %v5783_v19  ;;  %3336 = vst [vmem:[%s6566_s26 + $0x340] sm:$0xff] %v1941_v62  ;;  %3338 = vst [vmem:[%s6566_s26 + $0x350] sm:$0xff] %v2300_v42 }
 0x25d   : > { %3040 = vmatmul.mubr.f32.gmra.mrb[132].mxu1 %v5783_v19  ;;  %2686 = vmatprep.mubr.f32.mxu0 %v5796_v61  ;;  %3337 = vst [vmem:[%s6566_s26 + $0x348] sm:$0xff] %v1943_v22  ;;  %3339 = vst [vmem:[%s6566_s26 + $0x358] sm:$0xff] %v2302_v15  ;;  %v1946_v21 = vpop.f32.mrb[28].mxu0  ;;  %v2305_v58 = vpop.f32.mrb[28].mxu1 }
 0x25e   : > { %3045 = vmatprep.mubr.f32.mxu1 %v5796_v61  ;;  %v1947_v19 = vadd.f32 %v1946_v21, %v6547_v23  ;;  %v2306_v6 = vadd.f32 %v2305_v58, %v6549_v20  ;;  %v1948_v0 = vpop.f32.mrb[29].mxu0  ;;  %v2307_v12 = vpop.f32.mrb[29].mxu1 }
 0x25f   : > { %v1949_v61 = vadd.f32 %v1948_v0, %v6554_v46  ;;  %v2308_v13 = vadd.f32 %v2307_v12, %v6556_v43 }
 0x260   : > { %2687 = vmatmul.mubr.f32.gmra.mrb[134].mxu0 %v5821_v54  ;;  %3344 = vst [vmem:[%s6566_s26 + $0x380] sm:$0xff] %v1947_v19  ;;  %3346 = vst [vmem:[%s6566_s26 + $0x390] sm:$0xff] %v2306_v6 }
 0x261   : > { %3046 = vmatmul.mubr.f32.gmra.mrb[134].mxu1 %v5821_v54  ;;  %2692 = vmatprep.mubr.f32.mxu0 %v5828_v44  ;;  %3345 = vst [vmem:[%s6566_s26 + $0x388] sm:$0xff] %v1949_v61  ;;  %3347 = vst [vmem:[%s6566_s26 + $0x398] sm:$0xff] %v2308_v13  ;;  %v1952_v16 = vpop.f32.mrb[30].mxu0  ;;  %v7981_v61 = vld [vmem:[#allocation44_spill] sm:$0xff] }
 0x262   : > { %3051 = vmatprep.mubr.f32.mxu1 %v5828_v44  ;;  %v2311_v39 = vpop.f32.mrb[30].mxu1  ;;  %v1953_v54 = vadd.f32 %v1952_v16, %v6547_v23  ;;  %v1954_v27 = vpop.f32.mrb[31].mxu0 }
 0x263   : > { %v2312_v36 = vadd.f32 %v2311_v39, %v6549_v20  ;;  %v2313_v35 = vpop.f32.mrb[31].mxu1  ;;  %v1955_v44 = vadd.f32 %v1954_v27, %v6554_v46  ;;  %v7982_v27 = vld [vmem:[#allocation43_spill] sm:$0xff] }
 0x264   : > { %2693 = vmatmul.mubr.f32.gmra.mrb[136].mxu0 %v5847_v31  ;;  %v2314_v9 = vadd.f32 %v2313_v35, %v6556_v43  ;;  %3352 = vst [vmem:[%s6566_s26 + $0x3c0] sm:$0xff] %v1953_v54 }
 0x265   : > { %3052 = vmatmul.mubr.f32.gmra.mrb[136].mxu1 %v5847_v31  ;;  %2698 = vmatprep.mubr.f32.mxu0 %v5860_v25  ;;  %3354 = vst [vmem:[%s6566_s26 + $0x3d0] sm:$0xff] %v2312_v36  ;;  %3353 = vst [vmem:[%s6566_s26 + $0x3c8] sm:$0xff] %v1955_v44  ;;  %v1958_v62 = vpop.f32.mrb[32].mxu0 }
 0x266   : > { %3057 = vmatprep.mubr.f32.mxu1 %v5860_v25  ;;  %3355 = vst [vmem:[%s6566_s26 + $0x3d8] sm:$0xff] %v2314_v9  ;;  %v2317_v42 = vpop.f32.mrb[32].mxu1  ;;  %v1959_v31 = vadd.f32 %v1958_v62, %v6547_v23  ;;  %v1960_v17 = vpop.f32.mrb[33].mxu0  ;;  %v7983_v9 = vld [vmem:[#allocation48_spill] sm:$0xff] }
 0x267   : > { %v2318_v45 = vadd.f32 %v2317_v42, %v6549_v20  ;;  %v2319_v22 = vpop.f32.mrb[33].mxu1  ;;  %v1961_v25 = vadd.f32 %v1960_v17, %v6554_v46 }
 0x268   : > { %2699 = vmatmul.mubr.f32.gmra.mrb[138].mxu0 %v5885_v30  ;;  %v2320_v15 = vadd.f32 %v2319_v22, %v6556_v43  ;;  %3360 = vst [vmem:[%s6566_s26 + $0x400] sm:$0xff] %v1959_v31 }
 0x269   : > { %3058 = vmatmul.mubr.f32.gmra.mrb[138].mxu1 %v5885_v30  ;;  %2704 = vmatprep.mubr.f32.mxu0 %v5892_v34  ;;  %3362 = vst [vmem:[%s6566_s26 + $0x410] sm:$0xff] %v2318_v45  ;;  %3361 = vst [vmem:[%s6566_s26 + $0x408] sm:$0xff] %v1961_v25  ;;  %v1964_v21 = vpop.f32.mrb[34].mxu0 }
 0x26a   : > { %3063 = vmatprep.mubr.f32.mxu1 %v5892_v34  ;;  %3363 = vst [vmem:[%s6566_s26 + $0x418] sm:$0xff] %v2320_v15  ;;  %v2323_v58 = vpop.f32.mrb[34].mxu1  ;;  %v1965_v30 = vadd.f32 %v1964_v21, %v6547_v23  ;;  %v1966_v6 = vpop.f32.mrb[35].mxu0 }
 0x26b   : > { %v2324_v19 = vadd.f32 %v2323_v58, %v6549_v20  ;;  %v2325_v0 = vpop.f32.mrb[35].mxu1  ;;  %v1967_v34 = vadd.f32 %v1966_v6, %v6554_v46 }
 0x26c   : > { %2705 = vmatmul.mubr.f32.gmra.mrb[140].mxu0 %v5911_v3  ;;  %v2326_v12 = vadd.f32 %v2325_v0, %v6556_v43  ;;  %3368 = vst [vmem:[%s6566_s26 + $0x440] sm:$0xff] %v1965_v30 }
 0x26d   : > { %3064 = vmatmul.mubr.f32.gmra.mrb[140].mxu1 %v5911_v3  ;;  %2710 = vmatprep.mubr.f32.mxu0 %v7981_v61  ;;  %3370 = vst [vmem:[%s6566_s26 + $0x450] sm:$0xff] %v2324_v19  ;;  %3369 = vst [vmem:[%s6566_s26 + $0x448] sm:$0xff] %v1967_v34  ;;  %v1970_v13 = vpop.f32.mrb[36].mxu0 }
 0x26e   : > { %3069 = vmatprep.mubr.f32.mxu1 %v7981_v61  ;;  %3371 = vst [vmem:[%s6566_s26 + $0x458] sm:$0xff] %v2326_v12  ;;  %v2329_v16 = vpop.f32.mrb[36].mxu1  ;;  %v1971_v3 = vadd.f32 %v1970_v13, %v6547_v23  ;;  %v1972_v54 = vpop.f32.mrb[37].mxu0 }
 0x26f   : > { %v2330_v39 = vadd.f32 %v2329_v16, %v6549_v20  ;;  %v2331_v36 = vpop.f32.mrb[37].mxu1  ;;  %v1973_v35 = vadd.f32 %v1972_v54, %v6554_v46 }
 0x270   : > { %2711 = vmatmul.mubr.f32.gmra.mrb[142].mxu0 %v7982_v27  ;;  %v2332_v44 = vadd.f32 %v2331_v36, %v6556_v43  ;;  %3376 = vst [vmem:[%s6566_s26 + $0x480] sm:$0xff] %v1971_v3 }
 0x271   : > { %3070 = vmatmul.mubr.f32.gmra.mrb[142].mxu1 %v7982_v27  ;;  %2716 = vmatprep.mubr.f32.mxu0 %v7983_v9  ;;  %3378 = vst [vmem:[%s6566_s26 + $0x490] sm:$0xff] %v2330_v39  ;;  %3377 = vst [vmem:[%s6566_s26 + $0x488] sm:$0xff] %v1973_v35  ;;  %v1976_v62 = vpop.f32.mrb[38].mxu0 }
 0x272   : > { %3075 = vmatprep.mubr.f32.mxu1 %v7983_v9  ;;  %3379 = vst [vmem:[%s6566_s26 + $0x498] sm:$0xff] %v2332_v44  ;;  %v2335_v42 = vpop.f32.mrb[38].mxu1  ;;  %v1977_v31 = vadd.f32 %v1976_v62, %v6547_v23  ;;  %v1978_v17 = vpop.f32.mrb[39].mxu0 }
 0x273   : > { %v2336_v45 = vadd.f32 %v2335_v42, %v6549_v20  ;;  %v2337_v22 = vpop.f32.mrb[39].mxu1  ;;  %v1979_v25 = vadd.f32 %v1978_v17, %v6554_v46 }
 0x274   : > { %2717 = vmatmul.mubr.f32.gmra.mrb[144].mxu0 %v5975_v4  ;;  %v2338_v15 = vadd.f32 %v2337_v22, %v6556_v43  ;;  %3384 = vst [vmem:[%s6566_s26 + $0x4c0] sm:$0xff] %v1977_v31 }
 0x275   : > { %3076 = vmatmul.mubr.f32.gmra.mrb[144].mxu1 %v5975_v4  ;;  %2722 = vmatprep.mubr.f32.mxu0 %v5988_v59  ;;  %3386 = vst [vmem:[%s6566_s26 + $0x4d0] sm:$0xff] %v2336_v45  ;;  %3385 = vst [vmem:[%s6566_s26 + $0x4c8] sm:$0xff] %v1979_v25  ;;  %v1982_v21 = vpop.f32.mrb[40].mxu0 }
 0x276   : > { %3081 = vmatprep.mubr.f32.mxu1 %v5988_v59  ;;  %3387 = vst [vmem:[%s6566_s26 + $0x4d8] sm:$0xff] %v2338_v15  ;;  %v2341_v58 = vpop.f32.mrb[40].mxu1  ;;  %v1983_v4 = vadd.f32 %v1982_v21, %v6547_v23  ;;  %v1984_v19 = vpop.f32.mrb[41].mxu0 }
 0x277   : > { %v2342_v30 = vadd.f32 %v2341_v58, %v6549_v20  ;;  %v2343_v6 = vpop.f32.mrb[41].mxu1  ;;  %v1985_v59 = vadd.f32 %v1984_v19, %v6554_v46 }
 0x278   : > { %2723 = vmatmul.mubr.f32.gmra.mrb[146].mxu0 %v6013_v48  ;;  %v2344_v0 = vadd.f32 %v2343_v6, %v6556_v43  ;;  %3392 = vst [vmem:[%s6566_s26 + $0x500] sm:$0xff] %v1983_v4 }
 0x279   : > { %3082 = vmatmul.mubr.f32.gmra.mrb[146].mxu1 %v6013_v48  ;;  %2728 = vmatprep.mubr.f32.mxu0 %v6020_v56  ;;  %3394 = vst [vmem:[%s6566_s26 + $0x510] sm:$0xff] %v2342_v30  ;;  %3393 = vst [vmem:[%s6566_s26 + $0x508] sm:$0xff] %v1985_v59  ;;  %v1988_v34 = vpop.f32.mrb[42].mxu0 }
 0x27a   : > { %3087 = vmatprep.mubr.f32.mxu1 %v6020_v56  ;;  %3395 = vst [vmem:[%s6566_s26 + $0x518] sm:$0xff] %v2344_v0  ;;  %v2347_v12 = vpop.f32.mrb[42].mxu1  ;;  %v1989_v48 = vadd.f32 %v1988_v34, %v6547_v23  ;;  %v1990_v13 = vpop.f32.mrb[43].mxu0 }
 0x27b   : > { %v2348_v61 = vadd.f32 %v2347_v12, %v6549_v20  ;;  %v2349_v16 = vpop.f32.mrb[43].mxu1  ;;  %v1991_v56 = vadd.f32 %v1990_v13, %v6554_v46 }
 0x27c   : > { %2729 = vmatmul.mubr.f32.gmra.mrb[148].mxu0 %v6039_v18  ;;  %v2350_v3 = vadd.f32 %v2349_v16, %v6556_v43  ;;  %3400 = vst [vmem:[%s6566_s26 + $0x540] sm:$0xff] %v1989_v48 }
 0x27d   : > { %3088 = vmatmul.mubr.f32.gmra.mrb[148].mxu1 %v6039_v18  ;;  %2734 = vmatprep.mubr.f32.mxu0 %v6052_v32  ;;  %3402 = vst [vmem:[%s6566_s26 + $0x550] sm:$0xff] %v2348_v61  ;;  %3401 = vst [vmem:[%s6566_s26 + $0x548] sm:$0xff] %v1991_v56  ;;  %v1994_v39 = vpop.f32.mrb[44].mxu0 }
 0x27e   : > { %3093 = vmatprep.mubr.f32.mxu1 %v6052_v32  ;;  %3403 = vst [vmem:[%s6566_s26 + $0x558] sm:$0xff] %v2350_v3  ;;  %v2353_v54 = vpop.f32.mrb[44].mxu1  ;;  %v1995_v18 = vadd.f32 %v1994_v39, %v6547_v23  ;;  %v1996_v27 = vpop.f32.mrb[45].mxu0 }
 0x27f   : > { %v2354_v36 = vadd.f32 %v2353_v54, %v6549_v20  ;;  %v2355_v35 = vpop.f32.mrb[45].mxu1  ;;  %v1997_v32 = vadd.f32 %v1996_v27, %v6554_v46 }
 0x280   : > { %2735 = vmatmul.mubr.f32.gmra.mrb[150].mxu0 %v6077_v1  ;;  %v2356_v44 = vadd.f32 %v2355_v35, %v6556_v43  ;;  %3408 = vst [vmem:[%s6566_s26 + $0x580] sm:$0xff] %v1995_v18 }
 0x281   : > { %3094 = vmatmul.mubr.f32.gmra.mrb[150].mxu1 %v6077_v1  ;;  %2740 = vmatprep.mubr.f32.mxu0 %v6084_v29  ;;  %3410 = vst [vmem:[%s6566_s26 + $0x590] sm:$0xff] %v2354_v36  ;;  %3409 = vst [vmem:[%s6566_s26 + $0x588] sm:$0xff] %v1997_v32 }
 0x282   : > { %3099 = vmatprep.mubr.f32.mxu1 %v6084_v29  ;;  %3411 = vst [vmem:[%s6566_s26 + $0x598] sm:$0xff] %v2356_v44  ;;  %v2000_v9 = vpop.f32.mrb[46].mxu0 }
 0x283   : > { %v2359_v62 = vpop.f32.mrb[46].mxu1  ;;  %v2001_v1 = vadd.f32 %v2000_v9, %v6547_v23  ;;  %v2002_v31 = vpop.f32.mrb[47].mxu0 }
 0x284   : > { %v2360_v42 = vadd.f32 %v2359_v62, %v6549_v20  ;;  %v2361_v45 = vpop.f32.mrb[47].mxu1  ;;  %2741 = vmatmul.mubr.f32.gmra.mrb[152].mxu0 %v6103_v33  ;;  %v2003_v29 = vadd.f32 %v2002_v31, %v6554_v46 }
 0x285   : > { %3100 = vmatmul.mubr.f32.gmra.mrb[152].mxu1 %v6103_v33  ;;  %v2362_v17 = vadd.f32 %v2361_v45, %v6556_v43  ;;  %2746 = vmatprep.mubr.f32.mxu0 %v6116_v55  ;;  %3416 = vst [vmem:[%s6566_s26 + $0x5c0] sm:$0xff] %v2001_v1 }
 0x286   : > { %3105 = vmatprep.mubr.f32.mxu1 %v6116_v55  ;;  %3418 = vst [vmem:[%s6566_s26 + $0x5d0] sm:$0xff] %v2360_v42  ;;  %3417 = vst [vmem:[%s6566_s26 + $0x5c8] sm:$0xff] %v2003_v29  ;;  %v2006_v22 = vpop.f32.mrb[48].mxu0 }
 0x287   : > { %3419 = vst [vmem:[%s6566_s26 + $0x5d8] sm:$0xff] %v2362_v17  ;;  %v2365_v25 = vpop.f32.mrb[48].mxu1  ;;  %v2007_v33 = vadd.f32 %v2006_v22, %v6547_v23  ;;  %v2008_v21 = vpop.f32.mrb[49].mxu0  ;;  %v7984_v22 = vld [vmem:[#allocation47_spill] sm:$0xff] }
 0x288   : > { %v2366_v15 = vadd.f32 %v2365_v25, %v6549_v20  ;;  %v2367_v58 = vpop.f32.mrb[49].mxu1  ;;  %2747 = vmatmul.mubr.f32.gmra.mrb[154].mxu0 %v6141_v41  ;;  %v2009_v55 = vadd.f32 %v2008_v21, %v6554_v46 }
 0x289   : > { %3106 = vmatmul.mubr.f32.gmra.mrb[154].mxu1 %v6141_v41  ;;  %v2368_v4 = vadd.f32 %v2367_v58, %v6556_v43  ;;  %2752 = vmatprep.mubr.f32.mxu0 %v6148_v28  ;;  %3424 = vst [vmem:[%s6566_s26 + $0x600] sm:$0xff] %v2007_v33  ;;  %v7985_v33 = vld [vmem:[#allocation50_spill] sm:$0xff] }
 0x28a   : > { %3111 = vmatprep.mubr.f32.mxu1 %v6148_v28  ;;  %3426 = vst [vmem:[%s6566_s26 + $0x610] sm:$0xff] %v2366_v15  ;;  %3425 = vst [vmem:[%s6566_s26 + $0x608] sm:$0xff] %v2009_v55 }
 0x28b   : > { %3427 = vst [vmem:[%s6566_s26 + $0x618] sm:$0xff] %v2368_v4  ;;  %v2012_v30 = vpop.f32.mrb[50].mxu0  ;;  %v2371_v19 = vpop.f32.mrb[50].mxu1 }
 0x28c   : > { %v2013_v41 = vadd.f32 %v2012_v30, %v6547_v23  ;;  %v2372_v6 = vadd.f32 %v2371_v19, %v6549_v20  ;;  %v2014_v59 = vpop.f32.mrb[51].mxu0  ;;  %v2373_v0 = vpop.f32.mrb[51].mxu1  ;;  %2753 = vmatmul.mubr.f32.gmra.mrb[156].mxu0 %v6167_v53  ;;  %v7986_v19 = vld [vmem:[#allocation49_spill] sm:$0xff] }
 0x28d   : > { %3112 = vmatmul.mubr.f32.gmra.mrb[156].mxu1 %v6167_v53  ;;  %v2015_v28 = vadd.f32 %v2014_v59, %v6554_v46  ;;  %v2374_v34 = vadd.f32 %v2373_v0, %v6556_v43  ;;  %2758 = vmatprep.mubr.f32.mxu0 %v6176_v37  ;;  %v7987_v59 = vld [vmem:[#allocation52_spill] sm:$0xff] }
 0x28e   : > { %3117 = vmatprep.mubr.f32.mxu1 %v6176_v37  ;;  %3432 = vst [vmem:[%s6566_s26 + $0x640] sm:$0xff] %v2013_v41  ;;  %3434 = vst [vmem:[%s6566_s26 + $0x650] sm:$0xff] %v2372_v6 }
 0x28f   : > { %3433 = vst [vmem:[%s6566_s26 + $0x648] sm:$0xff] %v2015_v28  ;;  %3435 = vst [vmem:[%s6566_s26 + $0x658] sm:$0xff] %v2374_v34  ;;  %v2018_v12 = vpop.f32.mrb[52].mxu0  ;;  %v2377_v48 = vpop.f32.mrb[52].mxu1 }
 0x290   : > { %v2019_v53 = vadd.f32 %v2018_v12, %v6547_v23  ;;  %v2378_v61 = vadd.f32 %v2377_v48, %v6549_v20  ;;  %v2020_v13 = vpop.f32.mrb[53].mxu0  ;;  %v2379_v16 = vpop.f32.mrb[53].mxu1  ;;  %2759 = vmatmul.mubr.f32.gmra.mrb[158].mxu0 %v6196_v24 }
 0x291   : > { %3118 = vmatmul.mubr.f32.gmra.mrb[158].mxu1 %v6196_v24  ;;  %v2021_v37 = vadd.f32 %v2020_v13, %v6554_v46  ;;  %v2380_v56 = vadd.f32 %v2379_v16, %v6556_v43  ;;  %2764 = vmatprep.mubr.f32.mxu0 %v6199_v51 }
 0x292   : > { %3123 = vmatprep.mubr.f32.mxu1 %v6199_v51  ;;  %3440 = vst [vmem:[%s6566_s26 + $0x680] sm:$0xff] %v2019_v53  ;;  %3442 = vst [vmem:[%s6566_s26 + $0x690] sm:$0xff] %v2378_v61  ;;  %v7988_v61 = vld [vmem:[#allocation51_spill] sm:$0xff] }
 0x293   : > { %3441 = vst [vmem:[%s6566_s26 + $0x688] sm:$0xff] %v2021_v37  ;;  %3443 = vst [vmem:[%s6566_s26 + $0x698] sm:$0xff] %v2380_v56  ;;  %v2024_v3 = vpop.f32.mrb[54].mxu0  ;;  %v2383_v39 = vpop.f32.mrb[54].mxu1  ;;  %v7989_v37 = vld [vmem:[#allocation54_spill] sm:$0xff] }
 0x294   : > { %v2025_v24 = vadd.f32 %v2024_v3, %v6547_v23  ;;  %v2384_v54 = vadd.f32 %v2383_v39, %v6549_v20  ;;  %v2026_v18 = vpop.f32.mrb[55].mxu0  ;;  %v2385_v36 = vpop.f32.mrb[55].mxu1  ;;  %2765 = vmatmul.mubr.f32.gmra.mrb[160].mxu0 %v6216_v63 }
 0x295   : > { %3124 = vmatmul.mubr.f32.gmra.mrb[160].mxu1 %v6216_v63  ;;  %v2027_v51 = vadd.f32 %v2026_v18, %v6554_v46  ;;  %v2386_v27 = vadd.f32 %v2385_v36, %v6556_v43  ;;  %2770 = vmatprep.mubr.f32.mxu0 %v6219_v57  ;;  %v7990_v36 = vld [vmem:[#allocation53_spill] sm:$0xff] }
 0x296   : > { %3129 = vmatprep.mubr.f32.mxu1 %v6219_v57  ;;  %3448 = vst [vmem:[%s6566_s26 + $0x6c0] sm:$0xff] %v2025_v24  ;;  %3450 = vst [vmem:[%s6566_s26 + $0x6d0] sm:$0xff] %v2384_v54 }
 0x297   : > { %3449 = vst [vmem:[%s6566_s26 + $0x6c8] sm:$0xff] %v2027_v51  ;;  %3451 = vst [vmem:[%s6566_s26 + $0x6d8] sm:$0xff] %v2386_v27  ;;  %v2030_v35 = vpop.f32.mrb[56].mxu0  ;;  %v2389_v32 = vpop.f32.mrb[56].mxu1 }
 0x298   : > { %v2031_v63 = vadd.f32 %v2030_v35, %v6547_v23  ;;  %v2390_v44 = vadd.f32 %v2389_v32, %v6549_v20  ;;  %v2032_v9 = vpop.f32.mrb[57].mxu0  ;;  %v2391_v62 = vpop.f32.mrb[57].mxu1  ;;  %2771 = vmatmul.mubr.f32.gmra.mrb[162].mxu0 %v6236_v5  ;;  %v7991_v35 = vld [vmem:[#allocation56_spill] sm:$0xff] }
 0x299   : > { %3130 = vmatmul.mubr.f32.gmra.mrb[162].mxu1 %v6236_v5  ;;  %v2033_v57 = vadd.f32 %v2032_v9, %v6554_v46  ;;  %v2392_v1 = vadd.f32 %v2391_v62, %v6556_v43  ;;  %2776 = vmatprep.mubr.f32.mxu0 %v6239_v60 }
 0x29a   : > { %3135 = vmatprep.mubr.f32.mxu1 %v6239_v60  ;;  %3456 = vst [vmem:[%s6566_s26 + $0x700] sm:$0xff] %v2031_v63  ;;  %3458 = vst [vmem:[%s6566_s26 + $0x710] sm:$0xff] %v2390_v44 }
 0x29b   : > { %3457 = vst [vmem:[%s6566_s26 + $0x708] sm:$0xff] %v2033_v57  ;;  %3459 = vst [vmem:[%s6566_s26 + $0x718] sm:$0xff] %v2392_v1  ;;  %v2036_v42 = vpop.f32.mrb[58].mxu0  ;;  %v7992_v1 = vld [vmem:[#allocation55_spill] sm:$0xff] }
 0x29c   : > { %v2395_v31 = vpop.f32.mrb[58].mxu1  ;;  %v2037_v5 = vadd.f32 %v2036_v42, %v6547_v23  ;;  %v2038_v29 = vpop.f32.mrb[59].mxu0  ;;  %2777 = vmatmul.mubr.f32.gmra.mrb[164].mxu0 %v7984_v22 }
 0x29d   : > { %v2396_v45 = vadd.f32 %v2395_v31, %v6549_v20  ;;  %v2397_v17 = vpop.f32.mrb[59].mxu1  ;;  %3136 = vmatmul.mubr.f32.gmra.mrb[164].mxu1 %v7984_v22  ;;  %v2039_v60 = vadd.f32 %v2038_v29, %v6554_v46  ;;  %2782 = vmatprep.mubr.f32.mxu0 %v7985_v33 }
 0x29e   : > { %v2398_v25 = vadd.f32 %v2397_v17, %v6556_v43  ;;  %3141 = vmatprep.mubr.f32.mxu1 %v7985_v33  ;;  %3464 = vst [vmem:[%s6566_s26 + $0x740] sm:$0xff] %v2037_v5  ;;  %v7993_v5 = vld [vmem:[#allocation58_spill] sm:$0xff]  ;;  %v7994_v33 = vld [vmem:[#allocation57_spill] sm:$0xff] }
 0x29f   : > { %3466 = vst [vmem:[%s6566_s26 + $0x750] sm:$0xff] %v2396_v45  ;;  %3465 = vst [vmem:[%s6566_s26 + $0x748] sm:$0xff] %v2039_v60  ;;  %v2042_v15 = vpop.f32.mrb[60].mxu0 }
 0x2a0   : > { %3467 = vst [vmem:[%s6566_s26 + $0x758] sm:$0xff] %v2398_v25  ;;  %v2401_v21 = vpop.f32.mrb[60].mxu1  ;;  %v2043_v58 = vadd.f32 %v2042_v15, %v6547_v23  ;;  %v2044_v4 = vpop.f32.mrb[61].mxu0  ;;  %2783 = vmatmul.mubr.f32.gmra.mrb[166].mxu0 %v7986_v19 }
 0x2a1   : > { %v2402_v55 = vadd.f32 %v2401_v21, %v6549_v20  ;;  %v2403_v30 = vpop.f32.mrb[61].mxu1  ;;  %3142 = vmatmul.mubr.f32.gmra.mrb[166].mxu1 %v7986_v19  ;;  %v2045_v41 = vadd.f32 %v2044_v4, %v6554_v46  ;;  %2788 = vmatprep.mubr.f32.mxu0 %v7987_v59 }
 0x2a2   : > { %v2404_v6 = vadd.f32 %v2403_v30, %v6556_v43  ;;  %3147 = vmatprep.mubr.f32.mxu1 %v7987_v59  ;;  %3472 = vst [vmem:[%s6566_s26 + $0x780] sm:$0xff] %v2043_v58  ;;  %v7995_v58 = vld [vmem:[#allocation59_spill] sm:$0xff]  ;;  %v7996_v59 = vld [vmem:[#allocation40_spill] sm:$0xff] }
 0x2a3   : > { %3474 = vst [vmem:[%s6566_s26 + $0x790] sm:$0xff] %v2402_v55  ;;  %3473 = vst [vmem:[%s6566_s26 + $0x788] sm:$0xff] %v2045_v41  ;;  %v2048_v0 = vpop.f32.mrb[62].mxu0 }
 0x2a4   : > { %3475 = vst [vmem:[%s6566_s26 + $0x798] sm:$0xff] %v2404_v6  ;;  %v2407_v28 = vpop.f32.mrb[62].mxu1  ;;  %v2049_v34 = vadd.f32 %v2048_v0, %v6547_v23  ;;  %v2050_v48 = vpop.f32.mrb[63].mxu0  ;;  %2789 = vmatmul.mubr.f32.gmra.mrb[168].mxu0 %v7988_v61 }
 0x2a5   : > { %v2408_v12 = vadd.f32 %v2407_v28, %v6549_v20  ;;  %v2409_v53 = vpop.f32.mrb[63].mxu1  ;;  %3148 = vmatmul.mubr.f32.gmra.mrb[168].mxu1 %v7988_v61  ;;  %v2051_v13 = vadd.f32 %v2050_v48, %v6554_v46  ;;  %2794 = vmatprep.mubr.f32.mxu0 %v7989_v37 }
 0x2a6   : > { %v2410_v16 = vadd.f32 %v2409_v53, %v6556_v43  ;;  %3153 = vmatprep.mubr.f32.mxu1 %v7989_v37  ;;  %3480 = vst [vmem:[%s6566_s26 + $0x7c0] sm:$0xff] %v2049_v34  ;;  %v7997_v34 = vld [vmem:[#allocation38_spill] sm:$0xff]  ;;  %v7998_v37 = vld [vmem:[#allocation35_spill] sm:$0xff] }
 0x2a7   : > { %3482 = vst [vmem:[%s6566_s26 + $0x7d0] sm:$0xff] %v2408_v12  ;;  %3481 = vst [vmem:[%s6566_s26 + $0x7c8] sm:$0xff] %v2051_v13  ;;  %v2054_v56 = vpop.f32.mrb[64].mxu0 }
 0x2a8   : > { %3483 = vst [vmem:[%s6566_s26 + $0x7d8] sm:$0xff] %v2410_v16  ;;  %v2413_v3 = vpop.f32.mrb[64].mxu1  ;;  %v2055_v39 = vadd.f32 %v2054_v56, %v6547_v23  ;;  %v2056_v54 = vpop.f32.mrb[65].mxu0  ;;  %2795 = vmatmul.mubr.f32.gmra.mrb[170].mxu0 %v7990_v36 }
 0x2a9   : > { %v2414_v24 = vadd.f32 %v2413_v3, %v6549_v20  ;;  %v2415_v18 = vpop.f32.mrb[65].mxu1  ;;  %3154 = vmatmul.mubr.f32.gmra.mrb[170].mxu1 %v7990_v36  ;;  %v2057_v51 = vadd.f32 %v2056_v54, %v6554_v46  ;;  %2800 = vmatprep.mubr.f32.mxu0 %v7991_v35 }
 0x2aa   : > { %v2416_v27 = vadd.f32 %v2415_v18, %v6556_v43  ;;  %3159 = vmatprep.mubr.f32.mxu1 %v7991_v35  ;;  %3488 = vst [vmem:[%s6566_s26 + $0x800] sm:$0xff] %v2055_v39 }
 0x2ab   : > { %3490 = vst [vmem:[%s6566_s26 + $0x810] sm:$0xff] %v2414_v24  ;;  %3489 = vst [vmem:[%s6566_s26 + $0x808] sm:$0xff] %v2057_v51  ;;  %v2060_v32 = vpop.f32.mrb[66].mxu0 }
 0x2ac   : > { %3491 = vst [vmem:[%s6566_s26 + $0x818] sm:$0xff] %v2416_v27  ;;  %v2419_v63 = vpop.f32.mrb[66].mxu1  ;;  %v2061_v44 = vadd.f32 %v2060_v32, %v6547_v23  ;;  %v2062_v62 = vpop.f32.mrb[67].mxu0  ;;  %2801 = vmatmul.mubr.f32.gmra.mrb[172].mxu0 %v7992_v1  ;;  %v7999_v27 = vld [vmem:[#allocation66_spill] sm:$0xff] }
 0x2ad   : > { %v2420_v9 = vadd.f32 %v2419_v63, %v6549_v20  ;;  %v2421_v57 = vpop.f32.mrb[67].mxu1  ;;  %3160 = vmatmul.mubr.f32.gmra.mrb[172].mxu1 %v7992_v1  ;;  %v2063_v42 = vadd.f32 %v2062_v62, %v6554_v46  ;;  %2806 = vmatprep.mubr.f32.mxu0 %v7993_v5 }
 0x2ae   : > { %v2422_v31 = vadd.f32 %v2421_v57, %v6556_v43  ;;  %3165 = vmatprep.mubr.f32.mxu1 %v7993_v5  ;;  %3496 = vst [vmem:[%s6566_s26 + $0x840] sm:$0xff] %v2061_v44 }
 0x2af   : > { %3498 = vst [vmem:[%s6566_s26 + $0x850] sm:$0xff] %v2420_v9  ;;  %3497 = vst [vmem:[%s6566_s26 + $0x848] sm:$0xff] %v2063_v42  ;;  %v2066_v45 = vpop.f32.mrb[68].mxu0 }
 0x2b0   : > { %3499 = vst [vmem:[%s6566_s26 + $0x858] sm:$0xff] %v2422_v31  ;;  %v2425_v29 = vpop.f32.mrb[68].mxu1  ;;  %v2067_v17 = vadd.f32 %v2066_v45, %v6547_v23  ;;  %v2068_v60 = vpop.f32.mrb[69].mxu0  ;;  %2807 = vmatmul.mubr.f32.gmra.mrb[174].mxu0 %v7994_v33 }
 0x2b1   : > { %v2426_v22 = vadd.f32 %v2425_v29, %v6549_v20  ;;  %v2427_v25 = vpop.f32.mrb[69].mxu1  ;;  %3166 = vmatmul.mubr.f32.gmra.mrb[174].mxu1 %v7994_v33  ;;  %v2069_v15 = vadd.f32 %v2068_v60, %v6554_v46  ;;  %2812 = vmatprep.mubr.f32.mxu0 %v7995_v58 }
 0x2b2   : > { %v2428_v21 = vadd.f32 %v2427_v25, %v6556_v43  ;;  %3171 = vmatprep.mubr.f32.mxu1 %v7995_v58  ;;  %3504 = vst [vmem:[%s6566_s26 + $0x880] sm:$0xff] %v2067_v17 }
 0x2b3   : > { %3506 = vst [vmem:[%s6566_s26 + $0x890] sm:$0xff] %v2426_v22  ;;  %3505 = vst [vmem:[%s6566_s26 + $0x888] sm:$0xff] %v2069_v15  ;;  %v2072_v55 = vpop.f32.mrb[70].mxu0 }
 0x2b4   : > { %3507 = vst [vmem:[%s6566_s26 + $0x898] sm:$0xff] %v2428_v21  ;;  %v2431_v4 = vpop.f32.mrb[70].mxu1  ;;  %v2073_v30 = vadd.f32 %v2072_v55, %v6547_v23  ;;  %v2074_v41 = vpop.f32.mrb[71].mxu0  ;;  %2813 = vmatmul.mubr.f32.gmra.mrb[176].mxu0 %v7996_v59 }
 0x2b5   : > { %v2432_v19 = vadd.f32 %v2431_v4, %v6549_v20  ;;  %v2433_v6 = vpop.f32.mrb[71].mxu1  ;;  %3172 = vmatmul.mubr.f32.gmra.mrb[176].mxu1 %v7996_v59  ;;  %v2075_v0 = vadd.f32 %v2074_v41, %v6554_v46  ;;  %2818 = vmatprep.mubr.f32.mxu0 %v7997_v34 }
 0x2b6   : > { %v2434_v28 = vadd.f32 %v2433_v6, %v6556_v43  ;;  %3177 = vmatprep.mubr.f32.mxu1 %v7997_v34  ;;  %3512 = vst [vmem:[%s6566_s26 + $0x8c0] sm:$0xff] %v2073_v30 }
 0x2b7   : > { %3514 = vst [vmem:[%s6566_s26 + $0x8d0] sm:$0xff] %v2432_v19  ;;  %3513 = vst [vmem:[%s6566_s26 + $0x8c8] sm:$0xff] %v2075_v0  ;;  %v2078_v12 = vpop.f32.mrb[72].mxu0 }
 0x2b8   : > { %3515 = vst [vmem:[%s6566_s26 + $0x8d8] sm:$0xff] %v2434_v28  ;;  %v2437_v48 = vpop.f32.mrb[72].mxu1  ;;  %v2079_v53 = vadd.f32 %v2078_v12, %v6547_v23  ;;  %v2080_v13 = vpop.f32.mrb[73].mxu0  ;;  %2819 = vmatmul.mubr.f32.gmra.mrb[178].mxu0 %v7998_v37 }
 0x2b9   : > { %v2438_v61 = vadd.f32 %v2437_v48, %v6549_v20  ;;  %v2439_v16 = vpop.f32.mrb[73].mxu1  ;;  %3178 = vmatmul.mubr.f32.gmra.mrb[178].mxu1 %v7998_v37  ;;  %v2081_v56 = vadd.f32 %v2080_v13, %v6554_v46  ;;  %2824 = vmatprep.mubr.f32.mxu0 %v6403_v11 }
 0x2ba   : > { %v2440_v3 = vadd.f32 %v2439_v16, %v6556_v43  ;;  %3183 = vmatprep.mubr.f32.mxu1 %v6403_v11  ;;  %3520 = vst [vmem:[%s6566_s26 + $0x900] sm:$0xff] %v2079_v53 }
 0x2bb   : > { %3522 = vst [vmem:[%s6566_s26 + $0x910] sm:$0xff] %v2438_v61  ;;  %3521 = vst [vmem:[%s6566_s26 + $0x908] sm:$0xff] %v2081_v56  ;;  %v2084_v39 = vpop.f32.mrb[74].mxu0  ;;  %v8000_v56 = vld [vmem:[#allocation67_spill] sm:$0xff] }
 0x2bc   : > { %3523 = vst [vmem:[%s6566_s26 + $0x918] sm:$0xff] %v2440_v3  ;;  %v2443_v24 = vpop.f32.mrb[74].mxu1  ;;  %v2085_v54 = vadd.f32 %v2084_v39, %v6547_v23  ;;  %v2086_v36 = vpop.f32.mrb[75].mxu0  ;;  %2825 = vmatmul.mubr.f32.gmra.mrb[180].mxu0 %v7999_v27 }
 0x2bd   : > { %v2444_v18 = vadd.f32 %v2443_v24, %v6549_v20  ;;  %v2445_v51 = vpop.f32.mrb[75].mxu1  ;;  %3184 = vmatmul.mubr.f32.gmra.mrb[180].mxu1 %v7999_v27  ;;  %v2087_v11 = vadd.f32 %v2086_v36, %v6554_v46  ;;  %2830 = vmatprep.mubr.f32.mxu0 %v6423_v40  ;;  %v8001_v36 = vld [vmem:[#allocation68_spill] sm:$0xff] }
 0x2be   : > { %v2446_v35 = vadd.f32 %v2445_v51, %v6556_v43  ;;  %3189 = vmatprep.mubr.f32.mxu1 %v6423_v40  ;;  %3528 = vst [vmem:[%s6566_s26 + $0x940] sm:$0xff] %v2085_v54 }
 0x2bf   : > { %3530 = vst [vmem:[%s6566_s26 + $0x950] sm:$0xff] %v2444_v18  ;;  %3529 = vst [vmem:[%s6566_s26 + $0x948] sm:$0xff] %v2087_v11  ;;  %v2090_v32 = vpop.f32.mrb[76].mxu0 }
 0x2c0   : > { %3531 = vst [vmem:[%s6566_s26 + $0x958] sm:$0xff] %v2446_v35  ;;  %v2449_v63 = vpop.f32.mrb[76].mxu1  ;;  %v2091_v44 = vadd.f32 %v2090_v32, %v6547_v23  ;;  %v2092_v62 = vpop.f32.mrb[77].mxu0  ;;  %2831 = vmatmul.mubr.f32.gmra.mrb[182].mxu0 %v6431_v47 }
 0x2c1   : > { %v2450_v9 = vadd.f32 %v2449_v63, %v6549_v20  ;;  %v2451_v57 = vpop.f32.mrb[77].mxu1  ;;  %3190 = vmatmul.mubr.f32.gmra.mrb[182].mxu1 %v6431_v47  ;;  %v2093_v40 = vadd.f32 %v2092_v62, %v6554_v46  ;;  %2836 = vmatprep.mubr.f32.mxu0 %v6441_v49 }
 0x2c2   : > { %v2452_v1 = vadd.f32 %v2451_v57, %v6556_v43  ;;  %3195 = vmatprep.mubr.f32.mxu1 %v6441_v49  ;;  %3536 = vst [vmem:[%s6566_s26 + $0x980] sm:$0xff] %v2091_v44 }
 0x2c3   : > { %3538 = vst [vmem:[%s6566_s26 + $0x990] sm:$0xff] %v2450_v9  ;;  %3537 = vst [vmem:[%s6566_s26 + $0x988] sm:$0xff] %v2093_v40  ;;  %v2096_v42 = vpop.f32.mrb[78].mxu0 }
 0x2c4   : > { %3539 = vst [vmem:[%s6566_s26 + $0x998] sm:$0xff] %v2452_v1  ;;  %v2455_v31 = vpop.f32.mrb[78].mxu1  ;;  %v2097_v47 = vadd.f32 %v2096_v42, %v6547_v23  ;;  %v2098_v45 = vpop.f32.mrb[79].mxu0  ;;  %2837 = vmatmul.mubr.f32.gmra.mrb[184].mxu0 %v6451_v50 }
 0x2c5   : > { %v2456_v5 = vadd.f32 %v2455_v31, %v6549_v20  ;;  %v2457_v29 = vpop.f32.mrb[79].mxu1  ;;  %3196 = vmatmul.mubr.f32.gmra.mrb[184].mxu1 %v6451_v50  ;;  %v2099_v49 = vadd.f32 %v2098_v45, %v6554_v46  ;;  %2842 = vmatprep.mubr.f32.mxu0 %v6458_v52 }
 0x2c6   : > { %v2458_v17 = vadd.f32 %v2457_v29, %v6556_v43  ;;  %3201 = vmatprep.mubr.f32.mxu1 %v6458_v52  ;;  %3544 = vst [vmem:[%s6566_s26 + $0x9c0] sm:$0xff] %v2097_v47 }
 0x2c7   : > { %3546 = vst [vmem:[%s6566_s26 + $0x9d0] sm:$0xff] %v2456_v5  ;;  %3545 = vst [vmem:[%s6566_s26 + $0x9c8] sm:$0xff] %v2099_v49  ;;  %v2102_v22 = vpop.f32.mrb[80].mxu0 }
 0x2c8   : > { %3547 = vst [vmem:[%s6566_s26 + $0x9d8] sm:$0xff] %v2458_v17  ;;  %v2461_v60 = vpop.f32.mrb[80].mxu1  ;;  %v2103_v50 = vadd.f32 %v2102_v22, %v6547_v23  ;;  %v2104_v33 = vpop.f32.mrb[81].mxu0  ;;  %2843 = vmatmul.mubr.f32.gmra.mrb[186].mxu0 %v6465_v2  ;;  %v8002_v22 = vld [vmem:[#allocation16_spill] sm:$0xff] }
 0x2c9   : > { %v2462_v25 = vadd.f32 %v2461_v60, %v6549_v20  ;;  %v2463_v15 = vpop.f32.mrb[81].mxu1  ;;  %3202 = vmatmul.mubr.f32.gmra.mrb[186].mxu1 %v6465_v2  ;;  %v2105_v52 = vadd.f32 %v2104_v33, %v6554_v46  ;;  %2848 = vmatprep.mubr.f32.mxu0 %v6474_v38  ;;  %v1774_v60 = vsub.s32 4, %v8002_v22 }
 0x2ca   : > { %v2464_v21 = vadd.f32 %v2463_v15, %v6556_v43  ;;  %3207 = vmatprep.mubr.f32.mxu1 %v6474_v38  ;;  %3552 = vst [vmem:[%s6566_s26 + $0xa00] sm:$0xff] %v2103_v50  ;;  %v1782_v50 = vsub.s32 6, %v8002_v22 }
 0x2cb   : > { %3554 = vst [vmem:[%s6566_s26 + $0xa10] sm:$0xff] %v2462_v25  ;;  %3553 = vst [vmem:[%s6566_s26 + $0xa08] sm:$0xff] %v2105_v52  ;;  %v2108_v58 = vpop.f32.mrb[82].mxu0 }
 0x2cc   : > { %3555 = vst [vmem:[%s6566_s26 + $0xa18] sm:$0xff] %v2464_v21  ;;  %v2467_v55 = vpop.f32.mrb[82].mxu1  ;;  %v2109_v2 = vadd.f32 %v2108_v58, %v6547_v23  ;;  %v2110_v30 = vpop.f32.mrb[83].mxu0  ;;  %2849 = vmatmul.mubr.f32.gmra.mrb[188].mxu0 %v6483_v26  ;;  %v1778_v21 = vsub.s32 5, %v8002_v22  ;;  %v1786_v58 = vsub.s32 7, %v8002_v22 }
 0x2cd   : > { %v2468_v4 = vadd.f32 %v2467_v55, %v6549_v20  ;;  %v2469_v19 = vpop.f32.mrb[83].mxu1  ;;  %3208 = vmatmul.mubr.f32.gmra.mrb[188].mxu1 %v6483_v26  ;;  %v2111_v38 = vadd.f32 %v2110_v30, %v6554_v46  ;;  %2854 = vmatprep.mubr.f32.mxu0 %v6490_v7 }
 0x2ce   : > { %v2470_v41 = vadd.f32 %v2469_v19, %v6556_v43  ;;  %3213 = vmatprep.mubr.f32.mxu1 %v6490_v7  ;;  %3560 = vst [vmem:[%s6566_s26 + $0xa40] sm:$0xff] %v2109_v2 }
 0x2cf   : > { %3562 = vst [vmem:[%s6566_s26 + $0xa50] sm:$0xff] %v2468_v4  ;;  %3561 = vst [vmem:[%s6566_s26 + $0xa48] sm:$0xff] %v2111_v38  ;;  %v2114_v6 = vpop.f32.mrb[84].mxu0 }
 0x2d0   : > { %3563 = vst [vmem:[%s6566_s26 + $0xa58] sm:$0xff] %v2470_v41  ;;  %v2473_v59 = vpop.f32.mrb[84].mxu1  ;;  %v2115_v26 = vadd.f32 %v2114_v6, %v6547_v23  ;;  %v2116_v28 = vpop.f32.mrb[85].mxu0  ;;  %2855 = vmatmul.mubr.f32.gmra.mrb[190].mxu0 %v6497_v8 }
 0x2d1   : > { %v2474_v0 = vadd.f32 %v2473_v59, %v6549_v20  ;;  %v2475_v34 = vpop.f32.mrb[85].mxu1  ;;  %3214 = vmatmul.mubr.f32.gmra.mrb[190].mxu1 %v6497_v8  ;;  %v2117_v7 = vadd.f32 %v2116_v28, %v6554_v46  ;;  %2860 = vmatprep.mubr.f32.mxu0 %v6506_v14  ;;  %v4320_v59 = vld [vmem:[#allocation7] sm:$0xff] }
 0x2d2   : > { %v2476_v12 = vadd.f32 %v2475_v34, %v6556_v43  ;;  %3219 = vmatprep.mubr.f32.mxu1 %v6506_v14  ;;  %3568 = vst [vmem:[%s6566_s26 + $0xa80] sm:$0xff] %v2115_v26  ;;  %v7128_v26 = vrot.slane %v4320_v59, %v1774_v60 }
 0x2d3   : > { %3570 = vst [vmem:[%s6566_s26 + $0xa90] sm:$0xff] %v2474_v0  ;;  %3569 = vst [vmem:[%s6566_s26 + $0xa88] sm:$0xff] %v2117_v7  ;;  %v2120_v48 = vpop.f32.mrb[86].mxu0  ;;  %v7130_v0 = vrot.slane %v4320_v59, %v1782_v50  ;;  %v7134_v7 = vrot.slane %v4320_v59, %v1778_v21 }
 0x2d4   : > { %3571 = vst [vmem:[%s6566_s26 + $0xa98] sm:$0xff] %v2476_v12  ;;  %v2479_v53 = vpop.f32.mrb[86].mxu1  ;;  %v2121_v8 = vadd.f32 %v2120_v48, %v6547_v23  ;;  %v2122_v13 = vpop.f32.mrb[87].mxu0  ;;  %2861 = vmatmul.mubr.f32.gmra.mrb[192].mxu0 %v6511_v10  ;;  %v7136_v12 = vrot.slane %v4320_v59, %v1786_v58 }
 0x2d5   : > { %v2480_v61 = vadd.f32 %v2479_v53, %v6549_v20  ;;  %v2481_v16 = vpop.f32.mrb[87].mxu1  ;;  %3220 = vmatmul.mubr.f32.gmra.mrb[192].mxu1 %v6511_v10  ;;  %v2123_v14 = vadd.f32 %v2122_v13, %v6554_v46  ;;  %2866 = vmatprep.mubr.f32.mxu0 %v8000_v56 }
 0x2d6   : > { %v2482_v37 = vadd.f32 %v2481_v16, %v6556_v43  ;;  %3225 = vmatprep.mubr.f32.mxu1 %v8000_v56  ;;  %3576 = vst [vmem:[%s6566_s26 + $0xac0] sm:$0xff] %v2121_v8 }
 0x2d7   : > { %3578 = vst [vmem:[%s6566_s26 + $0xad0] sm:$0xff] %v2480_v61  ;;  %3577 = vst [vmem:[%s6566_s26 + $0xac8] sm:$0xff] %v2123_v14  ;;  %v2126_v3 = vpop.f32.mrb[88].mxu0 }
 0x2d8   : > { %3579 = vst [vmem:[%s6566_s26 + $0xad8] sm:$0xff] %v2482_v37  ;;  %v2485_v39 = vpop.f32.mrb[88].mxu1  ;;  %v2127_v10 = vadd.f32 %v2126_v3, %v6547_v23  ;;  %v2128_v54 = vpop.f32.mrb[89].mxu0  ;;  %2867 = vmatmul.mubr.f32.gmra.mrb[194].mxu0 %v8001_v36 }
 0x2d9   : > { %v2486_v24 = vadd.f32 %v2485_v39, %v6549_v20  ;;  %v2487_v18 = vpop.f32.mrb[89].mxu1  ;;  %3226 = vmatmul.mubr.f32.gmra.mrb[194].mxu1 %v8001_v36  ;;  %v2129_v51 = vadd.f32 %v2128_v54, %v6554_v46 }
 0x2da   : > { %v2488_v27 = vadd.f32 %v2487_v18, %v6556_v43  ;;  %3584 = vst [vmem:[%s6566_s26 + $0xb00] sm:$0xff] %v2127_v10 }
 0x2db   : > { %3586 = vst [vmem:[%s6566_s26 + $0xb10] sm:$0xff] %v2486_v24  ;;  %3585 = vst [vmem:[%s6566_s26 + $0xb08] sm:$0xff] %v2129_v51  ;;  %v2132_v11 = vpop.f32.mrb[90].mxu0 }
 0x2dc   : > { %3587 = vst [vmem:[%s6566_s26 + $0xb18] sm:$0xff] %v2488_v27  ;;  %v2491_v35 = vpop.f32.mrb[90].mxu1  ;;  %v2133_v32 = vadd.f32 %v2132_v11, %v6547_v23  ;;  %v2134_v44 = vpop.f32.mrb[91].mxu0 }
 0x2dd   : > { %v2492_v63 = vadd.f32 %v2491_v35, %v6549_v20  ;;  %v2493_v9 = vpop.f32.mrb[91].mxu1  ;;  %v2135_v62 = vadd.f32 %v2134_v44, %v6554_v46 }
 0x2de   : > { %v2494_v57 = vadd.f32 %v2493_v9, %v6556_v43  ;;  %3592 = vst [vmem:[%s6566_s26 + $0xb40] sm:$0xff] %v2133_v32 }
 0x2df   : > { %3594 = vst [vmem:[%s6566_s26 + $0xb50] sm:$0xff] %v2492_v63  ;;  %3593 = vst [vmem:[%s6566_s26 + $0xb48] sm:$0xff] %v2135_v62  ;;  %v2138_v40 = vpop.f32.mrb[92].mxu0 }
 0x2e0   : > { %3595 = vst [vmem:[%s6566_s26 + $0xb58] sm:$0xff] %v2494_v57  ;;  %v2497_v1 = vpop.f32.mrb[92].mxu1  ;;  %v2139_v42 = vadd.f32 %v2138_v40, %v6547_v23  ;;  %v2140_v47 = vpop.f32.mrb[93].mxu0 }
 0x2e1   : > { %v2498_v31 = vadd.f32 %v2497_v1, %v6549_v20  ;;  %v2499_v5 = vpop.f32.mrb[93].mxu1  ;;  %v2141_v45 = vadd.f32 %v2140_v47, %v6554_v46 }
 0x2e2   : > { %v2500_v29 = vadd.f32 %v2499_v5, %v6556_v43  ;;  %3600 = vst [vmem:[%s6566_s26 + $0xb80] sm:$0xff] %v2139_v42 }
 0x2e3   : > { %3602 = vst [vmem:[%s6566_s26 + $0xb90] sm:$0xff] %v2498_v31  ;;  %3601 = vst [vmem:[%s6566_s26 + $0xb88] sm:$0xff] %v2141_v45  ;;  %v2144_v49 = vpop.f32.mrb[94].mxu0 }
 0x2e4   : > { %3603 = vst [vmem:[%s6566_s26 + $0xb98] sm:$0xff] %v2500_v29  ;;  %v2503_v17 = vpop.f32.mrb[94].mxu1  ;;  %v2145_v25 = vadd.f32 %v2144_v49, %v6547_v23  ;;  %v2146_v15 = vpop.f32.mrb[95].mxu0 }
 0x2e5   : > { %v2504_v33 = vadd.f32 %v2503_v17, %v6549_v20  ;;  %v2505_v52 = vpop.f32.mrb[95].mxu1  ;;  %v2147_v55 = vadd.f32 %v2146_v15, %v6554_v46 }
 0x2e6   : > { %v2506_v2 = vadd.f32 %v2505_v52, %v6556_v43  ;;  %3608 = vst [vmem:[%s6566_s26 + $0xbc0] sm:$0xff] %v2145_v25 }
 0x2e7   : > { %3610 = vst [vmem:[%s6566_s26 + $0xbd0] sm:$0xff] %v2504_v33  ;;  %3609 = vst [vmem:[%s6566_s26 + $0xbc8] sm:$0xff] %v2147_v55  ;;  %v2150_v4 = vpop.f32.mrb[96].mxu0 }
 0x2e8   : > { %3611 = vst [vmem:[%s6566_s26 + $0xbd8] sm:$0xff] %v2506_v2  ;;  %v2509_v30 = vpop.f32.mrb[96].mxu1  ;;  %v2151_v19 = vadd.f32 %v2150_v4, %v6547_v23  ;;  %v2152_v41 = vpop.f32.mrb[97].mxu0 }
 0x2e9   : > { %v2510_v38 = vadd.f32 %v2509_v30, %v6549_v20  ;;  %v2511_v6 = vpop.f32.mrb[97].mxu1  ;;  %v2153_v28 = vadd.f32 %v2152_v41, %v6554_v46 }
 0x2ea   : > { %v2512_v34 = vadd.f32 %v2511_v6, %v6556_v43  ;;  %3616 = vst [vmem:[%s6566_s26 + $0xc00] sm:$0xff] %v2151_v19 }
 0x2eb   : > { %3618 = vst [vmem:[%s6566_s26 + $0xc10] sm:$0xff] %v2510_v38  ;;  %3617 = vst [vmem:[%s6566_s26 + $0xc08] sm:$0xff] %v2153_v28  ;;  %v2580_v23 = vpop.f32.mrb[98].mxu0 }
 0x2ec   : > { %3619 = vst [vmem:[%s6566_s26 + $0xc18] sm:$0xff] %v2512_v34  ;;  %v2939_v20 = vpop.f32.mrb[98].mxu1  ;;  %v2581_v48 = vadd.f32 %v2580_v23, %v7128_v26  ;;  %v2582_v53 = vpop.f32.mrb[99].mxu0 }
 0x2ed   : > { %v2940_v46 = vadd.f32 %v2939_v20, %v7130_v0  ;;  %v2941_v43 = vpop.f32.mrb[99].mxu1  ;;  %v2583_v8 = vadd.f32 %v2582_v53, %v7134_v7 }
 0x2ee   : > { %v2942_v61 = vadd.f32 %v2941_v43, %v7136_v12  ;;  %3236 = vst [vmem:[%s6566_s26 + $0x20] sm:$0xff] %v2581_v48 }
 0x2ef   : > { %3238 = vst [vmem:[%s6566_s26 + $0x30] sm:$0xff] %v2940_v46  ;;  %3237 = vst [vmem:[%s6566_s26 + $0x28] sm:$0xff] %v2583_v8  ;;  %v2586_v13 = vpop.f32.mrb[100].mxu0 }
 0x2f0   : > { %3239 = vst [vmem:[%s6566_s26 + $0x38] sm:$0xff] %v2942_v61  ;;  %v2945_v16 = vpop.f32.mrb[100].mxu1  ;;  %v2587_v14 = vadd.f32 %v2586_v13, %v7128_v26  ;;  %v2588_v56 = vpop.f32.mrb[101].mxu0 }
 0x2f1   : > { %v2946_v37 = vadd.f32 %v2945_v16, %v7130_v0  ;;  %v2947_v3 = vpop.f32.mrb[101].mxu1  ;;  %v2589_v39 = vadd.f32 %v2588_v56, %v7134_v7 }
 0x2f2   : > { %v2948_v10 = vadd.f32 %v2947_v3, %v7136_v12  ;;  %3244 = vst [vmem:[%s6566_s26 + $0x60] sm:$0xff] %v2587_v14 }
 0x2f3   : > { %3246 = vst [vmem:[%s6566_s26 + $0x70] sm:$0xff] %v2946_v37  ;;  %3245 = vst [vmem:[%s6566_s26 + $0x68] sm:$0xff] %v2589_v39  ;;  %v2592_v24 = vpop.f32.mrb[102].mxu0 }
 0x2f4   : > { %3247 = vst [vmem:[%s6566_s26 + $0x78] sm:$0xff] %v2948_v10  ;;  %v2951_v54 = vpop.f32.mrb[102].mxu1  ;;  %v2593_v18 = vadd.f32 %v2592_v24, %v7128_v26  ;;  %v2594_v51 = vpop.f32.mrb[103].mxu0 }
 0x2f5   : > { %v2952_v36 = vadd.f32 %v2951_v54, %v7130_v0  ;;  %v2953_v27 = vpop.f32.mrb[103].mxu1  ;;  %v2595_v11 = vadd.f32 %v2594_v51, %v7134_v7 }
 0x2f6   : > { %v2954_v35 = vadd.f32 %v2953_v27, %v7136_v12  ;;  %3252 = vst [vmem:[%s6566_s26 + $0xa0] sm:$0xff] %v2593_v18 }
 0x2f7   : > { %3254 = vst [vmem:[%s6566_s26 + $0xb0] sm:$0xff] %v2952_v36  ;;  %3253 = vst [vmem:[%s6566_s26 + $0xa8] sm:$0xff] %v2595_v11  ;;  %v2598_v32 = vpop.f32.mrb[104].mxu0 }
 0x2f8   : > { %3255 = vst [vmem:[%s6566_s26 + $0xb8] sm:$0xff] %v2954_v35  ;;  %v2957_v63 = vpop.f32.mrb[104].mxu1  ;;  %v2599_v44 = vadd.f32 %v2598_v32, %v7128_v26  ;;  %v2600_v62 = vpop.f32.mrb[105].mxu0 }
 0x2f9   : > { %v2958_v9 = vadd.f32 %v2957_v63, %v7130_v0  ;;  %v2959_v57 = vpop.f32.mrb[105].mxu1  ;;  %v2601_v40 = vadd.f32 %v2600_v62, %v7134_v7 }
 0x2fa   : > { %v2960_v1 = vadd.f32 %v2959_v57, %v7136_v12  ;;  %3260 = vst [vmem:[%s6566_s26 + $0xe0] sm:$0xff] %v2599_v44 }
 0x2fb   : > { %3262 = vst [vmem:[%s6566_s26 + $0xf0] sm:$0xff] %v2958_v9  ;;  %3261 = vst [vmem:[%s6566_s26 + $0xe8] sm:$0xff] %v2601_v40  ;;  %v2604_v42 = vpop.f32.mrb[106].mxu0 }
 0x2fc   : > { %3263 = vst [vmem:[%s6566_s26 + $0xf8] sm:$0xff] %v2960_v1  ;;  %v2963_v31 = vpop.f32.mrb[106].mxu1  ;;  %v2605_v47 = vadd.f32 %v2604_v42, %v7128_v26  ;;  %v2606_v45 = vpop.f32.mrb[107].mxu0 }
 0x2fd   : > { %v2964_v5 = vadd.f32 %v2963_v31, %v7130_v0  ;;  %v2965_v29 = vpop.f32.mrb[107].mxu1  ;;  %v2607_v49 = vadd.f32 %v2606_v45, %v7134_v7 }
 0x2fe   : > { %v2966_v17 = vadd.f32 %v2965_v29, %v7136_v12  ;;  %3268 = vst [vmem:[%s6566_s26 + $0x120] sm:$0xff] %v2605_v47 }
 0x2ff   : > { %3270 = vst [vmem:[%s6566_s26 + $0x130] sm:$0xff] %v2964_v5  ;;  %3269 = vst [vmem:[%s6566_s26 + $0x128] sm:$0xff] %v2607_v49  ;;  %v2610_v22 = vpop.f32.mrb[108].mxu0 }
 0x300   : > { %3271 = vst [vmem:[%s6566_s26 + $0x138] sm:$0xff] %v2966_v17  ;;  %v2969_v60 = vpop.f32.mrb[108].mxu1  ;;  %v2611_v50 = vadd.f32 %v2610_v22, %v7128_v26  ;;  %v2612_v33 = vpop.f32.mrb[109].mxu0 }
 0x301   : > { %v2970_v25 = vadd.f32 %v2969_v60, %v7130_v0  ;;  %v2971_v15 = vpop.f32.mrb[109].mxu1  ;;  %v2613_v52 = vadd.f32 %v2612_v33, %v7134_v7 }
 0x302   : > { %v2972_v21 = vadd.f32 %v2971_v15, %v7136_v12  ;;  %3276 = vst [vmem:[%s6566_s26 + $0x160] sm:$0xff] %v2611_v50 }
 0x303   : > { %3278 = vst [vmem:[%s6566_s26 + $0x170] sm:$0xff] %v2970_v25  ;;  %3277 = vst [vmem:[%s6566_s26 + $0x168] sm:$0xff] %v2613_v52  ;;  %v2616_v58 = vpop.f32.mrb[110].mxu0 }
 0x304   : > { %3279 = vst [vmem:[%s6566_s26 + $0x178] sm:$0xff] %v2972_v21  ;;  %v2975_v55 = vpop.f32.mrb[110].mxu1  ;;  %v2617_v2 = vadd.f32 %v2616_v58, %v7128_v26  ;;  %v2618_v30 = vpop.f32.mrb[111].mxu0 }
 0x305   : > { %v2976_v4 = vadd.f32 %v2975_v55, %v7130_v0  ;;  %v2977_v19 = vpop.f32.mrb[111].mxu1  ;;  %v2619_v38 = vadd.f32 %v2618_v30, %v7134_v7 }
 0x306   : > { %v2978_v41 = vadd.f32 %v2977_v19, %v7136_v12  ;;  %3284 = vst [vmem:[%s6566_s26 + $0x1a0] sm:$0xff] %v2617_v2 }
 0x307   : > { %3286 = vst [vmem:[%s6566_s26 + $0x1b0] sm:$0xff] %v2976_v4  ;;  %3285 = vst [vmem:[%s6566_s26 + $0x1a8] sm:$0xff] %v2619_v38  ;;  %v2622_v6 = vpop.f32.mrb[112].mxu0 }
 0x308   : > { %3287 = vst [vmem:[%s6566_s26 + $0x1b8] sm:$0xff] %v2978_v41  ;;  %v2981_v59 = vpop.f32.mrb[112].mxu1  ;;  %v2623_v28 = vadd.f32 %v2622_v6, %v7128_v26  ;;  %v2624_v23 = vpop.f32.mrb[113].mxu0 }
 0x309   : > { %v2982_v34 = vadd.f32 %v2981_v59, %v7130_v0  ;;  %v2983_v20 = vpop.f32.mrb[113].mxu1  ;;  %v2625_v48 = vadd.f32 %v2624_v23, %v7134_v7 }
 0x30a   : > { %v2984_v46 = vadd.f32 %v2983_v20, %v7136_v12  ;;  %3292 = vst [vmem:[%s6566_s26 + $0x1e0] sm:$0xff] %v2623_v28 }
 0x30b   : > { %3294 = vst [vmem:[%s6566_s26 + $0x1f0] sm:$0xff] %v2982_v34  ;;  %3293 = vst [vmem:[%s6566_s26 + $0x1e8] sm:$0xff] %v2625_v48  ;;  %v2628_v53 = vpop.f32.mrb[114].mxu0 }
 0x30c   : > { %3295 = vst [vmem:[%s6566_s26 + $0x1f8] sm:$0xff] %v2984_v46  ;;  %v2987_v43 = vpop.f32.mrb[114].mxu1  ;;  %v2629_v8 = vadd.f32 %v2628_v53, %v7128_v26  ;;  %v2630_v13 = vpop.f32.mrb[115].mxu0 }
 0x30d   : > { %v2988_v61 = vadd.f32 %v2987_v43, %v7130_v0  ;;  %v2989_v16 = vpop.f32.mrb[115].mxu1  ;;  %v2631_v14 = vadd.f32 %v2630_v13, %v7134_v7 }
 0x30e   : > { %v2990_v37 = vadd.f32 %v2989_v16, %v7136_v12  ;;  %3300 = vst [vmem:[%s6566_s26 + $0x220] sm:$0xff] %v2629_v8 }
 0x30f   : > { %3302 = vst [vmem:[%s6566_s26 + $0x230] sm:$0xff] %v2988_v61  ;;  %3301 = vst [vmem:[%s6566_s26 + $0x228] sm:$0xff] %v2631_v14  ;;  %v2634_v56 = vpop.f32.mrb[116].mxu0 }
 0x310   : > { %3303 = vst [vmem:[%s6566_s26 + $0x238] sm:$0xff] %v2990_v37  ;;  %v2993_v3 = vpop.f32.mrb[116].mxu1  ;;  %v2635_v39 = vadd.f32 %v2634_v56, %v7128_v26  ;;  %v2636_v24 = vpop.f32.mrb[117].mxu0 }
 0x311   : > { %v2994_v10 = vadd.f32 %v2993_v3, %v7130_v0  ;;  %v2995_v54 = vpop.f32.mrb[117].mxu1  ;;  %v2637_v18 = vadd.f32 %v2636_v24, %v7134_v7 }
 0x312   : > { %v2996_v36 = vadd.f32 %v2995_v54, %v7136_v12  ;;  %3308 = vst [vmem:[%s6566_s26 + $0x260] sm:$0xff] %v2635_v39 }
 0x313   : > { %3310 = vst [vmem:[%s6566_s26 + $0x270] sm:$0xff] %v2994_v10  ;;  %3309 = vst [vmem:[%s6566_s26 + $0x268] sm:$0xff] %v2637_v18  ;;  %v2640_v51 = vpop.f32.mrb[118].mxu0 }
 0x314   : > { %3311 = vst [vmem:[%s6566_s26 + $0x278] sm:$0xff] %v2996_v36  ;;  %v2999_v27 = vpop.f32.mrb[118].mxu1  ;;  %v2641_v11 = vadd.f32 %v2640_v51, %v7128_v26  ;;  %v2642_v32 = vpop.f32.mrb[119].mxu0 }
 0x315   : > { %v3000_v35 = vadd.f32 %v2999_v27, %v7130_v0  ;;  %v3001_v63 = vpop.f32.mrb[119].mxu1  ;;  %v2643_v44 = vadd.f32 %v2642_v32, %v7134_v7 }
 0x316   : > { %v3002_v9 = vadd.f32 %v3001_v63, %v7136_v12  ;;  %3316 = vst [vmem:[%s6566_s26 + $0x2a0] sm:$0xff] %v2641_v11 }
 0x317   : > { %3318 = vst [vmem:[%s6566_s26 + $0x2b0] sm:$0xff] %v3000_v35  ;;  %3317 = vst [vmem:[%s6566_s26 + $0x2a8] sm:$0xff] %v2643_v44  ;;  %v2646_v62 = vpop.f32.mrb[120].mxu0 }
 0x318   : > { %3319 = vst [vmem:[%s6566_s26 + $0x2b8] sm:$0xff] %v3002_v9  ;;  %v3005_v57 = vpop.f32.mrb[120].mxu1  ;;  %v2647_v40 = vadd.f32 %v2646_v62, %v7128_v26  ;;  %v2648_v42 = vpop.f32.mrb[121].mxu0 }
 0x319   : > { %v3006_v1 = vadd.f32 %v3005_v57, %v7130_v0  ;;  %v3007_v31 = vpop.f32.mrb[121].mxu1  ;;  %v2649_v47 = vadd.f32 %v2648_v42, %v7134_v7 }
 0x31a   : > { %v3008_v5 = vadd.f32 %v3007_v31, %v7136_v12  ;;  %3324 = vst [vmem:[%s6566_s26 + $0x2e0] sm:$0xff] %v2647_v40 }
 0x31b   : > { %3326 = vst [vmem:[%s6566_s26 + $0x2f0] sm:$0xff] %v3006_v1  ;;  %3325 = vst [vmem:[%s6566_s26 + $0x2e8] sm:$0xff] %v2649_v47  ;;  %v2652_v45 = vpop.f32.mrb[122].mxu0 }
 0x31c   : > { %3327 = vst [vmem:[%s6566_s26 + $0x2f8] sm:$0xff] %v3008_v5  ;;  %v3011_v29 = vpop.f32.mrb[122].mxu1  ;;  %v2653_v49 = vadd.f32 %v2652_v45, %v7128_v26  ;;  %v2654_v22 = vpop.f32.mrb[123].mxu0 }
 0x31d   : > { %v3012_v17 = vadd.f32 %v3011_v29, %v7130_v0  ;;  %v3013_v60 = vpop.f32.mrb[123].mxu1  ;;  %v2655_v50 = vadd.f32 %v2654_v22, %v7134_v7 }
 0x31e   : > { %v3014_v25 = vadd.f32 %v3013_v60, %v7136_v12  ;;  %3332 = vst [vmem:[%s6566_s26 + $0x320] sm:$0xff] %v2653_v49 }
 0x31f   : > { %3334 = vst [vmem:[%s6566_s26 + $0x330] sm:$0xff] %v3012_v17  ;;  %3333 = vst [vmem:[%s6566_s26 + $0x328] sm:$0xff] %v2655_v50  ;;  %v2658_v33 = vpop.f32.mrb[124].mxu0 }
 0x320   : > { %3335 = vst [vmem:[%s6566_s26 + $0x338] sm:$0xff] %v3014_v25  ;;  %v3017_v15 = vpop.f32.mrb[124].mxu1  ;;  %v2659_v52 = vadd.f32 %v2658_v33, %v7128_v26  ;;  %v2660_v58 = vpop.f32.mrb[125].mxu0 }
 0x321   : > { %v3018_v21 = vadd.f32 %v3017_v15, %v7130_v0  ;;  %v3019_v55 = vpop.f32.mrb[125].mxu1  ;;  %v2661_v2 = vadd.f32 %v2660_v58, %v7134_v7 }
 0x322   : > { %v3020_v4 = vadd.f32 %v3019_v55, %v7136_v12  ;;  %3340 = vst [vmem:[%s6566_s26 + $0x360] sm:$0xff] %v2659_v52 }
 0x323   : > { %3342 = vst [vmem:[%s6566_s26 + $0x370] sm:$0xff] %v3018_v21  ;;  %3341 = vst [vmem:[%s6566_s26 + $0x368] sm:$0xff] %v2661_v2  ;;  %v2664_v30 = vpop.f32.mrb[126].mxu0 }
 0x324   : > { %3343 = vst [vmem:[%s6566_s26 + $0x378] sm:$0xff] %v3020_v4  ;;  %v3023_v19 = vpop.f32.mrb[126].mxu1  ;;  %v2665_v38 = vadd.f32 %v2664_v30, %v7128_v26  ;;  %v2666_v6 = vpop.f32.mrb[127].mxu0 }
 0x325   : > { %v3024_v41 = vadd.f32 %v3023_v19, %v7130_v0  ;;  %v3025_v59 = vpop.f32.mrb[127].mxu1  ;;  %v2667_v28 = vadd.f32 %v2666_v6, %v7134_v7 }
 0x326   : > { %v3026_v34 = vadd.f32 %v3025_v59, %v7136_v12  ;;  %3348 = vst [vmem:[%s6566_s26 + $0x3a0] sm:$0xff] %v2665_v38 }
 0x327   : > { %3350 = vst [vmem:[%s6566_s26 + $0x3b0] sm:$0xff] %v3024_v41  ;;  %3349 = vst [vmem:[%s6566_s26 + $0x3a8] sm:$0xff] %v2667_v28  ;;  %v2670_v23 = vpop.f32.mrb[128].mxu0 }
 0x328   : > { %3351 = vst [vmem:[%s6566_s26 + $0x3b8] sm:$0xff] %v3026_v34  ;;  %v3029_v20 = vpop.f32.mrb[128].mxu1  ;;  %v2671_v48 = vadd.f32 %v2670_v23, %v7128_v26  ;;  %v2672_v53 = vpop.f32.mrb[129].mxu0 }
 0x329   : > { %v3030_v46 = vadd.f32 %v3029_v20, %v7130_v0  ;;  %v3031_v43 = vpop.f32.mrb[129].mxu1  ;;  %v2673_v8 = vadd.f32 %v2672_v53, %v7134_v7 }
 0x32a   : > { %v3032_v61 = vadd.f32 %v3031_v43, %v7136_v12  ;;  %3356 = vst [vmem:[%s6566_s26 + $0x3e0] sm:$0xff] %v2671_v48 }
 0x32b   : > { %3358 = vst [vmem:[%s6566_s26 + $0x3f0] sm:$0xff] %v3030_v46  ;;  %3357 = vst [vmem:[%s6566_s26 + $0x3e8] sm:$0xff] %v2673_v8  ;;  %v2676_v13 = vpop.f32.mrb[130].mxu0 }
 0x32c   : > { %3359 = vst [vmem:[%s6566_s26 + $0x3f8] sm:$0xff] %v3032_v61  ;;  %v3035_v16 = vpop.f32.mrb[130].mxu1  ;;  %v2677_v14 = vadd.f32 %v2676_v13, %v7128_v26  ;;  %v2678_v56 = vpop.f32.mrb[131].mxu0 }
 0x32d   : > { %v3036_v37 = vadd.f32 %v3035_v16, %v7130_v0  ;;  %v3037_v3 = vpop.f32.mrb[131].mxu1  ;;  %v2679_v39 = vadd.f32 %v2678_v56, %v7134_v7 }
 0x32e   : > { %v3038_v10 = vadd.f32 %v3037_v3, %v7136_v12  ;;  %3364 = vst [vmem:[%s6566_s26 + $0x420] sm:$0xff] %v2677_v14 }
 0x32f   : > { %3366 = vst [vmem:[%s6566_s26 + $0x430] sm:$0xff] %v3036_v37  ;;  %3365 = vst [vmem:[%s6566_s26 + $0x428] sm:$0xff] %v2679_v39  ;;  %v2682_v24 = vpop.f32.mrb[132].mxu0 }
 0x330   : > { %3367 = vst [vmem:[%s6566_s26 + $0x438] sm:$0xff] %v3038_v10  ;;  %v3041_v54 = vpop.f32.mrb[132].mxu1  ;;  %v2683_v18 = vadd.f32 %v2682_v24, %v7128_v26  ;;  %v2684_v51 = vpop.f32.mrb[133].mxu0 }
 0x331   : > { %v3042_v36 = vadd.f32 %v3041_v54, %v7130_v0  ;;  %v3043_v27 = vpop.f32.mrb[133].mxu1  ;;  %v2685_v11 = vadd.f32 %v2684_v51, %v7134_v7 }
 0x332   : > { %v3044_v35 = vadd.f32 %v3043_v27, %v7136_v12  ;;  %3372 = vst [vmem:[%s6566_s26 + $0x460] sm:$0xff] %v2683_v18 }
 0x333   : > { %3374 = vst [vmem:[%s6566_s26 + $0x470] sm:$0xff] %v3042_v36  ;;  %3373 = vst [vmem:[%s6566_s26 + $0x468] sm:$0xff] %v2685_v11  ;;  %v2688_v32 = vpop.f32.mrb[134].mxu0 }
 0x334   : > { %3375 = vst [vmem:[%s6566_s26 + $0x478] sm:$0xff] %v3044_v35  ;;  %v3047_v63 = vpop.f32.mrb[134].mxu1  ;;  %v2689_v44 = vadd.f32 %v2688_v32, %v7128_v26  ;;  %v2690_v62 = vpop.f32.mrb[135].mxu0 }
 0x335   : > { %v3048_v9 = vadd.f32 %v3047_v63, %v7130_v0  ;;  %v3049_v57 = vpop.f32.mrb[135].mxu1  ;;  %v2691_v40 = vadd.f32 %v2690_v62, %v7134_v7 }
 0x336   : > { %v3050_v1 = vadd.f32 %v3049_v57, %v7136_v12  ;;  %3380 = vst [vmem:[%s6566_s26 + $0x4a0] sm:$0xff] %v2689_v44 }
 0x337   : > { %3382 = vst [vmem:[%s6566_s26 + $0x4b0] sm:$0xff] %v3048_v9  ;;  %3381 = vst [vmem:[%s6566_s26 + $0x4a8] sm:$0xff] %v2691_v40  ;;  %v2694_v42 = vpop.f32.mrb[136].mxu0 }
 0x338   : > { %3383 = vst [vmem:[%s6566_s26 + $0x4b8] sm:$0xff] %v3050_v1  ;;  %v3053_v31 = vpop.f32.mrb[136].mxu1  ;;  %v2695_v47 = vadd.f32 %v2694_v42, %v7128_v26  ;;  %v2696_v45 = vpop.f32.mrb[137].mxu0 }
 0x339   : > { %v3054_v5 = vadd.f32 %v3053_v31, %v7130_v0  ;;  %v3055_v29 = vpop.f32.mrb[137].mxu1  ;;  %v2697_v49 = vadd.f32 %v2696_v45, %v7134_v7 }
 0x33a   : > { %v3056_v17 = vadd.f32 %v3055_v29, %v7136_v12  ;;  %3388 = vst [vmem:[%s6566_s26 + $0x4e0] sm:$0xff] %v2695_v47 }
 0x33b   : > { %3390 = vst [vmem:[%s6566_s26 + $0x4f0] sm:$0xff] %v3054_v5  ;;  %3389 = vst [vmem:[%s6566_s26 + $0x4e8] sm:$0xff] %v2697_v49  ;;  %v2700_v22 = vpop.f32.mrb[138].mxu0 }
 0x33c   : > { %3391 = vst [vmem:[%s6566_s26 + $0x4f8] sm:$0xff] %v3056_v17  ;;  %v3059_v60 = vpop.f32.mrb[138].mxu1  ;;  %v2701_v50 = vadd.f32 %v2700_v22, %v7128_v26  ;;  %v2702_v33 = vpop.f32.mrb[139].mxu0 }
 0x33d   : > { %v3060_v25 = vadd.f32 %v3059_v60, %v7130_v0  ;;  %v3061_v15 = vpop.f32.mrb[139].mxu1  ;;  %v2703_v52 = vadd.f32 %v2702_v33, %v7134_v7 }
 0x33e   : > { %v3062_v21 = vadd.f32 %v3061_v15, %v7136_v12  ;;  %3396 = vst [vmem:[%s6566_s26 + $0x520] sm:$0xff] %v2701_v50 }
 0x33f   : > { %3398 = vst [vmem:[%s6566_s26 + $0x530] sm:$0xff] %v3060_v25  ;;  %3397 = vst [vmem:[%s6566_s26 + $0x528] sm:$0xff] %v2703_v52  ;;  %v2706_v58 = vpop.f32.mrb[140].mxu0 }
 0x340   : > { %3399 = vst [vmem:[%s6566_s26 + $0x538] sm:$0xff] %v3062_v21  ;;  %v3065_v55 = vpop.f32.mrb[140].mxu1  ;;  %v2707_v2 = vadd.f32 %v2706_v58, %v7128_v26  ;;  %v2708_v30 = vpop.f32.mrb[141].mxu0 }
 0x341   : > { %v3066_v4 = vadd.f32 %v3065_v55, %v7130_v0  ;;  %v3067_v19 = vpop.f32.mrb[141].mxu1  ;;  %v2709_v38 = vadd.f32 %v2708_v30, %v7134_v7 }
 0x342   : > { %v3068_v41 = vadd.f32 %v3067_v19, %v7136_v12  ;;  %3404 = vst [vmem:[%s6566_s26 + $0x560] sm:$0xff] %v2707_v2 }
 0x343   : > { %3406 = vst [vmem:[%s6566_s26 + $0x570] sm:$0xff] %v3066_v4  ;;  %3405 = vst [vmem:[%s6566_s26 + $0x568] sm:$0xff] %v2709_v38  ;;  %v2712_v6 = vpop.f32.mrb[142].mxu0 }
 0x344   : > { %3407 = vst [vmem:[%s6566_s26 + $0x578] sm:$0xff] %v3068_v41  ;;  %v3071_v59 = vpop.f32.mrb[142].mxu1  ;;  %v2713_v28 = vadd.f32 %v2712_v6, %v7128_v26  ;;  %v2714_v23 = vpop.f32.mrb[143].mxu0 }
 0x345   : > { %v3072_v34 = vadd.f32 %v3071_v59, %v7130_v0  ;;  %v3073_v20 = vpop.f32.mrb[143].mxu1  ;;  %v2715_v48 = vadd.f32 %v2714_v23, %v7134_v7 }
 0x346   : > { %v3074_v46 = vadd.f32 %v3073_v20, %v7136_v12  ;;  %3412 = vst [vmem:[%s6566_s26 + $0x5a0] sm:$0xff] %v2713_v28 }
 0x347   : > { %3414 = vst [vmem:[%s6566_s26 + $0x5b0] sm:$0xff] %v3072_v34  ;;  %3413 = vst [vmem:[%s6566_s26 + $0x5a8] sm:$0xff] %v2715_v48  ;;  %v2718_v53 = vpop.f32.mrb[144].mxu0 }
 0x348   : > { %3415 = vst [vmem:[%s6566_s26 + $0x5b8] sm:$0xff] %v3074_v46  ;;  %v3077_v43 = vpop.f32.mrb[144].mxu1  ;;  %v2719_v8 = vadd.f32 %v2718_v53, %v7128_v26  ;;  %v2720_v13 = vpop.f32.mrb[145].mxu0 }
 0x349   : > { %v3078_v61 = vadd.f32 %v3077_v43, %v7130_v0  ;;  %v3079_v16 = vpop.f32.mrb[145].mxu1  ;;  %v2721_v14 = vadd.f32 %v2720_v13, %v7134_v7 }
 0x34a   : > { %v3080_v37 = vadd.f32 %v3079_v16, %v7136_v12  ;;  %3420 = vst [vmem:[%s6566_s26 + $0x5e0] sm:$0xff] %v2719_v8 }
 0x34b   : > { %3422 = vst [vmem:[%s6566_s26 + $0x5f0] sm:$0xff] %v3078_v61  ;;  %3421 = vst [vmem:[%s6566_s26 + $0x5e8] sm:$0xff] %v2721_v14  ;;  %v2724_v56 = vpop.f32.mrb[146].mxu0 }
 0x34c   : > { %3423 = vst [vmem:[%s6566_s26 + $0x5f8] sm:$0xff] %v3080_v37  ;;  %v3083_v3 = vpop.f32.mrb[146].mxu1  ;;  %v2725_v39 = vadd.f32 %v2724_v56, %v7128_v26  ;;  %v2726_v24 = vpop.f32.mrb[147].mxu0 }
 0x34d   : > { %v3084_v10 = vadd.f32 %v3083_v3, %v7130_v0  ;;  %v3085_v54 = vpop.f32.mrb[147].mxu1  ;;  %v2727_v18 = vadd.f32 %v2726_v24, %v7134_v7 }
 0x34e   : > { %v3086_v36 = vadd.f32 %v3085_v54, %v7136_v12  ;;  %3428 = vst [vmem:[%s6566_s26 + $0x620] sm:$0xff] %v2725_v39 }
 0x34f   : > { %3430 = vst [vmem:[%s6566_s26 + $0x630] sm:$0xff] %v3084_v10  ;;  %3429 = vst [vmem:[%s6566_s26 + $0x628] sm:$0xff] %v2727_v18  ;;  %v2730_v51 = vpop.f32.mrb[148].mxu0 }
 0x350   : > { %3431 = vst [vmem:[%s6566_s26 + $0x638] sm:$0xff] %v3086_v36  ;;  %v3089_v27 = vpop.f32.mrb[148].mxu1  ;;  %v2731_v11 = vadd.f32 %v2730_v51, %v7128_v26  ;;  %v2732_v32 = vpop.f32.mrb[149].mxu0 }
 0x351   : > { %v3090_v35 = vadd.f32 %v3089_v27, %v7130_v0  ;;  %v3091_v63 = vpop.f32.mrb[149].mxu1  ;;  %v2733_v44 = vadd.f32 %v2732_v32, %v7134_v7 }
 0x352   : > { %v3092_v9 = vadd.f32 %v3091_v63, %v7136_v12  ;;  %3436 = vst [vmem:[%s6566_s26 + $0x660] sm:$0xff] %v2731_v11 }
 0x353   : > { %3438 = vst [vmem:[%s6566_s26 + $0x670] sm:$0xff] %v3090_v35  ;;  %3437 = vst [vmem:[%s6566_s26 + $0x668] sm:$0xff] %v2733_v44  ;;  %v2736_v62 = vpop.f32.mrb[150].mxu0 }
 0x354   : > { %3439 = vst [vmem:[%s6566_s26 + $0x678] sm:$0xff] %v3092_v9  ;;  %v3095_v57 = vpop.f32.mrb[150].mxu1  ;;  %v2737_v40 = vadd.f32 %v2736_v62, %v7128_v26  ;;  %v2738_v42 = vpop.f32.mrb[151].mxu0 }
 0x355   : > { %v3096_v1 = vadd.f32 %v3095_v57, %v7130_v0  ;;  %v3097_v31 = vpop.f32.mrb[151].mxu1  ;;  %v2739_v47 = vadd.f32 %v2738_v42, %v7134_v7 }
 0x356   : > { %v3098_v5 = vadd.f32 %v3097_v31, %v7136_v12  ;;  %3444 = vst [vmem:[%s6566_s26 + $0x6a0] sm:$0xff] %v2737_v40 }
 0x357   : > { %3446 = vst [vmem:[%s6566_s26 + $0x6b0] sm:$0xff] %v3096_v1  ;;  %3445 = vst [vmem:[%s6566_s26 + $0x6a8] sm:$0xff] %v2739_v47  ;;  %v2742_v45 = vpop.f32.mrb[152].mxu0 }
 0x358   : > { %3447 = vst [vmem:[%s6566_s26 + $0x6b8] sm:$0xff] %v3098_v5  ;;  %v3101_v29 = vpop.f32.mrb[152].mxu1  ;;  %v2743_v49 = vadd.f32 %v2742_v45, %v7128_v26  ;;  %v2744_v22 = vpop.f32.mrb[153].mxu0 }
 0x359   : > { %v3102_v17 = vadd.f32 %v3101_v29, %v7130_v0  ;;  %v3103_v60 = vpop.f32.mrb[153].mxu1  ;;  %v2745_v50 = vadd.f32 %v2744_v22, %v7134_v7 }
 0x35a   : > { %v3104_v25 = vadd.f32 %v3103_v60, %v7136_v12  ;;  %3452 = vst [vmem:[%s6566_s26 + $0x6e0] sm:$0xff] %v2743_v49 }
 0x35b   : > { %3454 = vst [vmem:[%s6566_s26 + $0x6f0] sm:$0xff] %v3102_v17  ;;  %3453 = vst [vmem:[%s6566_s26 + $0x6e8] sm:$0xff] %v2745_v50  ;;  %v2748_v33 = vpop.f32.mrb[154].mxu0 }
 0x35c   : > { %3455 = vst [vmem:[%s6566_s26 + $0x6f8] sm:$0xff] %v3104_v25  ;;  %v3107_v15 = vpop.f32.mrb[154].mxu1  ;;  %v2749_v52 = vadd.f32 %v2748_v33, %v7128_v26  ;;  %v2750_v58 = vpop.f32.mrb[155].mxu0 }
 0x35d   : > { %v3108_v21 = vadd.f32 %v3107_v15, %v7130_v0  ;;  %v3109_v55 = vpop.f32.mrb[155].mxu1  ;;  %v2751_v2 = vadd.f32 %v2750_v58, %v7134_v7 }
 0x35e   : > { %v3110_v4 = vadd.f32 %v3109_v55, %v7136_v12  ;;  %3460 = vst [vmem:[%s6566_s26 + $0x720] sm:$0xff] %v2749_v52 }
 0x35f   : > { %3462 = vst [vmem:[%s6566_s26 + $0x730] sm:$0xff] %v3108_v21  ;;  %3461 = vst [vmem:[%s6566_s26 + $0x728] sm:$0xff] %v2751_v2  ;;  %v2754_v30 = vpop.f32.mrb[156].mxu0 }
 0x360   : > { %3463 = vst [vmem:[%s6566_s26 + $0x738] sm:$0xff] %v3110_v4  ;;  %v3113_v19 = vpop.f32.mrb[156].mxu1  ;;  %v2755_v38 = vadd.f32 %v2754_v30, %v7128_v26  ;;  %v2756_v6 = vpop.f32.mrb[157].mxu0 }
 0x361   : > { %v3114_v41 = vadd.f32 %v3113_v19, %v7130_v0  ;;  %v3115_v59 = vpop.f32.mrb[157].mxu1  ;;  %v2757_v28 = vadd.f32 %v2756_v6, %v7134_v7 }
 0x362   : > { %v3116_v34 = vadd.f32 %v3115_v59, %v7136_v12  ;;  %3468 = vst [vmem:[%s6566_s26 + $0x760] sm:$0xff] %v2755_v38 }
 0x363   : > { %3470 = vst [vmem:[%s6566_s26 + $0x770] sm:$0xff] %v3114_v41  ;;  %3469 = vst [vmem:[%s6566_s26 + $0x768] sm:$0xff] %v2757_v28  ;;  %v2760_v23 = vpop.f32.mrb[158].mxu0 }
 0x364   : > { %3471 = vst [vmem:[%s6566_s26 + $0x778] sm:$0xff] %v3116_v34  ;;  %v3119_v20 = vpop.f32.mrb[158].mxu1  ;;  %v2761_v48 = vadd.f32 %v2760_v23, %v7128_v26  ;;  %v2762_v53 = vpop.f32.mrb[159].mxu0 }
 0x365   : > { %v3120_v46 = vadd.f32 %v3119_v20, %v7130_v0  ;;  %v3121_v43 = vpop.f32.mrb[159].mxu1  ;;  %v2763_v8 = vadd.f32 %v2762_v53, %v7134_v7 }
 0x366   : > { %v3122_v61 = vadd.f32 %v3121_v43, %v7136_v12  ;;  %3476 = vst [vmem:[%s6566_s26 + $0x7a0] sm:$0xff] %v2761_v48 }
 0x367   : > { %3478 = vst [vmem:[%s6566_s26 + $0x7b0] sm:$0xff] %v3120_v46  ;;  %3477 = vst [vmem:[%s6566_s26 + $0x7a8] sm:$0xff] %v2763_v8  ;;  %v2766_v13 = vpop.f32.mrb[160].mxu0 }
 0x368   : > { %3479 = vst [vmem:[%s6566_s26 + $0x7b8] sm:$0xff] %v3122_v61  ;;  %v3125_v16 = vpop.f32.mrb[160].mxu1  ;;  %v2767_v14 = vadd.f32 %v2766_v13, %v7128_v26  ;;  %v2768_v56 = vpop.f32.mrb[161].mxu0 }
 0x369   : > { %v3126_v37 = vadd.f32 %v3125_v16, %v7130_v0  ;;  %v3127_v3 = vpop.f32.mrb[161].mxu1  ;;  %v2769_v39 = vadd.f32 %v2768_v56, %v7134_v7 }
 0x36a   : > { %v3128_v10 = vadd.f32 %v3127_v3, %v7136_v12  ;;  %3484 = vst [vmem:[%s6566_s26 + $0x7e0] sm:$0xff] %v2767_v14 }
 0x36b   : > { %3486 = vst [vmem:[%s6566_s26 + $0x7f0] sm:$0xff] %v3126_v37  ;;  %3485 = vst [vmem:[%s6566_s26 + $0x7e8] sm:$0xff] %v2769_v39  ;;  %v2772_v24 = vpop.f32.mrb[162].mxu0 }
 0x36c   : > { %3487 = vst [vmem:[%s6566_s26 + $0x7f8] sm:$0xff] %v3128_v10  ;;  %v3131_v54 = vpop.f32.mrb[162].mxu1  ;;  %v2773_v18 = vadd.f32 %v2772_v24, %v7128_v26  ;;  %v2774_v51 = vpop.f32.mrb[163].mxu0 }
 0x36d   : > { %v3132_v36 = vadd.f32 %v3131_v54, %v7130_v0  ;;  %v3133_v27 = vpop.f32.mrb[163].mxu1  ;;  %v2775_v11 = vadd.f32 %v2774_v51, %v7134_v7 }
 0x36e   : > { %v3134_v35 = vadd.f32 %v3133_v27, %v7136_v12  ;;  %3492 = vst [vmem:[%s6566_s26 + $0x820] sm:$0xff] %v2773_v18 }
 0x36f   : > { %3494 = vst [vmem:[%s6566_s26 + $0x830] sm:$0xff] %v3132_v36  ;;  %3493 = vst [vmem:[%s6566_s26 + $0x828] sm:$0xff] %v2775_v11  ;;  %v2778_v32 = vpop.f32.mrb[164].mxu0 }
 0x370   : > { %3495 = vst [vmem:[%s6566_s26 + $0x838] sm:$0xff] %v3134_v35  ;;  %v3137_v63 = vpop.f32.mrb[164].mxu1  ;;  %v2779_v44 = vadd.f32 %v2778_v32, %v7128_v26  ;;  %v2780_v62 = vpop.f32.mrb[165].mxu0 }
 0x371   : > { %v3138_v9 = vadd.f32 %v3137_v63, %v7130_v0  ;;  %v3139_v57 = vpop.f32.mrb[165].mxu1  ;;  %v2781_v40 = vadd.f32 %v2780_v62, %v7134_v7 }
 0x372   : > { %v3140_v1 = vadd.f32 %v3139_v57, %v7136_v12  ;;  %3500 = vst [vmem:[%s6566_s26 + $0x860] sm:$0xff] %v2779_v44 }
 0x373   : > { %3502 = vst [vmem:[%s6566_s26 + $0x870] sm:$0xff] %v3138_v9  ;;  %3501 = vst [vmem:[%s6566_s26 + $0x868] sm:$0xff] %v2781_v40  ;;  %v2784_v42 = vpop.f32.mrb[166].mxu0 }
 0x374   : > { %3503 = vst [vmem:[%s6566_s26 + $0x878] sm:$0xff] %v3140_v1  ;;  %v3143_v31 = vpop.f32.mrb[166].mxu1  ;;  %v2785_v47 = vadd.f32 %v2784_v42, %v7128_v26  ;;  %v2786_v45 = vpop.f32.mrb[167].mxu0 }
 0x375   : > { %v3144_v5 = vadd.f32 %v3143_v31, %v7130_v0  ;;  %v3145_v29 = vpop.f32.mrb[167].mxu1  ;;  %v2787_v49 = vadd.f32 %v2786_v45, %v7134_v7 }
 0x376   : > { %v3146_v17 = vadd.f32 %v3145_v29, %v7136_v12  ;;  %3508 = vst [vmem:[%s6566_s26 + $0x8a0] sm:$0xff] %v2785_v47 }
 0x377   : > { %3510 = vst [vmem:[%s6566_s26 + $0x8b0] sm:$0xff] %v3144_v5  ;;  %3509 = vst [vmem:[%s6566_s26 + $0x8a8] sm:$0xff] %v2787_v49  ;;  %v2790_v22 = vpop.f32.mrb[168].mxu0 }
 0x378   : > { %3511 = vst [vmem:[%s6566_s26 + $0x8b8] sm:$0xff] %v3146_v17  ;;  %v3149_v60 = vpop.f32.mrb[168].mxu1  ;;  %v2791_v50 = vadd.f32 %v2790_v22, %v7128_v26  ;;  %v2792_v33 = vpop.f32.mrb[169].mxu0 }
 0x379   : > { %v3150_v25 = vadd.f32 %v3149_v60, %v7130_v0  ;;  %v3151_v15 = vpop.f32.mrb[169].mxu1  ;;  %v2793_v52 = vadd.f32 %v2792_v33, %v7134_v7 }
 0x37a   : > { %v3152_v21 = vadd.f32 %v3151_v15, %v7136_v12  ;;  %3516 = vst [vmem:[%s6566_s26 + $0x8e0] sm:$0xff] %v2791_v50 }
 0x37b   : > { %3518 = vst [vmem:[%s6566_s26 + $0x8f0] sm:$0xff] %v3150_v25  ;;  %3517 = vst [vmem:[%s6566_s26 + $0x8e8] sm:$0xff] %v2793_v52  ;;  %v2796_v58 = vpop.f32.mrb[170].mxu0 }
 0x37c   : > { %3519 = vst [vmem:[%s6566_s26 + $0x8f8] sm:$0xff] %v3152_v21  ;;  %v3155_v55 = vpop.f32.mrb[170].mxu1  ;;  %v2797_v2 = vadd.f32 %v2796_v58, %v7128_v26  ;;  %v2798_v30 = vpop.f32.mrb[171].mxu0 }
 0x37d   : > { %v3156_v4 = vadd.f32 %v3155_v55, %v7130_v0  ;;  %v3157_v19 = vpop.f32.mrb[171].mxu1  ;;  %v2799_v38 = vadd.f32 %v2798_v30, %v7134_v7 }
 0x37e   : > { %v3158_v41 = vadd.f32 %v3157_v19, %v7136_v12  ;;  %3524 = vst [vmem:[%s6566_s26 + $0x920] sm:$0xff] %v2797_v2 }
 0x37f   : > { %3526 = vst [vmem:[%s6566_s26 + $0x930] sm:$0xff] %v3156_v4  ;;  %3525 = vst [vmem:[%s6566_s26 + $0x928] sm:$0xff] %v2799_v38  ;;  %v2802_v6 = vpop.f32.mrb[172].mxu0 }
 0x380   : > { %3527 = vst [vmem:[%s6566_s26 + $0x938] sm:$0xff] %v3158_v41  ;;  %v3161_v59 = vpop.f32.mrb[172].mxu1  ;;  %v2803_v28 = vadd.f32 %v2802_v6, %v7128_v26  ;;  %v2804_v23 = vpop.f32.mrb[173].mxu0 }
 0x381   : > { %v3162_v34 = vadd.f32 %v3161_v59, %v7130_v0  ;;  %v3163_v20 = vpop.f32.mrb[173].mxu1  ;;  %v2805_v48 = vadd.f32 %v2804_v23, %v7134_v7 }
 0x382   : > { %v3164_v46 = vadd.f32 %v3163_v20, %v7136_v12  ;;  %3532 = vst [vmem:[%s6566_s26 + $0x960] sm:$0xff] %v2803_v28 }
 0x383   : > { %3534 = vst [vmem:[%s6566_s26 + $0x970] sm:$0xff] %v3162_v34  ;;  %3533 = vst [vmem:[%s6566_s26 + $0x968] sm:$0xff] %v2805_v48  ;;  %v2808_v53 = vpop.f32.mrb[174].mxu0 }
 0x384   : > { %3535 = vst [vmem:[%s6566_s26 + $0x978] sm:$0xff] %v3164_v46  ;;  %v3167_v43 = vpop.f32.mrb[174].mxu1  ;;  %v2809_v8 = vadd.f32 %v2808_v53, %v7128_v26  ;;  %v2810_v13 = vpop.f32.mrb[175].mxu0 }
 0x385   : > { %v3168_v61 = vadd.f32 %v3167_v43, %v7130_v0  ;;  %v3169_v16 = vpop.f32.mrb[175].mxu1  ;;  %v2811_v14 = vadd.f32 %v2810_v13, %v7134_v7 }
 0x386   : > { %v3170_v37 = vadd.f32 %v3169_v16, %v7136_v12  ;;  %3540 = vst [vmem:[%s6566_s26 + $0x9a0] sm:$0xff] %v2809_v8 }
 0x387   : > { %3542 = vst [vmem:[%s6566_s26 + $0x9b0] sm:$0xff] %v3168_v61  ;;  %3541 = vst [vmem:[%s6566_s26 + $0x9a8] sm:$0xff] %v2811_v14  ;;  %v2814_v56 = vpop.f32.mrb[176].mxu0 }
 0x388   : > { %3543 = vst [vmem:[%s6566_s26 + $0x9b8] sm:$0xff] %v3170_v37  ;;  %v3173_v3 = vpop.f32.mrb[176].mxu1  ;;  %v2815_v39 = vadd.f32 %v2814_v56, %v7128_v26  ;;  %v2816_v24 = vpop.f32.mrb[177].mxu0 }
 0x389   : > { %v3174_v10 = vadd.f32 %v3173_v3, %v7130_v0  ;;  %v3175_v54 = vpop.f32.mrb[177].mxu1  ;;  %v2817_v18 = vadd.f32 %v2816_v24, %v7134_v7 }
 0x38a   : > { %v3176_v36 = vadd.f32 %v3175_v54, %v7136_v12  ;;  %3548 = vst [vmem:[%s6566_s26 + $0x9e0] sm:$0xff] %v2815_v39 }
 0x38b   : > { %3550 = vst [vmem:[%s6566_s26 + $0x9f0] sm:$0xff] %v3174_v10  ;;  %3549 = vst [vmem:[%s6566_s26 + $0x9e8] sm:$0xff] %v2817_v18  ;;  %v2820_v51 = vpop.f32.mrb[178].mxu0 }
 0x38c   : > { %3551 = vst [vmem:[%s6566_s26 + $0x9f8] sm:$0xff] %v3176_v36  ;;  %v3179_v27 = vpop.f32.mrb[178].mxu1  ;;  %v2821_v11 = vadd.f32 %v2820_v51, %v7128_v26  ;;  %v2822_v32 = vpop.f32.mrb[179].mxu0 }
 0x38d   : > { %v3180_v35 = vadd.f32 %v3179_v27, %v7130_v0  ;;  %v3181_v63 = vpop.f32.mrb[179].mxu1  ;;  %v2823_v44 = vadd.f32 %v2822_v32, %v7134_v7 }
 0x38e   : > { %v3182_v9 = vadd.f32 %v3181_v63, %v7136_v12  ;;  %3556 = vst [vmem:[%s6566_s26 + $0xa20] sm:$0xff] %v2821_v11 }
 0x38f   : > { %3558 = vst [vmem:[%s6566_s26 + $0xa30] sm:$0xff] %v3180_v35  ;;  %3557 = vst [vmem:[%s6566_s26 + $0xa28] sm:$0xff] %v2823_v44  ;;  %v2826_v62 = vpop.f32.mrb[180].mxu0 }
 0x390   : > { %3559 = vst [vmem:[%s6566_s26 + $0xa38] sm:$0xff] %v3182_v9  ;;  %v3185_v57 = vpop.f32.mrb[180].mxu1  ;;  %v2827_v40 = vadd.f32 %v2826_v62, %v7128_v26  ;;  %v2828_v42 = vpop.f32.mrb[181].mxu0 }
 0x391   : > { %v3186_v1 = vadd.f32 %v3185_v57, %v7130_v0  ;;  %v3187_v31 = vpop.f32.mrb[181].mxu1  ;;  %v2829_v47 = vadd.f32 %v2828_v42, %v7134_v7 }
 0x392   : > { %v3188_v5 = vadd.f32 %v3187_v31, %v7136_v12  ;;  %3564 = vst [vmem:[%s6566_s26 + $0xa60] sm:$0xff] %v2827_v40 }
 0x393   : > { %3566 = vst [vmem:[%s6566_s26 + $0xa70] sm:$0xff] %v3186_v1  ;;  %3565 = vst [vmem:[%s6566_s26 + $0xa68] sm:$0xff] %v2829_v47  ;;  %v2832_v45 = vpop.f32.mrb[182].mxu0 }
 0x394   : > { %3567 = vst [vmem:[%s6566_s26 + $0xa78] sm:$0xff] %v3188_v5  ;;  %v3191_v29 = vpop.f32.mrb[182].mxu1  ;;  %v2833_v49 = vadd.f32 %v2832_v45, %v7128_v26  ;;  %v2834_v22 = vpop.f32.mrb[183].mxu0 }
 0x395   : > { %v3192_v17 = vadd.f32 %v3191_v29, %v7130_v0  ;;  %v3193_v60 = vpop.f32.mrb[183].mxu1  ;;  %v2835_v50 = vadd.f32 %v2834_v22, %v7134_v7 }
 0x396   : > { %v3194_v25 = vadd.f32 %v3193_v60, %v7136_v12  ;;  %3572 = vst [vmem:[%s6566_s26 + $0xaa0] sm:$0xff] %v2833_v49 }
 0x397   : > { %3574 = vst [vmem:[%s6566_s26 + $0xab0] sm:$0xff] %v3192_v17  ;;  %3573 = vst [vmem:[%s6566_s26 + $0xaa8] sm:$0xff] %v2835_v50  ;;  %v2838_v33 = vpop.f32.mrb[184].mxu0 }
 0x398   : > { %3575 = vst [vmem:[%s6566_s26 + $0xab8] sm:$0xff] %v3194_v25  ;;  %v3197_v15 = vpop.f32.mrb[184].mxu1  ;;  %v2839_v52 = vadd.f32 %v2838_v33, %v7128_v26  ;;  %v2840_v58 = vpop.f32.mrb[185].mxu0 }
 0x399   : > { %v3198_v21 = vadd.f32 %v3197_v15, %v7130_v0  ;;  %v3199_v55 = vpop.f32.mrb[185].mxu1  ;;  %v2841_v2 = vadd.f32 %v2840_v58, %v7134_v7 }
 0x39a   : > { %v3200_v4 = vadd.f32 %v3199_v55, %v7136_v12  ;;  %3580 = vst [vmem:[%s6566_s26 + $0xae0] sm:$0xff] %v2839_v52 }
 0x39b   : > { %3582 = vst [vmem:[%s6566_s26 + $0xaf0] sm:$0xff] %v3198_v21  ;;  %3581 = vst [vmem:[%s6566_s26 + $0xae8] sm:$0xff] %v2841_v2  ;;  %v2844_v30 = vpop.f32.mrb[186].mxu0 }
 0x39c   : > { %3583 = vst [vmem:[%s6566_s26 + $0xaf8] sm:$0xff] %v3200_v4  ;;  %v3203_v19 = vpop.f32.mrb[186].mxu1  ;;  %v2845_v38 = vadd.f32 %v2844_v30, %v7128_v26  ;;  %v2846_v6 = vpop.f32.mrb[187].mxu0 }
 0x39d   : > { %v3204_v41 = vadd.f32 %v3203_v19, %v7130_v0  ;;  %v3205_v59 = vpop.f32.mrb[187].mxu1  ;;  %v2847_v28 = vadd.f32 %v2846_v6, %v7134_v7 }
 0x39e   : > { %v3206_v34 = vadd.f32 %v3205_v59, %v7136_v12  ;;  %3588 = vst [vmem:[%s6566_s26 + $0xb20] sm:$0xff] %v2845_v38 }
 0x39f   : > { %3590 = vst [vmem:[%s6566_s26 + $0xb30] sm:$0xff] %v3204_v41  ;;  %3589 = vst [vmem:[%s6566_s26 + $0xb28] sm:$0xff] %v2847_v28  ;;  %v2850_v23 = vpop.f32.mrb[188].mxu0 }
 0x3a0   : > { %3591 = vst [vmem:[%s6566_s26 + $0xb38] sm:$0xff] %v3206_v34  ;;  %v3209_v20 = vpop.f32.mrb[188].mxu1  ;;  %v2851_v48 = vadd.f32 %v2850_v23, %v7128_v26  ;;  %v2852_v53 = vpop.f32.mrb[189].mxu0 }
 0x3a1   : > { %v3210_v46 = vadd.f32 %v3209_v20, %v7130_v0  ;;  %v3211_v43 = vpop.f32.mrb[189].mxu1  ;;  %v2853_v8 = vadd.f32 %v2852_v53, %v7134_v7 }
 0x3a2   : > { %v3212_v61 = vadd.f32 %v3211_v43, %v7136_v12  ;;  %3596 = vst [vmem:[%s6566_s26 + $0xb60] sm:$0xff] %v2851_v48 }
 0x3a3   : > { %3598 = vst [vmem:[%s6566_s26 + $0xb70] sm:$0xff] %v3210_v46  ;;  %3597 = vst [vmem:[%s6566_s26 + $0xb68] sm:$0xff] %v2853_v8  ;;  %v2856_v13 = vpop.f32.mrb[190].mxu0 }
 0x3a4   : > { %3599 = vst [vmem:[%s6566_s26 + $0xb78] sm:$0xff] %v3212_v61  ;;  %v3215_v16 = vpop.f32.mrb[190].mxu1  ;;  %v2857_v14 = vadd.f32 %v2856_v13, %v7128_v26  ;;  %v2858_v56 = vpop.f32.mrb[191].mxu0 }
 0x3a5   : > { %v3216_v37 = vadd.f32 %v3215_v16, %v7130_v0  ;;  %v3217_v3 = vpop.f32.mrb[191].mxu1  ;;  %v2859_v39 = vadd.f32 %v2858_v56, %v7134_v7 }
 0x3a6   : > { %v3218_v10 = vadd.f32 %v3217_v3, %v7136_v12  ;;  %3604 = vst [vmem:[%s6566_s26 + $0xba0] sm:$0xff] %v2857_v14 }
 0x3a7   : > { %3606 = vst [vmem:[%s6566_s26 + $0xbb0] sm:$0xff] %v3216_v37  ;;  %3605 = vst [vmem:[%s6566_s26 + $0xba8] sm:$0xff] %v2859_v39  ;;  %v2862_v24 = vpop.f32.mrb[192].mxu0 }
 0x3a8   : > { %3607 = vst [vmem:[%s6566_s26 + $0xbb8] sm:$0xff] %v3218_v10  ;;  %v3221_v54 = vpop.f32.mrb[192].mxu1  ;;  %v2863_v18 = vadd.f32 %v2862_v24, %v7128_v26  ;;  %v2864_v51 = vpop.f32.mrb[193].mxu0 }
 0x3a9   : > { %v3222_v36 = vadd.f32 %v3221_v54, %v7130_v0  ;;  %v3223_v27 = vpop.f32.mrb[193].mxu1  ;;  %v2865_v11 = vadd.f32 %v2864_v51, %v7134_v7 }
 0x3aa   : > { %v3224_v35 = vadd.f32 %v3223_v27, %v7136_v12  ;;  %3612 = vst [vmem:[%s6566_s26 + $0xbe0] sm:$0xff] %v2863_v18 }
 0x3ab   : > { %3614 = vst [vmem:[%s6566_s26 + $0xbf0] sm:$0xff] %v3222_v36  ;;  %3613 = vst [vmem:[%s6566_s26 + $0xbe8] sm:$0xff] %v2865_v11  ;;  %v2868_v32 = vpop.f32.mrb[194].mxu0 }
 0x3ac   : > { %3615 = vst [vmem:[%s6566_s26 + $0xbf8] sm:$0xff] %v3224_v35  ;;  %v3227_v63 = vpop.f32.mrb[194].mxu1  ;;  %v2869_v44 = vadd.f32 %v2868_v32, %v7128_v26  ;;  %v2870_v62 = vpop.f32.mrb[195].mxu0 }
 0x3ad   : > { %v3228_v9 = vadd.f32 %v3227_v63, %v7130_v0  ;;  %v3229_v57 = vpop.f32.mrb[195].mxu1  ;;  %v2871_v40 = vadd.f32 %v2870_v62, %v7134_v7 }
 0x3ae   : > { %v3230_v1 = vadd.f32 %v3229_v57, %v7136_v12  ;;  %3620 = vst [vmem:[%s6566_s26 + $0xc20] sm:$0xff] %v2869_v44 }
 0x3af   : > { %3622 = vst [vmem:[%s6566_s26 + $0xc30] sm:$0xff] %v3228_v9  ;;  %3621 = vst [vmem:[%s6566_s26 + $0xc28] sm:$0xff] %v2871_v40 }
 0x3b0   : > { %3623 = vst [vmem:[%s6566_s26 + $0xc38] sm:$0xff] %v3230_v1 }
 0x3b1   : > { %4476 = shalt.err (!%p4473_p13)
}
 0x3b2   : > { %s4477_s28 = scalar_lea.hbm %s7533_s16, 50176  ;;  %s4481_s13 = scalar_lea.hbm %s7590_s5, 100352 }
 0x3b3   : > { %p4478_p9 = scmp.ne.s32.totalorder %s7533_s16, %s4477_s28  ;;  %p4482_p6 = scmp.lt.u32.totalorder %s7533_s16, %s7590_s5 }
 0x3b4   : > { %p4483_p4 = scmp.lt.u32.totalorder %s4481_s13, %s4477_s28  ;;  %p4485_p3 = scmp.lt.u32.totalorder %s4477_s28, %s7533_s16 }
 0x3b5   : > { %p4479_p0 = pnand %p4478_p9, %p4741_p10 }
 0x3b6   : > { %p4484_p8 = por %p4483_p4, %p4482_p6 }
 0x3b7   : > { %p4480_p11 = pneg %p4479_p0 }
 0x3b8   : > { %p4486_p5 = por %p4485_p3, %p4484_p8 }
 0x3ba   : > { %p4487_p7 = pnand %p4486_p5, %p4480_p11 }
 0x3bc   : > { %4490 = shalt.err (!%p4487_p7)
}
 0x3bd   : > { %s4547_s27 = smov 1024   ;;  %s4548_s22 = smov 64  }
 0x3be   : > { %4051 = dma.vmem_to_hbm [thread:$0]  (%p4741_p10), %s7537_s11, 50176, %s7533_s16, %s3625_s6, %s4547_s27, %s4547_s27, %s4548_s22  }
 0x3bf PF: > { %s3654_s15 = sand.u32 1, %s4525_s18   ;;  %p8003_p12 = scmp.ne.s32.totalorder %s7735_s25, 0 }
 0x3c0   : > { %p8004_p1 = scmp.ge.s32.totalorder %s4537_s21, 2  ;;  %s3655_s9 = scalar_lea.sflag [#allocation4], %s3654_s15 }
 0x3c2   : > { %p4071_p2 = pnand %p8004_p1, %p8003_p12 }
 0x3c4   : > { %4520 = dma.done.wait (!%p4071_p2), %s3655_s9, 50176  }
 0x3c5   : > { %4522 = vsyncadd (!%p4071_p2), %s3655_s9, 4294917120  ;;  %p20_p13 = scmp.ge.s32.totalorder %s4731_s14, 4   ;;  %s8005_s18 = smov %s4529_s19 }
 0x3c6   : > { %s8006_s19 = smov %s4533_s20  ;;  %s8007_s20 = smov %s4747_s7 }
 0x3c7   : > { %s8008_s21 = smov %s4731_s14  ;;  %22 = sbr.rel (!%p20_p13) target bundleno = 7 (0x7), region = 101 }
 0x3ce   :  { %3660 = vsyncpa [#allocation3], 1 }
 0x3cf   :  { %3662 = vsyncpa [#allocation3 + $0x1], 1 }
 0x3d0   :  { %3663 = vsyncpa [#allocation6], 1 }
 0x3d1   :  { %3664 = vsyncpa [#allocation9], 1 }
 0x3d2   :  { %3665 = vsyncpa [#allocation4], 1 }
 0x3d3   :  { %3667 = vsyncpa [#allocation4 + $0x1], 1 }

</bundles_post_ra>
